<compile_context>
chip_gen: v5e
topology: v5e:2x2
jax: 0.10.0
libtpu: 0.0.40
codegen_flags: <defaults>
</compile_context>

<pallas_src>
import functools
import math

import jax
import jax.numpy as jnp
from jax import lax
from jax.experimental import pallas as pl
from jax.experimental.pallas import tpu as pltpu  # noqa: F401  (TPU backend)

D_MODEL = 32
N_HEADS = 4
D_FF = 64
N_LAYERS = 2
EPS = 1e-6
NEG_INF = -1e9


# --------------------------- fused Pallas kernel -----------------------------

def _decoder_kernel(
        x_ref, mem_ref, sbias_ref, xbias_ref,
        wq_s_ref, wk_s_ref, wv_s_ref, wo_s_ref,
        bq_s_ref, bk_s_ref, bv_s_ref, bo_s_ref,
        wq_x_ref, wk_x_ref, wv_x_ref, wo_x_ref,
        bq_x_ref, bk_x_ref, bv_x_ref, bo_x_ref,
        w1_ref, b1_ref, w2_ref, b2_ref,
        ln_g_ref, ln_b_ref, fin_g_ref, fin_b_ref,
        o_ref, *, B, T, S, D, H, L):
    """Whole decoder forward in one kernel.  Activations are kept as 2-D
    [B*T, D] / [B*S, D] slabs (batches stacked along sublanes); attention is
    unrolled over heads only."""
    f32 = jnp.float32
    bf16 = jnp.bfloat16
    dk = D // H
    scale = 1.0 / math.sqrt(dk)
    # Contract the last (feature) dim of both operands: Q @ K^T without
    # materialising a transpose through the XLU.
    qk_dims = (((1,), (1,)), ((), ()))

    def layer_norm(y, g, b):
        # annotated-transformer LayerNorm: g*(y-mu)/(std+eps)+b, unbiased std.
        mu = jnp.mean(y, axis=-1, keepdims=True)
        d = y - mu
        var = jnp.sum(d * d, axis=-1, keepdims=True) * (1.0 / (D - 1))
        return g * d / (jnp.sqrt(var) + EPS) + b      # exact divide (precision)

    def softmax_rows(s):
        s = s - jnp.max(s, axis=-1, keepdims=True)
        p = jnp.exp(s)
        return p * pl.reciprocal(jnp.sum(p, axis=-1, keepdims=True), approx=True)

    def project(y_bf, w_ref, b_ref, l):
        return jnp.dot(y_bf, w_ref[l], preferred_element_type=f32) + b_ref[l]

    def attention(q, k, v, bias, wo_ref, bo_ref, l):
        # q: (B*Lq, D), k/v: (B*Lk, D).  Batches are folded along sublanes;
        # `bias` is the block-diagonal additive mask (per-batch mask on the
        # diagonal blocks, -1e9 on all cross-batch blocks).
        qb, kb, vb = q.astype(bf16), k.astype(bf16), v.astype(bf16)
        out = None
        for h in range(H):
            lo, hi = h * dk, (h + 1) * dk
            s = lax.dot_general(qb[:, lo:hi], kb[:, lo:hi], qk_dims,
                                preferred_element_type=f32) * scale + bias
            p = softmax_rows(s).astype(bf16)
            ho = jnp.dot(p, vb[:, lo:hi], preferred_element_type=f32)
            # output projection fused per head: ctx @ Wo == sum_h head_h @ Wo[h]
            contrib = jnp.dot(ho.astype(bf16), wo_ref[l, h],
                              preferred_element_type=f32)
            out = contrib if out is None else out + contrib
        return out + bo_ref[l]

    x = x_ref[...]                          # (B*T, D) f32
    mem_bf = mem_ref[...].astype(bf16)      # (B*S, D) — reused by every layer
    sbias = sbias_ref[...]                  # (B*T, B*T) f32
    xbias = xbias_ref[...]                  # (B*T, B*S) f32

    for l in range(L):
        # --- sublayer 1: masked self-attention (pre-norm residual) ---
        yb = layer_norm(x, ln_g_ref[l, 0], ln_b_ref[l, 0]).astype(bf16)
        q = project(yb, wq_s_ref, bq_s_ref, l)
        k = project(yb, wk_s_ref, bk_s_ref, l)
        v = project(yb, wv_s_ref, bv_s_ref, l)
        x = x + attention(q, k, v, sbias, wo_s_ref, bo_s_ref, l)

        # --- sublayer 2: cross-attention over encoder memory ---
        yb = layer_norm(x, ln_g_ref[l, 1], ln_b_ref[l, 1]).astype(bf16)
        q = project(yb, wq_x_ref, bq_x_ref, l)
        k = jnp.dot(mem_bf, wk_x_ref[l], preferred_element_type=f32) + bk_x_ref[l]
        v = jnp.dot(mem_bf, wv_x_ref[l], preferred_element_type=f32) + bv_x_ref[l]
        x = x + attention(q, k, v, xbias, wo_x_ref, bo_x_ref, l)

        # --- sublayer 3: position-wise feed-forward ---
        yb = layer_norm(x, ln_g_ref[l, 2], ln_b_ref[l, 2]).astype(bf16)
        h1 = jnp.maximum(
            jnp.dot(yb, w1_ref[l], preferred_element_type=f32) + b1_ref[l], 0.0)
        x = x + jnp.dot(h1.astype(bf16), w2_ref[l],
                        preferred_element_type=f32) + b2_ref[l]

    # final LayerNorm
    o_ref[...] = layer_norm(x, fin_g_ref[...], fin_b_ref[...])


# --------------------------- wrapper ------------------------------------------

def fuse_params(params):
    """Stack per-layer weights once (outside the hot path).  Matmul weights are
    cast to bf16 (MXU-native), Wo is pre-split per head as (L, H, dk, D) so the
    output projection can be fused into the head loop."""
    layers = params["layers"]
    dk = D_MODEL // N_HEADS
    bf16 = jnp.bfloat16
    stack = lambda fn: jnp.stack([fn(p) for p in layers], axis=0)
    split_heads = lambda w: w.reshape(N_HEADS, dk, D_MODEL)
    return {
        "wq_s": stack(lambda p: p["self_attn"]["wq"]).astype(bf16),
        "wk_s": stack(lambda p: p["self_attn"]["wk"]).astype(bf16),
        "wv_s": stack(lambda p: p["self_attn"]["wv"]).astype(bf16),
        "wo_s": stack(lambda p: split_heads(p["self_attn"]["wo"])).astype(bf16),
        "bq_s": stack(lambda p: p["self_attn"]["bq"]),
        "bk_s": stack(lambda p: p["self_attn"]["bk"]),
        "bv_s": stack(lambda p: p["self_attn"]["bv"]),
        "bo_s": stack(lambda p: p["self_attn"]["bo"]),
        "wq_x": stack(lambda p: p["src_attn"]["wq"]).astype(bf16),
        "wk_x": stack(lambda p: p["src_attn"]["wk"]).astype(bf16),
        "wv_x": stack(lambda p: p["src_attn"]["wv"]).astype(bf16),
        "wo_x": stack(lambda p: split_heads(p["src_attn"]["wo"])).astype(bf16),
        "bq_x": stack(lambda p: p["src_attn"]["bq"]),
        "bk_x": stack(lambda p: p["src_attn"]["bk"]),
        "bv_x": stack(lambda p: p["src_attn"]["bv"]),
        "bo_x": stack(lambda p: p["src_attn"]["bo"]),
        "w1": stack(lambda p: p["w1"]).astype(bf16),
        "b1": stack(lambda p: p["b1"]),
        "w2": stack(lambda p: p["w2"]).astype(bf16),
        "b2": stack(lambda p: p["b2"]),
        "ln_g": stack(lambda p: jnp.stack(
            [p["ln1_g"], p["ln2_g"], p["ln3_g"]], axis=0)),   # (L,3,1,D)
        "ln_b": stack(lambda p: jnp.stack(
            [p["ln1_b"], p["ln2_b"], p["ln3_b"]], axis=0)),
        "norm_g": params["norm_g"], "norm_b": params["norm_b"],
    }


def build_attention_biases(src_mask, tgt_mask, T):
    """Block-diagonal additive attention biases for the batch-folded layout:
    diagonal blocks carry the per-batch mask, off-diagonal (cross-batch)
    blocks are -1e9."""
    B = tgt_mask.shape[0]
    S = src_mask.shape[-1]
    eye = jnp.eye(B, dtype=jnp.float32)
    tgt_allow = (tgt_mask != 0).astype(jnp.float32).reshape(B, T, T)
    self_allow = jnp.einsum("ij,iqk->iqjk", eye, tgt_allow).reshape(B * T, B * T)
    src_allow = jnp.broadcast_to(
        (src_mask != 0).astype(jnp.float32).reshape(B, 1, S), (B, T, S))
    cross_allow = jnp.einsum("ij,iqk->iqjk", eye, src_allow).reshape(B * T, B * S)
    to_bias = lambda a: jnp.where(a > 0, 0.0, NEG_INF).astype(jnp.float32)
    return to_bias(self_allow), to_bias(cross_allow)


def decoder_apply(fp, x, memory, src_mask, tgt_mask):
    B, T, D = x.shape
    S = memory.shape[1]
    L = fp["wq_s"].shape[0]
    self_bias, cross_bias = build_attention_biases(src_mask, tgt_mask, T)
    kernel = functools.partial(_decoder_kernel,
                               B=B, T=T, S=S, D=D, H=N_HEADS, L=L)
    out = pl.pallas_call(
        kernel,
        out_shape=jax.ShapeDtypeStruct((B * T, D), jnp.float32),
    )(x.reshape(B * T, D).astype(jnp.float32),
      memory.reshape(B * S, D).astype(jnp.float32),
      self_bias, cross_bias,
      fp["wq_s"], fp["wk_s"], fp["wv_s"], fp["wo_s"],
      fp["bq_s"], fp["bk_s"], fp["bv_s"], fp["bo_s"],
      fp["wq_x"], fp["wk_x"], fp["wv_x"], fp["wo_x"],
      fp["bq_x"], fp["bk_x"], fp["bv_x"], fp["bo_x"],
      fp["w1"], fp["b1"], fp["w2"], fp["b2"],
      fp["ln_g"], fp["ln_b"], fp["norm_g"], fp["norm_b"])
    return out.reshape(B, T, D)


# --------------------------- pure-JAX reference -------------------------------

def decoder_reference(params, x, memory, src_mask, tgt_mask):
    B, _, D = x.shape
    h, dk = N_HEADS, D // N_HEADS

    def ln(y, g, b):
        mu = jnp.mean(y, axis=-1, keepdims=True)
        var = jnp.sum((y - mu) ** 2, axis=-1, keepdims=True) / (D - 1)
        return g * (y - mu) / (jnp.sqrt(var) + EPS) + b

    def mha(xq, xkv, mask, p):
        Tq = xq.shape[1]

        def split(t):
            return jnp.transpose(t.reshape(B, -1, h, dk), (0, 2, 1, 3))

        q = split(xq @ p["wq"] + p["bq"])
        k = split(xkv @ p["wk"] + p["bk"])
        v = split(xkv @ p["wv"] + p["bv"])
        s = jnp.einsum("bhqd,bhkd->bhqk", q, k) / math.sqrt(dk)
        s = jnp.where(mask[:, None] == 0, -1e9, s)
        a = jax.nn.softmax(s, axis=-1)
        o = jnp.einsum("bhqk,bhkd->bhqd", a, v)
        o = jnp.transpose(o, (0, 2, 1, 3)).reshape(B, Tq, D)
        return o @ p["wo"] + p["bo"]

    for p in params["layers"]:
        y = ln(x, p["ln1_g"], p["ln1_b"])
        x = x + mha(y, y, tgt_mask, p["self_attn"])
        y = ln(x, p["ln2_g"], p["ln2_b"])
        x = x + mha(y, memory, src_mask, p["src_attn"])
        y = ln(x, p["ln3_g"], p["ln3_b"])
        x = x + jnp.maximum(y @ p["w1"] + p["b1"], 0.0) @ p["w2"] + p["b2"]
    return ln(x, params["norm_g"], params["norm_b"])


# --------------------------- parameter init ----------------------------------

def init_params(key):
    keys = iter(jax.random.split(key, 256))

    def w(din, dout):
        return 0.02 * jax.random.normal(next(keys), (din, dout), jnp.float32)

    def b(dout):
        return jnp.zeros((1, dout), jnp.float32)

    def attn_params():
        return {"wq": w(D_MODEL, D_MODEL), "bq": b(D_MODEL),
                "wk": w(D_MODEL, D_MODEL), "bk": b(D_MODEL),
                "wv": w(D_MODEL, D_MODEL), "bv": b(D_MODEL),
                "wo": w(D_MODEL, D_MODEL), "bo": b(D_MODEL)}

    layers = []
    for _ in range(N_LAYERS):
        layers.append({
            "self_attn": attn_params(),
            "src_attn": attn_params(),
            "w1": w(D_MODEL, D_FF), "b1": b(D_FF),
            "w2": w(D_FF, D_MODEL), "b2": b(D_MODEL),
            "ln1_g": jnp.ones((1, D_MODEL), jnp.float32), "ln1_b": b(D_MODEL),
            "ln2_g": jnp.ones((1, D_MODEL), jnp.float32), "ln2_b": b(D_MODEL),
            "ln3_g": jnp.ones((1, D_MODEL), jnp.float32), "ln3_b": b(D_MODEL),
        })
    return {"layers": layers,
            "norm_g": jnp.ones((1, D_MODEL), jnp.float32),
            "norm_b": b(D_MODEL)}


if __name__ == "__main__":
    B, T, S = 2, 8, 8
    key = jax.random.PRNGKey(0)
    kx, km, kp = jax.random.split(key, 3)
    x = jax.random.normal(kx, (B, T, D_MODEL), jnp.float32)
    memory = jax.random.normal(km, (B, S, D_MODEL), jnp.float32)
    # target mask: causal (subsequent) mask; source mask: all-visible padding mask
    tgt_mask = jnp.broadcast_to(
        jnp.tril(jnp.ones((T, T), jnp.int32))[None], (B, T, T))
    src_mask = jnp.ones((B, 1, S), jnp.int32)
    params = init_params(kp)
    fused = fuse_params(params)

    out = jax.jit(decoder_apply)(fused, x, memory, src_mask, tgt_mask)
    jax.block_until_ready(out)
    assert out.shape == (B, T, D_MODEL)

    # sanity check vs pure-JAX f32 reference (bf16 MXU operands + approx
    # softmax reciprocal in the kernel -> loose-ish tolerance)
    ref = decoder_reference(params, x, memory, src_mask, tgt_mask)
    max_err = float(jnp.max(jnp.abs(out - ref)))
    assert max_err < 5e-2, f"mismatch vs reference: {max_err}"
    print("KERNEL_OK")
</pallas_src>

<mosaic_0001>
module attributes {stable_mosaic.version = 11 : i64} {
  func.func @_decoder_kernel(%arg0: memref<16x32xf32, #tpu.memory_space<vmem>>, %arg1: memref<16x32xf32, #tpu.memory_space<vmem>>, %arg2: memref<16x16xf32, #tpu.memory_space<vmem>>, %arg3: memref<16x16xf32, #tpu.memory_space<vmem>>, %arg4: memref<2x32x32xbf16, #tpu.memory_space<vmem>>, %arg5: memref<2x32x32xbf16, #tpu.memory_space<vmem>>, %arg6: memref<2x32x32xbf16, #tpu.memory_space<vmem>>, %arg7: memref<2x4x8x32xbf16, #tpu.memory_space<vmem>>, %arg8: memref<2x1x32xf32, #tpu.memory_space<vmem>>, %arg9: memref<2x1x32xf32, #tpu.memory_space<vmem>>, %arg10: memref<2x1x32xf32, #tpu.memory_space<vmem>>, %arg11: memref<2x1x32xf32, #tpu.memory_space<vmem>>, %arg12: memref<2x32x32xbf16, #tpu.memory_space<vmem>>, %arg13: memref<2x32x32xbf16, #tpu.memory_space<vmem>>, %arg14: memref<2x32x32xbf16, #tpu.memory_space<vmem>>, %arg15: memref<2x4x8x32xbf16, #tpu.memory_space<vmem>>, %arg16: memref<2x1x32xf32, #tpu.memory_space<vmem>>, %arg17: memref<2x1x32xf32, #tpu.memory_space<vmem>>, %arg18: memref<2x1x32xf32, #tpu.memory_space<vmem>>, %arg19: memref<2x1x32xf32, #tpu.memory_space<vmem>>, %arg20: memref<2x32x64xbf16, #tpu.memory_space<vmem>>, %arg21: memref<2x1x64xf32, #tpu.memory_space<vmem>>, %arg22: memref<2x64x32xbf16, #tpu.memory_space<vmem>>, %arg23: memref<2x1x32xf32, #tpu.memory_space<vmem>>, %arg24: memref<2x3x1x32xf32, #tpu.memory_space<vmem>>, %arg25: memref<2x3x1x32xf32, #tpu.memory_space<vmem>>, %arg26: memref<1x32xf32, #tpu.memory_space<vmem>>, %arg27: memref<1x32xf32, #tpu.memory_space<vmem>>, %arg28: memref<16x32xf32, #tpu.memory_space<vmem>>) attributes {dimension_semantics = [], scalar_prefetch = 0 : i64, scratch_operands = 0 : i64, tpu.core_type = #tpu.core_type<tc>} {
    %c0 = arith.constant 0 : index
    %c0_0 = arith.constant 0 : index
    %0 = vector.load %arg0[%c0, %c0_0] : memref<16x32xf32, #tpu.memory_space<vmem>>, vector<16x32xf32>
    %c0_1 = arith.constant 0 : index
    %c0_2 = arith.constant 0 : index
    %1 = vector.load %arg1[%c0_1, %c0_2] : memref<16x32xf32, #tpu.memory_space<vmem>>, vector<16x32xf32>
    %2 = arith.truncf %1 : vector<16x32xf32> to vector<16x32xbf16>
    %c0_3 = arith.constant 0 : index
    %c0_4 = arith.constant 0 : index
    %3 = vector.load %arg2[%c0_3, %c0_4] : memref<16x16xf32, #tpu.memory_space<vmem>>, vector<16x16xf32>
    %c0_5 = arith.constant 0 : index
    %c0_6 = arith.constant 0 : index
    %4 = vector.load %arg3[%c0_5, %c0_6] : memref<16x16xf32, #tpu.memory_space<vmem>>, vector<16x16xf32>
    %c0_7 = arith.constant 0 : index
    %c0_8 = arith.constant 0 : index
    %c0_9 = arith.constant 0 : index
    %c0_10 = arith.constant 0 : index
    %5 = vector.load %arg24[%c0_7, %c0_8, %c0_9, %c0_10] : memref<2x3x1x32xf32, #tpu.memory_space<vmem>>, vector<1x1x1x32xf32>
    %6 = vector.shape_cast %5 : vector<1x1x1x32xf32> to vector<1x32xf32>
    %c0_11 = arith.constant 0 : index
    %c0_12 = arith.constant 0 : index
    %c0_13 = arith.constant 0 : index
    %c0_14 = arith.constant 0 : index
    %7 = vector.load %arg25[%c0_11, %c0_12, %c0_13, %c0_14] : memref<2x3x1x32xf32, #tpu.memory_space<vmem>>, vector<1x1x1x32xf32>
    %8 = vector.shape_cast %7 : vector<1x1x1x32xf32> to vector<1x32xf32>
    %cst = arith.constant dense<0.000000e+00> : vector<16xf32>
    %9 = vector.multi_reduction <add>, %0, %cst [1] : vector<16x32xf32> to vector<16xf32>
    %10 = vector.shape_cast %9 : vector<16xf32> to vector<16x1xf32>
    %cst_15 = arith.constant 3.200000e+01 : f32
    %11 = vector.broadcast %cst_15 : f32 to vector<16x1xf32>
    %12 = arith.divf %10, %11 : vector<16x1xf32>
    %13 = vector.broadcast %12 : vector<16x1xf32> to vector<16x32xf32>
    %14 = arith.subf %0, %13 : vector<16x32xf32>
    %15 = arith.mulf %14, %14 : vector<16x32xf32>
    %cst_16 = arith.constant dense<0.000000e+00> : vector<16xf32>
    %16 = vector.multi_reduction <add>, %15, %cst_16 [1] : vector<16x32xf32> to vector<16xf32>
    %17 = vector.shape_cast %16 : vector<16xf32> to vector<16x1xf32>
    %cst_17 = arith.constant 0.0322580636 : f32
    %18 = vector.broadcast %cst_17 : f32 to vector<16x1xf32>
    %19 = arith.mulf %17, %18 : vector<16x1xf32>
    %20 = vector.broadcast %6 : vector<1x32xf32> to vector<16x32xf32>
    %21 = arith.mulf %20, %14 : vector<16x32xf32>
    %22 = math.sqrt %19 : vector<16x1xf32>
    %cst_18 = arith.constant 9.99999997E-7 : f32
    %23 = vector.broadcast %cst_18 : f32 to vector<16x1xf32>
    %24 = arith.addf %22, %23 : vector<16x1xf32>
    %25 = vector.broadcast %24 : vector<16x1xf32> to vector<16x32xf32>
    %26 = arith.divf %21, %25 : vector<16x32xf32>
    %27 = vector.broadcast %8 : vector<1x32xf32> to vector<16x32xf32>
    %28 = arith.addf %26, %27 : vector<16x32xf32>
    %29 = arith.truncf %28 : vector<16x32xf32> to vector<16x32xbf16>
    %c0_19 = arith.constant 0 : index
    %c0_20 = arith.constant 0 : index
    %c0_21 = arith.constant 0 : index
    %30 = vector.load %arg4[%c0_19, %c0_20, %c0_21] : memref<2x32x32xbf16, #tpu.memory_space<vmem>>, vector<1x32x32xbf16>
    %31 = vector.shape_cast %30 : vector<1x32x32xbf16> to vector<32x32xbf16>
    %cst_22 = arith.constant dense<0.000000e+00> : vector<16x32xf32>
    %32 = tpu.matmul %29, %31, %cst_22 {dimension_numbers = #tpu.dot_dimension_numbers<[1], [0], [0], [1], [0, 0, 1, 1], [], []>} : vector<16x32xbf16>, vector<32x32xbf16>, vector<16x32xf32> -> vector<16x32xf32>
    %c0_23 = arith.constant 0 : index
    %c0_24 = arith.constant 0 : index
    %c0_25 = arith.constant 0 : index
    %33 = vector.load %arg8[%c0_23, %c0_24, %c0_25] : memref<2x1x32xf32, #tpu.memory_space<vmem>>, vector<1x1x32xf32>
    %34 = vector.shape_cast %33 : vector<1x1x32xf32> to vector<1x32xf32>
    %35 = vector.broadcast %34 : vector<1x32xf32> to vector<16x32xf32>
    %36 = arith.addf %32, %35 : vector<16x32xf32>
    %c0_26 = arith.constant 0 : index
    %c0_27 = arith.constant 0 : index
    %c0_28 = arith.constant 0 : index
    %37 = vector.load %arg5[%c0_26, %c0_27, %c0_28] : memref<2x32x32xbf16, #tpu.memory_space<vmem>>, vector<1x32x32xbf16>
    %38 = vector.shape_cast %37 : vector<1x32x32xbf16> to vector<32x32xbf16>
    %cst_29 = arith.constant dense<0.000000e+00> : vector<16x32xf32>
    %39 = tpu.matmul %29, %38, %cst_29 {dimension_numbers = #tpu.dot_dimension_numbers<[1], [0], [0], [1], [0, 0, 1, 1], [], []>} : vector<16x32xbf16>, vector<32x32xbf16>, vector<16x32xf32> -> vector<16x32xf32>
    %c0_30 = arith.constant 0 : index
    %c0_31 = arith.constant 0 : index
    %c0_32 = arith.constant 0 : index
    %40 = vector.load %arg9[%c0_30, %c0_31, %c0_32] : memref<2x1x32xf32, #tpu.memory_space<vmem>>, vector<1x1x32xf32>
    %41 = vector.shape_cast %40 : vector<1x1x32xf32> to vector<1x32xf32>
    %42 = vector.broadcast %41 : vector<1x32xf32> to vector<16x32xf32>
    %43 = arith.addf %39, %42 : vector<16x32xf32>
    %c0_33 = arith.constant 0 : index
    %c0_34 = arith.constant 0 : index
    %c0_35 = arith.constant 0 : index
    %44 = vector.load %arg6[%c0_33, %c0_34, %c0_35] : memref<2x32x32xbf16, #tpu.memory_space<vmem>>, vector<1x32x32xbf16>
    %45 = vector.shape_cast %44 : vector<1x32x32xbf16> to vector<32x32xbf16>
    %cst_36 = arith.constant dense<0.000000e+00> : vector<16x32xf32>
    %46 = tpu.matmul %29, %45, %cst_36 {dimension_numbers = #tpu.dot_dimension_numbers<[1], [0], [0], [1], [0, 0, 1, 1], [], []>} : vector<16x32xbf16>, vector<32x32xbf16>, vector<16x32xf32> -> vector<16x32xf32>
    %c0_37 = arith.constant 0 : index
    %c0_38 = arith.constant 0 : index
    %c0_39 = arith.constant 0 : index
    %47 = vector.load %arg10[%c0_37, %c0_38, %c0_39] : memref<2x1x32xf32, #tpu.memory_space<vmem>>, vector<1x1x32xf32>
    %48 = vector.shape_cast %47 : vector<1x1x32xf32> to vector<1x32xf32>
    %49 = vector.broadcast %48 : vector<1x32xf32> to vector<16x32xf32>
    %50 = arith.addf %46, %49 : vector<16x32xf32>
    %51 = arith.truncf %36 : vector<16x32xf32> to vector<16x32xbf16>
    %52 = arith.truncf %43 : vector<16x32xf32> to vector<16x32xbf16>
    %53 = arith.truncf %50 : vector<16x32xf32> to vector<16x32xbf16>
    %54 = vector.extract_strided_slice %51 {offsets = [0, 0], sizes = [16, 8], strides = [1, 1]} : vector<16x32xbf16> to vector<16x8xbf16>
    %55 = vector.extract_strided_slice %52 {offsets = [0, 0], sizes = [16, 8], strides = [1, 1]} : vector<16x32xbf16> to vector<16x8xbf16>
    %cst_40 = arith.constant dense<0.000000e+00> : vector<16x16xf32>
    %56 = tpu.matmul %54, %55, %cst_40 {dimension_numbers = #tpu.dot_dimension_numbers<[1], [1], [0], [0], [0, 0, 1, 0], [], []>} : vector<16x8xbf16>, vector<16x8xbf16>, vector<16x16xf32> -> vector<16x16xf32>
    %cst_41 = arith.constant 0.353553385 : f32
    %57 = vector.broadcast %cst_41 : f32 to vector<16x16xf32>
    %58 = arith.mulf %56, %57 : vector<16x16xf32>
    %59 = arith.addf %58, %3 : vector<16x16xf32>
    %cst_42 = arith.constant dense<0xFF800000> : vector<16xf32>
    %60 = vector.multi_reduction <maximumf>, %59, %cst_42 [1] : vector<16x16xf32> to vector<16xf32>
    %61 = vector.shape_cast %60 : vector<16xf32> to vector<16x1xf32>
    %62 = vector.broadcast %61 : vector<16x1xf32> to vector<16x16xf32>
    %63 = arith.subf %59, %62 : vector<16x16xf32>
    %64 = math.exp %63 : vector<16x16xf32>
    %cst_43 = arith.constant dense<0.000000e+00> : vector<16xf32>
    %65 = vector.multi_reduction <add>, %64, %cst_43 [1] : vector<16x16xf32> to vector<16xf32>
    %66 = vector.shape_cast %65 : vector<16xf32> to vector<16x1xf32>
    %67 = tpu.reciprocal %66 {approx = true} : vector<16x1xf32> -> vector<16x1xf32>
    %68 = vector.broadcast %67 : vector<16x1xf32> to vector<16x16xf32>
    %69 = arith.mulf %64, %68 : vector<16x16xf32>
    %70 = arith.truncf %69 : vector<16x16xf32> to vector<16x16xbf16>
    %71 = vector.extract_strided_slice %53 {offsets = [0, 0], sizes = [16, 8], strides = [1, 1]} : vector<16x32xbf16> to vector<16x8xbf16>
    %cst_44 = arith.constant dense<0.000000e+00> : vector<16x8xf32>
    %72 = tpu.matmul %70, %71, %cst_44 {dimension_numbers = #tpu.dot_dimension_numbers<[1], [0], [0], [1], [0, 0, 1, 1], [], []>} : vector<16x16xbf16>, vector<16x8xbf16>, vector<16x8xf32> -> vector<16x8xf32>
    %73 = arith.truncf %72 : vector<16x8xf32> to vector<16x8xbf16>
    %c0_45 = arith.constant 0 : index
    %c0_46 = arith.constant 0 : index
    %c0_47 = arith.constant 0 : index
    %c0_48 = arith.constant 0 : index
    %74 = vector.load %arg7[%c0_45, %c0_46, %c0_47, %c0_48] : memref<2x4x8x32xbf16, #tpu.memory_space<vmem>>, vector<1x1x8x32xbf16>
    %75 = vector.shape_cast %74 : vector<1x1x8x32xbf16> to vector<8x32xbf16>
    %cst_49 = arith.constant dense<0.000000e+00> : vector<16x32xf32>
    %76 = tpu.matmul %73, %75, %cst_49 {dimension_numbers = #tpu.dot_dimension_numbers<[1], [0], [0], [1], [0, 0, 1, 1], [], []>} : vector<16x8xbf16>, vector<8x32xbf16>, vector<16x32xf32> -> vector<16x32xf32>
    %77 = vector.extract_strided_slice %51 {offsets = [0, 8], sizes = [16, 8], strides = [1, 1]} : vector<16x32xbf16> to vector<16x8xbf16>
    %78 = vector.extract_strided_slice %52 {offsets = [0, 8], sizes = [16, 8], strides = [1, 1]} : vector<16x32xbf16> to vector<16x8xbf16>
    %cst_50 = arith.constant dense<0.000000e+00> : vector<16x16xf32>
    %79 = tpu.matmul %77, %78, %cst_50 {dimension_numbers = #tpu.dot_dimension_numbers<[1], [1], [0], [0], [0, 0, 1, 0], [], []>} : vector<16x8xbf16>, vector<16x8xbf16>, vector<16x16xf32> -> vector<16x16xf32>
    %cst_51 = arith.constant 0.353553385 : f32
    %80 = vector.broadcast %cst_51 : f32 to vector<16x16xf32>
    %81 = arith.mulf %79, %80 : vector<16x16xf32>
    %82 = arith.addf %81, %3 : vector<16x16xf32>
    %cst_52 = arith.constant dense<0xFF800000> : vector<16xf32>
    %83 = vector.multi_reduction <maximumf>, %82, %cst_52 [1] : vector<16x16xf32> to vector<16xf32>
    %84 = vector.shape_cast %83 : vector<16xf32> to vector<16x1xf32>
    %85 = vector.broadcast %84 : vector<16x1xf32> to vector<16x16xf32>
    %86 = arith.subf %82, %85 : vector<16x16xf32>
    %87 = math.exp %86 : vector<16x16xf32>
    %cst_53 = arith.constant dense<0.000000e+00> : vector<16xf32>
    %88 = vector.multi_reduction <add>, %87, %cst_53 [1] : vector<16x16xf32> to vector<16xf32>
    %89 = vector.shape_cast %88 : vector<16xf32> to vector<16x1xf32>
    %90 = tpu.reciprocal %89 {approx = true} : vector<16x1xf32> -> vector<16x1xf32>
    %91 = vector.broadcast %90 : vector<16x1xf32> to vector<16x16xf32>
    %92 = arith.mulf %87, %91 : vector<16x16xf32>
    %93 = arith.truncf %92 : vector<16x16xf32> to vector<16x16xbf16>
    %94 = vector.extract_strided_slice %53 {offsets = [0, 8], sizes = [16, 8], strides = [1, 1]} : vector<16x32xbf16> to vector<16x8xbf16>
    %cst_54 = arith.constant dense<0.000000e+00> : vector<16x8xf32>
    %95 = tpu.matmul %93, %94, %cst_54 {dimension_numbers = #tpu.dot_dimension_numbers<[1], [0], [0], [1], [0, 0, 1, 1], [], []>} : vector<16x16xbf16>, vector<16x8xbf16>, vector<16x8xf32> -> vector<16x8xf32>
    %96 = arith.truncf %95 : vector<16x8xf32> to vector<16x8xbf16>
    %c0_55 = arith.constant 0 : index
    %c1 = arith.constant 1 : index
    %c0_56 = arith.constant 0 : index
    %c0_57 = arith.constant 0 : index
    %97 = vector.load %arg7[%c0_55, %c1, %c0_56, %c0_57] : memref<2x4x8x32xbf16, #tpu.memory_space<vmem>>, vector<1x1x8x32xbf16>
    %98 = vector.shape_cast %97 : vector<1x1x8x32xbf16> to vector<8x32xbf16>
    %cst_58 = arith.constant dense<0.000000e+00> : vector<16x32xf32>
    %99 = tpu.matmul %96, %98, %cst_58 {dimension_numbers = #tpu.dot_dimension_numbers<[1], [0], [0], [1], [0, 0, 1, 1], [], []>} : vector<16x8xbf16>, vector<8x32xbf16>, vector<16x32xf32> -> vector<16x32xf32>
    %100 = arith.addf %76, %99 : vector<16x32xf32>
    %101 = vector.extract_strided_slice %51 {offsets = [0, 16], sizes = [16, 8], strides = [1, 1]} : vector<16x32xbf16> to vector<16x8xbf16>
    %102 = vector.extract_strided_slice %52 {offsets = [0, 16], sizes = [16, 8], strides = [1, 1]} : vector<16x32xbf16> to vector<16x8xbf16>
    %cst_59 = arith.constant dense<0.000000e+00> : vector<16x16xf32>
    %103 = tpu.matmul %101, %102, %cst_59 {dimension_numbers = #tpu.dot_dimension_numbers<[1], [1], [0], [0], [0, 0, 1, 0], [], []>} : vector<16x8xbf16>, vector<16x8xbf16>, vector<16x16xf32> -> vector<16x16xf32>
    %cst_60 = arith.constant 0.353553385 : f32
    %104 = vector.broadcast %cst_60 : f32 to vector<16x16xf32>
    %105 = arith.mulf %103, %104 : vector<16x16xf32>
    %106 = arith.addf %105, %3 : vector<16x16xf32>
    %cst_61 = arith.constant dense<0xFF800000> : vector<16xf32>
    %107 = vector.multi_reduction <maximumf>, %106, %cst_61 [1] : vector<16x16xf32> to vector<16xf32>
    %108 = vector.shape_cast %107 : vector<16xf32> to vector<16x1xf32>
    %109 = vector.broadcast %108 : vector<16x1xf32> to vector<16x16xf32>
    %110 = arith.subf %106, %109 : vector<16x16xf32>
    %111 = math.exp %110 : vector<16x16xf32>
    %cst_62 = arith.constant dense<0.000000e+00> : vector<16xf32>
    %112 = vector.multi_reduction <add>, %111, %cst_62 [1] : vector<16x16xf32> to vector<16xf32>
    %113 = vector.shape_cast %112 : vector<16xf32> to vector<16x1xf32>
    %114 = tpu.reciprocal %113 {approx = true} : vector<16x1xf32> -> vector<16x1xf32>
    %115 = vector.broadcast %114 : vector<16x1xf32> to vector<16x16xf32>
    %116 = arith.mulf %111, %115 : vector<16x16xf32>
    %117 = arith.truncf %116 : vector<16x16xf32> to vector<16x16xbf16>
    %118 = vector.extract_strided_slice %53 {offsets = [0, 16], sizes = [16, 8], strides = [1, 1]} : vector<16x32xbf16> to vector<16x8xbf16>
    %cst_63 = arith.constant dense<0.000000e+00> : vector<16x8xf32>
    %119 = tpu.matmul %117, %118, %cst_63 {dimension_numbers = #tpu.dot_dimension_numbers<[1], [0], [0], [1], [0, 0, 1, 1], [], []>} : vector<16x16xbf16>, vector<16x8xbf16>, vector<16x8xf32> -> vector<16x8xf32>
    %120 = arith.truncf %119 : vector<16x8xf32> to vector<16x8xbf16>
    %c0_64 = arith.constant 0 : index
    %c2 = arith.constant 2 : index
    %c0_65 = arith.constant 0 : index
    %c0_66 = arith.constant 0 : index
    %121 = vector.load %arg7[%c0_64, %c2, %c0_65, %c0_66] : memref<2x4x8x32xbf16, #tpu.memory_space<vmem>>, vector<1x1x8x32xbf16>
    %122 = vector.shape_cast %121 : vector<1x1x8x32xbf16> to vector<8x32xbf16>
    %cst_67 = arith.constant dense<0.000000e+00> : vector<16x32xf32>
    %123 = tpu.matmul %120, %122, %cst_67 {dimension_numbers = #tpu.dot_dimension_numbers<[1], [0], [0], [1], [0, 0, 1, 1], [], []>} : vector<16x8xbf16>, vector<8x32xbf16>, vector<16x32xf32> -> vector<16x32xf32>
    %124 = arith.addf %100, %123 : vector<16x32xf32>
    %125 = vector.extract_strided_slice %51 {offsets = [0, 24], sizes = [16, 8], strides = [1, 1]} : vector<16x32xbf16> to vector<16x8xbf16>
    %126 = vector.extract_strided_slice %52 {offsets = [0, 24], sizes = [16, 8], strides = [1, 1]} : vector<16x32xbf16> to vector<16x8xbf16>
    %cst_68 = arith.constant dense<0.000000e+00> : vector<16x16xf32>
    %127 = tpu.matmul %125, %126, %cst_68 {dimension_numbers = #tpu.dot_dimension_numbers<[1], [1], [0], [0], [0, 0, 1, 0], [], []>} : vector<16x8xbf16>, vector<16x8xbf16>, vector<16x16xf32> -> vector<16x16xf32>
    %cst_69 = arith.constant 0.353553385 : f32
    %128 = vector.broadcast %cst_69 : f32 to vector<16x16xf32>
    %129 = arith.mulf %127, %128 : vector<16x16xf32>
    %130 = arith.addf %129, %3 : vector<16x16xf32>
    %cst_70 = arith.constant dense<0xFF800000> : vector<16xf32>
    %131 = vector.multi_reduction <maximumf>, %130, %cst_70 [1] : vector<16x16xf32> to vector<16xf32>
    %132 = vector.shape_cast %131 : vector<16xf32> to vector<16x1xf32>
    %133 = vector.broadcast %132 : vector<16x1xf32> to vector<16x16xf32>
    %134 = arith.subf %130, %133 : vector<16x16xf32>
    %135 = math.exp %134 : vector<16x16xf32>
    %cst_71 = arith.constant dense<0.000000e+00> : vector<16xf32>
    %136 = vector.multi_reduction <add>, %135, %cst_71 [1] : vector<16x16xf32> to vector<16xf32>
    %137 = vector.shape_cast %136 : vector<16xf32> to vector<16x1xf32>
    %138 = tpu.reciprocal %137 {approx = true} : vector<16x1xf32> -> vector<16x1xf32>
    %139 = vector.broadcast %138 : vector<16x1xf32> to vector<16x16xf32>
    %140 = arith.mulf %135, %139 : vector<16x16xf32>
    %141 = arith.truncf %140 : vector<16x16xf32> to vector<16x16xbf16>
    %142 = vector.extract_strided_slice %53 {offsets = [0, 24], sizes = [16, 8], strides = [1, 1]} : vector<16x32xbf16> to vector<16x8xbf16>
    %cst_72 = arith.constant dense<0.000000e+00> : vector<16x8xf32>
    %143 = tpu.matmul %141, %142, %cst_72 {dimension_numbers = #tpu.dot_dimension_numbers<[1], [0], [0], [1], [0, 0, 1, 1], [], []>} : vector<16x16xbf16>, vector<16x8xbf16>, vector<16x8xf32> -> vector<16x8xf32>
    %144 = arith.truncf %143 : vector<16x8xf32> to vector<16x8xbf16>
    %c0_73 = arith.constant 0 : index
    %c3 = arith.constant 3 : index
    %c0_74 = arith.constant 0 : index
    %c0_75 = arith.constant 0 : index
    %145 = vector.load %arg7[%c0_73, %c3, %c0_74, %c0_75] : memref<2x4x8x32xbf16, #tpu.memory_space<vmem>>, vector<1x1x8x32xbf16>
    %146 = vector.shape_cast %145 : vector<1x1x8x32xbf16> to vector<8x32xbf16>
    %cst_76 = arith.constant dense<0.000000e+00> : vector<16x32xf32>
    %147 = tpu.matmul %144, %146, %cst_76 {dimension_numbers = #tpu.dot_dimension_numbers<[1], [0], [0], [1], [0, 0, 1, 1], [], []>} : vector<16x8xbf16>, vector<8x32xbf16>, vector<16x32xf32> -> vector<16x32xf32>
    %148 = arith.addf %124, %147 : vector<16x32xf32>
    %c0_77 = arith.constant 0 : index
    %c0_78 = arith.constant 0 : index
    %c0_79 = arith.constant 0 : index
    %149 = vector.load %arg11[%c0_77, %c0_78, %c0_79] : memref<2x1x32xf32, #tpu.memory_space<vmem>>, vector<1x1x32xf32>
    %150 = vector.shape_cast %149 : vector<1x1x32xf32> to vector<1x32xf32>
    %151 = vector.broadcast %150 : vector<1x32xf32> to vector<16x32xf32>
    %152 = arith.addf %148, %151 : vector<16x32xf32>
    %153 = arith.addf %0, %152 : vector<16x32xf32>
    %c0_80 = arith.constant 0 : index
    %c1_81 = arith.constant 1 : index
    %c0_82 = arith.constant 0 : index
    %c0_83 = arith.constant 0 : index
    %154 = vector.load %arg24[%c0_80, %c1_81, %c0_82, %c0_83] : memref<2x3x1x32xf32, #tpu.memory_space<vmem>>, vector<1x1x1x32xf32>
    %155 = vector.shape_cast %154 : vector<1x1x1x32xf32> to vector<1x32xf32>
    %c0_84 = arith.constant 0 : index
    %c1_85 = arith.constant 1 : index
    %c0_86 = arith.constant 0 : index
    %c0_87 = arith.constant 0 : index
    %156 = vector.load %arg25[%c0_84, %c1_85, %c0_86, %c0_87] : memref<2x3x1x32xf32, #tpu.memory_space<vmem>>, vector<1x1x1x32xf32>
    %157 = vector.shape_cast %156 : vector<1x1x1x32xf32> to vector<1x32xf32>
    %cst_88 = arith.constant dense<0.000000e+00> : vector<16xf32>
    %158 = vector.multi_reduction <add>, %153, %cst_88 [1] : vector<16x32xf32> to vector<16xf32>
    %159 = vector.shape_cast %158 : vector<16xf32> to vector<16x1xf32>
    %cst_89 = arith.constant 3.200000e+01 : f32
    %160 = vector.broadcast %cst_89 : f32 to vector<16x1xf32>
    %161 = arith.divf %159, %160 : vector<16x1xf32>
    %162 = vector.broadcast %161 : vector<16x1xf32> to vector<16x32xf32>
    %163 = arith.subf %153, %162 : vector<16x32xf32>
    %164 = arith.mulf %163, %163 : vector<16x32xf32>
    %cst_90 = arith.constant dense<0.000000e+00> : vector<16xf32>
    %165 = vector.multi_reduction <add>, %164, %cst_90 [1] : vector<16x32xf32> to vector<16xf32>
    %166 = vector.shape_cast %165 : vector<16xf32> to vector<16x1xf32>
    %cst_91 = arith.constant 0.0322580636 : f32
    %167 = vector.broadcast %cst_91 : f32 to vector<16x1xf32>
    %168 = arith.mulf %166, %167 : vector<16x1xf32>
    %169 = vector.broadcast %155 : vector<1x32xf32> to vector<16x32xf32>
    %170 = arith.mulf %169, %163 : vector<16x32xf32>
    %171 = math.sqrt %168 : vector<16x1xf32>
    %cst_92 = arith.constant 9.99999997E-7 : f32
    %172 = vector.broadcast %cst_92 : f32 to vector<16x1xf32>
    %173 = arith.addf %171, %172 : vector<16x1xf32>
    %174 = vector.broadcast %173 : vector<16x1xf32> to vector<16x32xf32>
    %175 = arith.divf %170, %174 : vector<16x32xf32>
    %176 = vector.broadcast %157 : vector<1x32xf32> to vector<16x32xf32>
    %177 = arith.addf %175, %176 : vector<16x32xf32>
    %178 = arith.truncf %177 : vector<16x32xf32> to vector<16x32xbf16>
    %c0_93 = arith.constant 0 : index
    %c0_94 = arith.constant 0 : index
    %c0_95 = arith.constant 0 : index
    %179 = vector.load %arg12[%c0_93, %c0_94, %c0_95] : memref<2x32x32xbf16, #tpu.memory_space<vmem>>, vector<1x32x32xbf16>
    %180 = vector.shape_cast %179 : vector<1x32x32xbf16> to vector<32x32xbf16>
    %cst_96 = arith.constant dense<0.000000e+00> : vector<16x32xf32>
    %181 = tpu.matmul %178, %180, %cst_96 {dimension_numbers = #tpu.dot_dimension_numbers<[1], [0], [0], [1], [0, 0, 1, 1], [], []>} : vector<16x32xbf16>, vector<32x32xbf16>, vector<16x32xf32> -> vector<16x32xf32>
    %c0_97 = arith.constant 0 : index
    %c0_98 = arith.constant 0 : index
    %c0_99 = arith.constant 0 : index
    %182 = vector.load %arg16[%c0_97, %c0_98, %c0_99] : memref<2x1x32xf32, #tpu.memory_space<vmem>>, vector<1x1x32xf32>
    %183 = vector.shape_cast %182 : vector<1x1x32xf32> to vector<1x32xf32>
    %184 = vector.broadcast %183 : vector<1x32xf32> to vector<16x32xf32>
    %185 = arith.addf %181, %184 : vector<16x32xf32>
    %c0_100 = arith.constant 0 : index
    %c0_101 = arith.constant 0 : index
    %c0_102 = arith.constant 0 : index
    %186 = vector.load %arg13[%c0_100, %c0_101, %c0_102] : memref<2x32x32xbf16, #tpu.memory_space<vmem>>, vector<1x32x32xbf16>
    %187 = vector.shape_cast %186 : vector<1x32x32xbf16> to vector<32x32xbf16>
    %cst_103 = arith.constant dense<0.000000e+00> : vector<16x32xf32>
    %188 = tpu.matmul %2, %187, %cst_103 {dimension_numbers = #tpu.dot_dimension_numbers<[1], [0], [0], [1], [0, 0, 1, 1], [], []>} : vector<16x32xbf16>, vector<32x32xbf16>, vector<16x32xf32> -> vector<16x32xf32>
    %c0_104 = arith.constant 0 : index
    %c0_105 = arith.constant 0 : index
    %c0_106 = arith.constant 0 : index
    %189 = vector.load %arg17[%c0_104, %c0_105, %c0_106] : memref<2x1x32xf32, #tpu.memory_space<vmem>>, vector<1x1x32xf32>
    %190 = vector.shape_cast %189 : vector<1x1x32xf32> to vector<1x32xf32>
    %191 = vector.broadcast %190 : vector<1x32xf32> to vector<16x32xf32>
    %192 = arith.addf %188, %191 : vector<16x32xf32>
    %c0_107 = arith.constant 0 : index
    %c0_108 = arith.constant 0 : index
    %c0_109 = arith.constant 0 : index
    %193 = vector.load %arg14[%c0_107, %c0_108, %c0_109] : memref<2x32x32xbf16, #tpu.memory_space<vmem>>, vector<1x32x32xbf16>
    %194 = vector.shape_cast %193 : vector<1x32x32xbf16> to vector<32x32xbf16>
    %cst_110 = arith.constant dense<0.000000e+00> : vector<16x32xf32>
    %195 = tpu.matmul %2, %194, %cst_110 {dimension_numbers = #tpu.dot_dimension_numbers<[1], [0], [0], [1], [0, 0, 1, 1], [], []>} : vector<16x32xbf16>, vector<32x32xbf16>, vector<16x32xf32> -> vector<16x32xf32>
    %c0_111 = arith.constant 0 : index
    %c0_112 = arith.constant 0 : index
    %c0_113 = arith.constant 0 : index
    %196 = vector.load %arg18[%c0_111, %c0_112, %c0_113] : memref<2x1x32xf32, #tpu.memory_space<vmem>>, vector<1x1x32xf32>
    %197 = vector.shape_cast %196 : vector<1x1x32xf32> to vector<1x32xf32>
    %198 = vector.broadcast %197 : vector<1x32xf32> to vector<16x32xf32>
    %199 = arith.addf %195, %198 : vector<16x32xf32>
    %200 = arith.truncf %185 : vector<16x32xf32> to vector<16x32xbf16>
    %201 = arith.truncf %192 : vector<16x32xf32> to vector<16x32xbf16>
    %202 = arith.truncf %199 : vector<16x32xf32> to vector<16x32xbf16>
    %203 = vector.extract_strided_slice %200 {offsets = [0, 0], sizes = [16, 8], strides = [1, 1]} : vector<16x32xbf16> to vector<16x8xbf16>
    %204 = vector.extract_strided_slice %201 {offsets = [0, 0], sizes = [16, 8], strides = [1, 1]} : vector<16x32xbf16> to vector<16x8xbf16>
    %cst_114 = arith.constant dense<0.000000e+00> : vector<16x16xf32>
    %205 = tpu.matmul %203, %204, %cst_114 {dimension_numbers = #tpu.dot_dimension_numbers<[1], [1], [0], [0], [0, 0, 1, 0], [], []>} : vector<16x8xbf16>, vector<16x8xbf16>, vector<16x16xf32> -> vector<16x16xf32>
    %cst_115 = arith.constant 0.353553385 : f32
    %206 = vector.broadcast %cst_115 : f32 to vector<16x16xf32>
    %207 = arith.mulf %205, %206 : vector<16x16xf32>
    %208 = arith.addf %207, %4 : vector<16x16xf32>
    %cst_116 = arith.constant dense<0xFF800000> : vector<16xf32>
    %209 = vector.multi_reduction <maximumf>, %208, %cst_116 [1] : vector<16x16xf32> to vector<16xf32>
    %210 = vector.shape_cast %209 : vector<16xf32> to vector<16x1xf32>
    %211 = vector.broadcast %210 : vector<16x1xf32> to vector<16x16xf32>
    %212 = arith.subf %208, %211 : vector<16x16xf32>
    %213 = math.exp %212 : vector<16x16xf32>
    %cst_117 = arith.constant dense<0.000000e+00> : vector<16xf32>
    %214 = vector.multi_reduction <add>, %213, %cst_117 [1] : vector<16x16xf32> to vector<16xf32>
    %215 = vector.shape_cast %214 : vector<16xf32> to vector<16x1xf32>
    %216 = tpu.reciprocal %215 {approx = true} : vector<16x1xf32> -> vector<16x1xf32>
    %217 = vector.broadcast %216 : vector<16x1xf32> to vector<16x16xf32>
    %218 = arith.mulf %213, %217 : vector<16x16xf32>
    %219 = arith.truncf %218 : vector<16x16xf32> to vector<16x16xbf16>
    %220 = vector.extract_strided_slice %202 {offsets = [0, 0], sizes = [16, 8], strides = [1, 1]} : vector<16x32xbf16> to vector<16x8xbf16>
    %cst_118 = arith.constant dense<0.000000e+00> : vector<16x8xf32>
    %221 = tpu.matmul %219, %220, %cst_118 {dimension_numbers = #tpu.dot_dimension_numbers<[1], [0], [0], [1], [0, 0, 1, 1], [], []>} : vector<16x16xbf16>, vector<16x8xbf16>, vector<16x8xf32> -> vector<16x8xf32>
    %222 = arith.truncf %221 : vector<16x8xf32> to vector<16x8xbf16>
    %c0_119 = arith.constant 0 : index
    %c0_120 = arith.constant 0 : index
    %c0_121 = arith.constant 0 : index
    %c0_122 = arith.constant 0 : index
    %223 = vector.load %arg15[%c0_119, %c0_120, %c0_121, %c0_122] : memref<2x4x8x32xbf16, #tpu.memory_space<vmem>>, vector<1x1x8x32xbf16>
    %224 = vector.shape_cast %223 : vector<1x1x8x32xbf16> to vector<8x32xbf16>
    %cst_123 = arith.constant dense<0.000000e+00> : vector<16x32xf32>
    %225 = tpu.matmul %222, %224, %cst_123 {dimension_numbers = #tpu.dot_dimension_numbers<[1], [0], [0], [1], [0, 0, 1, 1], [], []>} : vector<16x8xbf16>, vector<8x32xbf16>, vector<16x32xf32> -> vector<16x32xf32>
    %226 = vector.extract_strided_slice %200 {offsets = [0, 8], sizes = [16, 8], strides = [1, 1]} : vector<16x32xbf16> to vector<16x8xbf16>
    %227 = vector.extract_strided_slice %201 {offsets = [0, 8], sizes = [16, 8], strides = [1, 1]} : vector<16x32xbf16> to vector<16x8xbf16>
    %cst_124 = arith.constant dense<0.000000e+00> : vector<16x16xf32>
    %228 = tpu.matmul %226, %227, %cst_124 {dimension_numbers = #tpu.dot_dimension_numbers<[1], [1], [0], [0], [0, 0, 1, 0], [], []>} : vector<16x8xbf16>, vector<16x8xbf16>, vector<16x16xf32> -> vector<16x16xf32>
    %cst_125 = arith.constant 0.353553385 : f32
    %229 = vector.broadcast %cst_125 : f32 to vector<16x16xf32>
    %230 = arith.mulf %228, %229 : vector<16x16xf32>
    %231 = arith.addf %230, %4 : vector<16x16xf32>
    %cst_126 = arith.constant dense<0xFF800000> : vector<16xf32>
    %232 = vector.multi_reduction <maximumf>, %231, %cst_126 [1] : vector<16x16xf32> to vector<16xf32>
    %233 = vector.shape_cast %232 : vector<16xf32> to vector<16x1xf32>
    %234 = vector.broadcast %233 : vector<16x1xf32> to vector<16x16xf32>
    %235 = arith.subf %231, %234 : vector<16x16xf32>
    %236 = math.exp %235 : vector<16x16xf32>
    %cst_127 = arith.constant dense<0.000000e+00> : vector<16xf32>
    %237 = vector.multi_reduction <add>, %236, %cst_127 [1] : vector<16x16xf32> to vector<16xf32>
    %238 = vector.shape_cast %237 : vector<16xf32> to vector<16x1xf32>
    %239 = tpu.reciprocal %238 {approx = true} : vector<16x1xf32> -> vector<16x1xf32>
    %240 = vector.broadcast %239 : vector<16x1xf32> to vector<16x16xf32>
    %241 = arith.mulf %236, %240 : vector<16x16xf32>
    %242 = arith.truncf %241 : vector<16x16xf32> to vector<16x16xbf16>
    %243 = vector.extract_strided_slice %202 {offsets = [0, 8], sizes = [16, 8], strides = [1, 1]} : vector<16x32xbf16> to vector<16x8xbf16>
    %cst_128 = arith.constant dense<0.000000e+00> : vector<16x8xf32>
    %244 = tpu.matmul %242, %243, %cst_128 {dimension_numbers = #tpu.dot_dimension_numbers<[1], [0], [0], [1], [0, 0, 1, 1], [], []>} : vector<16x16xbf16>, vector<16x8xbf16>, vector<16x8xf32> -> vector<16x8xf32>
    %245 = arith.truncf %244 : vector<16x8xf32> to vector<16x8xbf16>
    %c0_129 = arith.constant 0 : index
    %c1_130 = arith.constant 1 : index
    %c0_131 = arith.constant 0 : index
    %c0_132 = arith.constant 0 : index
    %246 = vector.load %arg15[%c0_129, %c1_130, %c0_131, %c0_132] : memref<2x4x8x32xbf16, #tpu.memory_space<vmem>>, vector<1x1x8x32xbf16>
    %247 = vector.shape_cast %246 : vector<1x1x8x32xbf16> to vector<8x32xbf16>
    %cst_133 = arith.constant dense<0.000000e+00> : vector<16x32xf32>
    %248 = tpu.matmul %245, %247, %cst_133 {dimension_numbers = #tpu.dot_dimension_numbers<[1], [0], [0], [1], [0, 0, 1, 1], [], []>} : vector<16x8xbf16>, vector<8x32xbf16>, vector<16x32xf32> -> vector<16x32xf32>
    %249 = arith.addf %225, %248 : vector<16x32xf32>
    %250 = vector.extract_strided_slice %200 {offsets = [0, 16], sizes = [16, 8], strides = [1, 1]} : vector<16x32xbf16> to vector<16x8xbf16>
    %251 = vector.extract_strided_slice %201 {offsets = [0, 16], sizes = [16, 8], strides = [1, 1]} : vector<16x32xbf16> to vector<16x8xbf16>
    %cst_134 = arith.constant dense<0.000000e+00> : vector<16x16xf32>
    %252 = tpu.matmul %250, %251, %cst_134 {dimension_numbers = #tpu.dot_dimension_numbers<[1], [1], [0], [0], [0, 0, 1, 0], [], []>} : vector<16x8xbf16>, vector<16x8xbf16>, vector<16x16xf32> -> vector<16x16xf32>
    %cst_135 = arith.constant 0.353553385 : f32
    %253 = vector.broadcast %cst_135 : f32 to vector<16x16xf32>
    %254 = arith.mulf %252, %253 : vector<16x16xf32>
    %255 = arith.addf %254, %4 : vector<16x16xf32>
    %cst_136 = arith.constant dense<0xFF800000> : vector<16xf32>
    %256 = vector.multi_reduction <maximumf>, %255, %cst_136 [1] : vector<16x16xf32> to vector<16xf32>
    %257 = vector.shape_cast %256 : vector<16xf32> to vector<16x1xf32>
    %258 = vector.broadcast %257 : vector<16x1xf32> to vector<16x16xf32>
    %259 = arith.subf %255, %258 : vector<16x16xf32>
    %260 = math.exp %259 : vector<16x16xf32>
    %cst_137 = arith.constant dense<0.000000e+00> : vector<16xf32>
    %261 = vector.multi_reduction <add>, %260, %cst_137 [1] : vector<16x16xf32> to vector<16xf32>
    %262 = vector.shape_cast %261 : vector<16xf32> to vector<16x1xf32>
    %263 = tpu.reciprocal %262 {approx = true} : vector<16x1xf32> -> vector<16x1xf32>
    %264 = vector.broadcast %263 : vector<16x1xf32> to vector<16x16xf32>
    %265 = arith.mulf %260, %264 : vector<16x16xf32>
    %266 = arith.truncf %265 : vector<16x16xf32> to vector<16x16xbf16>
    %267 = vector.extract_strided_slice %202 {offsets = [0, 16], sizes = [16, 8], strides = [1, 1]} : vector<16x32xbf16> to vector<16x8xbf16>
    %cst_138 = arith.constant dense<0.000000e+00> : vector<16x8xf32>
    %268 = tpu.matmul %266, %267, %cst_138 {dimension_numbers = #tpu.dot_dimension_numbers<[1], [0], [0], [1], [0, 0, 1, 1], [], []>} : vector<16x16xbf16>, vector<16x8xbf16>, vector<16x8xf32> -> vector<16x8xf32>
    %269 = arith.truncf %268 : vector<16x8xf32> to vector<16x8xbf16>
    %c0_139 = arith.constant 0 : index
    %c2_140 = arith.constant 2 : index
    %c0_141 = arith.constant 0 : index
    %c0_142 = arith.constant 0 : index
    %270 = vector.load %arg15[%c0_139, %c2_140, %c0_141, %c0_142] : memref<2x4x8x32xbf16, #tpu.memory_space<vmem>>, vector<1x1x8x32xbf16>
    %271 = vector.shape_cast %270 : vector<1x1x8x32xbf16> to vector<8x32xbf16>
    %cst_143 = arith.constant dense<0.000000e+00> : vector<16x32xf32>
    %272 = tpu.matmul %269, %271, %cst_143 {dimension_numbers = #tpu.dot_dimension_numbers<[1], [0], [0], [1], [0, 0, 1, 1], [], []>} : vector<16x8xbf16>, vector<8x32xbf16>, vector<16x32xf32> -> vector<16x32xf32>
    %273 = arith.addf %249, %272 : vector<16x32xf32>
    %274 = vector.extract_strided_slice %200 {offsets = [0, 24], sizes = [16, 8], strides = [1, 1]} : vector<16x32xbf16> to vector<16x8xbf16>
    %275 = vector.extract_strided_slice %201 {offsets = [0, 24], sizes = [16, 8], strides = [1, 1]} : vector<16x32xbf16> to vector<16x8xbf16>
    %cst_144 = arith.constant dense<0.000000e+00> : vector<16x16xf32>
    %276 = tpu.matmul %274, %275, %cst_144 {dimension_numbers = #tpu.dot_dimension_numbers<[1], [1], [0], [0], [0, 0, 1, 0], [], []>} : vector<16x8xbf16>, vector<16x8xbf16>, vector<16x16xf32> -> vector<16x16xf32>
    %cst_145 = arith.constant 0.353553385 : f32
    %277 = vector.broadcast %cst_145 : f32 to vector<16x16xf32>
    %278 = arith.mulf %276, %277 : vector<16x16xf32>
    %279 = arith.addf %278, %4 : vector<16x16xf32>
    %cst_146 = arith.constant dense<0xFF800000> : vector<16xf32>
    %280 = vector.multi_reduction <maximumf>, %279, %cst_146 [1] : vector<16x16xf32> to vector<16xf32>
    %281 = vector.shape_cast %280 : vector<16xf32> to vector<16x1xf32>
    %282 = vector.broadcast %281 : vector<16x1xf32> to vector<16x16xf32>
    %283 = arith.subf %279, %282 : vector<16x16xf32>
    %284 = math.exp %283 : vector<16x16xf32>
    %cst_147 = arith.constant dense<0.000000e+00> : vector<16xf32>
    %285 = vector.multi_reduction <add>, %284, %cst_147 [1] : vector<16x16xf32> to vector<16xf32>
    %286 = vector.shape_cast %285 : vector<16xf32> to vector<16x1xf32>
    %287 = tpu.reciprocal %286 {approx = true} : vector<16x1xf32> -> vector<16x1xf32>
    %288 = vector.broadcast %287 : vector<16x1xf32> to vector<16x16xf32>
    %289 = arith.mulf %284, %288 : vector<16x16xf32>
    %290 = arith.truncf %289 : vector<16x16xf32> to vector<16x16xbf16>
    %291 = vector.extract_strided_slice %202 {offsets = [0, 24], sizes = [16, 8], strides = [1, 1]} : vector<16x32xbf16> to vector<16x8xbf16>
    %cst_148 = arith.constant dense<0.000000e+00> : vector<16x8xf32>
    %292 = tpu.matmul %290, %291, %cst_148 {dimension_numbers = #tpu.dot_dimension_numbers<[1], [0], [0], [1], [0, 0, 1, 1], [], []>} : vector<16x16xbf16>, vector<16x8xbf16>, vector<16x8xf32> -> vector<16x8xf32>
    %293 = arith.truncf %292 : vector<16x8xf32> to vector<16x8xbf16>
    %c0_149 = arith.constant 0 : index
    %c3_150 = arith.constant 3 : index
    %c0_151 = arith.constant 0 : index
    %c0_152 = arith.constant 0 : index
    %294 = vector.load %arg15[%c0_149, %c3_150, %c0_151, %c0_152] : memref<2x4x8x32xbf16, #tpu.memory_space<vmem>>, vector<1x1x8x32xbf16>
    %295 = vector.shape_cast %294 : vector<1x1x8x32xbf16> to vector<8x32xbf16>
    %cst_153 = arith.constant dense<0.000000e+00> : vector<16x32xf32>
    %296 = tpu.matmul %293, %295, %cst_153 {dimension_numbers = #tpu.dot_dimension_numbers<[1], [0], [0], [1], [0, 0, 1, 1], [], []>} : vector<16x8xbf16>, vector<8x32xbf16>, vector<16x32xf32> -> vector<16x32xf32>
    %297 = arith.addf %273, %296 : vector<16x32xf32>
    %c0_154 = arith.constant 0 : index
    %c0_155 = arith.constant 0 : index
    %c0_156 = arith.constant 0 : index
    %298 = vector.load %arg19[%c0_154, %c0_155, %c0_156] : memref<2x1x32xf32, #tpu.memory_space<vmem>>, vector<1x1x32xf32>
    %299 = vector.shape_cast %298 : vector<1x1x32xf32> to vector<1x32xf32>
    %300 = vector.broadcast %299 : vector<1x32xf32> to vector<16x32xf32>
    %301 = arith.addf %297, %300 : vector<16x32xf32>
    %302 = arith.addf %153, %301 : vector<16x32xf32>
    %c0_157 = arith.constant 0 : index
    %c2_158 = arith.constant 2 : index
    %c0_159 = arith.constant 0 : index
    %c0_160 = arith.constant 0 : index
    %303 = vector.load %arg24[%c0_157, %c2_158, %c0_159, %c0_160] : memref<2x3x1x32xf32, #tpu.memory_space<vmem>>, vector<1x1x1x32xf32>
    %304 = vector.shape_cast %303 : vector<1x1x1x32xf32> to vector<1x32xf32>
    %c0_161 = arith.constant 0 : index
    %c2_162 = arith.constant 2 : index
    %c0_163 = arith.constant 0 : index
    %c0_164 = arith.constant 0 : index
    %305 = vector.load %arg25[%c0_161, %c2_162, %c0_163, %c0_164] : memref<2x3x1x32xf32, #tpu.memory_space<vmem>>, vector<1x1x1x32xf32>
    %306 = vector.shape_cast %305 : vector<1x1x1x32xf32> to vector<1x32xf32>
    %cst_165 = arith.constant dense<0.000000e+00> : vector<16xf32>
    %307 = vector.multi_reduction <add>, %302, %cst_165 [1] : vector<16x32xf32> to vector<16xf32>
    %308 = vector.shape_cast %307 : vector<16xf32> to vector<16x1xf32>
    %cst_166 = arith.constant 3.200000e+01 : f32
    %309 = vector.broadcast %cst_166 : f32 to vector<16x1xf32>
    %310 = arith.divf %308, %309 : vector<16x1xf32>
    %311 = vector.broadcast %310 : vector<16x1xf32> to vector<16x32xf32>
    %312 = arith.subf %302, %311 : vector<16x32xf32>
    %313 = arith.mulf %312, %312 : vector<16x32xf32>
    %cst_167 = arith.constant dense<0.000000e+00> : vector<16xf32>
    %314 = vector.multi_reduction <add>, %313, %cst_167 [1] : vector<16x32xf32> to vector<16xf32>
    %315 = vector.shape_cast %314 : vector<16xf32> to vector<16x1xf32>
    %cst_168 = arith.constant 0.0322580636 : f32
    %316 = vector.broadcast %cst_168 : f32 to vector<16x1xf32>
    %317 = arith.mulf %315, %316 : vector<16x1xf32>
    %318 = vector.broadcast %304 : vector<1x32xf32> to vector<16x32xf32>
    %319 = arith.mulf %318, %312 : vector<16x32xf32>
    %320 = math.sqrt %317 : vector<16x1xf32>
    %cst_169 = arith.constant 9.99999997E-7 : f32
    %321 = vector.broadcast %cst_169 : f32 to vector<16x1xf32>
    %322 = arith.addf %320, %321 : vector<16x1xf32>
    %323 = vector.broadcast %322 : vector<16x1xf32> to vector<16x32xf32>
    %324 = arith.divf %319, %323 : vector<16x32xf32>
    %325 = vector.broadcast %306 : vector<1x32xf32> to vector<16x32xf32>
    %326 = arith.addf %324, %325 : vector<16x32xf32>
    %327 = arith.truncf %326 : vector<16x32xf32> to vector<16x32xbf16>
    %c0_170 = arith.constant 0 : index
    %c0_171 = arith.constant 0 : index
    %c0_172 = arith.constant 0 : index
    %328 = vector.load %arg20[%c0_170, %c0_171, %c0_172] : memref<2x32x64xbf16, #tpu.memory_space<vmem>>, vector<1x32x64xbf16>
    %329 = vector.shape_cast %328 : vector<1x32x64xbf16> to vector<32x64xbf16>
    %cst_173 = arith.constant dense<0.000000e+00> : vector<16x64xf32>
    %330 = tpu.matmul %327, %329, %cst_173 {dimension_numbers = #tpu.dot_dimension_numbers<[1], [0], [0], [1], [0, 0, 1, 1], [], []>} : vector<16x32xbf16>, vector<32x64xbf16>, vector<16x64xf32> -> vector<16x64xf32>
    %c0_174 = arith.constant 0 : index
    %c0_175 = arith.constant 0 : index
    %c0_176 = arith.constant 0 : index
    %331 = vector.load %arg21[%c0_174, %c0_175, %c0_176] : memref<2x1x64xf32, #tpu.memory_space<vmem>>, vector<1x1x64xf32>
    %332 = vector.shape_cast %331 : vector<1x1x64xf32> to vector<1x64xf32>
    %333 = vector.broadcast %332 : vector<1x64xf32> to vector<16x64xf32>
    %334 = arith.addf %330, %333 : vector<16x64xf32>
    %cst_177 = arith.constant 0.000000e+00 : f32
    %335 = vector.broadcast %cst_177 : f32 to vector<16x64xf32>
    %336 = arith.maximumf %334, %335 : vector<16x64xf32>
    %337 = arith.truncf %336 : vector<16x64xf32> to vector<16x64xbf16>
    %c0_178 = arith.constant 0 : index
    %c0_179 = arith.constant 0 : index
    %c0_180 = arith.constant 0 : index
    %338 = vector.load %arg22[%c0_178, %c0_179, %c0_180] : memref<2x64x32xbf16, #tpu.memory_space<vmem>>, vector<1x64x32xbf16>
    %339 = vector.shape_cast %338 : vector<1x64x32xbf16> to vector<64x32xbf16>
    %cst_181 = arith.constant dense<0.000000e+00> : vector<16x32xf32>
    %340 = tpu.matmul %337, %339, %cst_181 {dimension_numbers = #tpu.dot_dimension_numbers<[1], [0], [0], [1], [0, 0, 1, 1], [], []>} : vector<16x64xbf16>, vector<64x32xbf16>, vector<16x32xf32> -> vector<16x32xf32>
    %341 = arith.addf %302, %340 : vector<16x32xf32>
    %c0_182 = arith.constant 0 : index
    %c0_183 = arith.constant 0 : index
    %c0_184 = arith.constant 0 : index
    %342 = vector.load %arg23[%c0_182, %c0_183, %c0_184] : memref<2x1x32xf32, #tpu.memory_space<vmem>>, vector<1x1x32xf32>
    %343 = vector.shape_cast %342 : vector<1x1x32xf32> to vector<1x32xf32>
    %344 = vector.broadcast %343 : vector<1x32xf32> to vector<16x32xf32>
    %345 = arith.addf %341, %344 : vector<16x32xf32>
    %c1_185 = arith.constant 1 : index
    %c0_186 = arith.constant 0 : index
    %c0_187 = arith.constant 0 : index
    %c0_188 = arith.constant 0 : index
    %346 = vector.load %arg24[%c1_185, %c0_186, %c0_187, %c0_188] : memref<2x3x1x32xf32, #tpu.memory_space<vmem>>, vector<1x1x1x32xf32>
    %347 = vector.shape_cast %346 : vector<1x1x1x32xf32> to vector<1x32xf32>
    %c1_189 = arith.constant 1 : index
    %c0_190 = arith.constant 0 : index
    %c0_191 = arith.constant 0 : index
    %c0_192 = arith.constant 0 : index
    %348 = vector.load %arg25[%c1_189, %c0_190, %c0_191, %c0_192] : memref<2x3x1x32xf32, #tpu.memory_space<vmem>>, vector<1x1x1x32xf32>
    %349 = vector.shape_cast %348 : vector<1x1x1x32xf32> to vector<1x32xf32>
    %cst_193 = arith.constant dense<0.000000e+00> : vector<16xf32>
    %350 = vector.multi_reduction <add>, %345, %cst_193 [1] : vector<16x32xf32> to vector<16xf32>
    %351 = vector.shape_cast %350 : vector<16xf32> to vector<16x1xf32>
    %cst_194 = arith.constant 3.200000e+01 : f32
    %352 = vector.broadcast %cst_194 : f32 to vector<16x1xf32>
    %353 = arith.divf %351, %352 : vector<16x1xf32>
    %354 = vector.broadcast %353 : vector<16x1xf32> to vector<16x32xf32>
    %355 = arith.subf %345, %354 : vector<16x32xf32>
    %356 = arith.mulf %355, %355 : vector<16x32xf32>
    %cst_195 = arith.constant dense<0.000000e+00> : vector<16xf32>
    %357 = vector.multi_reduction <add>, %356, %cst_195 [1] : vector<16x32xf32> to vector<16xf32>
    %358 = vector.shape_cast %357 : vector<16xf32> to vector<16x1xf32>
    %cst_196 = arith.constant 0.0322580636 : f32
    %359 = vector.broadcast %cst_196 : f32 to vector<16x1xf32>
    %360 = arith.mulf %358, %359 : vector<16x1xf32>
    %361 = vector.broadcast %347 : vector<1x32xf32> to vector<16x32xf32>
    %362 = arith.mulf %361, %355 : vector<16x32xf32>
    %363 = math.sqrt %360 : vector<16x1xf32>
    %cst_197 = arith.constant 9.99999997E-7 : f32
    %364 = vector.broadcast %cst_197 : f32 to vector<16x1xf32>
    %365 = arith.addf %363, %364 : vector<16x1xf32>
    %366 = vector.broadcast %365 : vector<16x1xf32> to vector<16x32xf32>
    %367 = arith.divf %362, %366 : vector<16x32xf32>
    %368 = vector.broadcast %349 : vector<1x32xf32> to vector<16x32xf32>
    %369 = arith.addf %367, %368 : vector<16x32xf32>
    %370 = arith.truncf %369 : vector<16x32xf32> to vector<16x32xbf16>
    %c1_198 = arith.constant 1 : index
    %c0_199 = arith.constant 0 : index
    %c0_200 = arith.constant 0 : index
    %371 = vector.load %arg4[%c1_198, %c0_199, %c0_200] : memref<2x32x32xbf16, #tpu.memory_space<vmem>>, vector<1x32x32xbf16>
    %372 = vector.shape_cast %371 : vector<1x32x32xbf16> to vector<32x32xbf16>
    %cst_201 = arith.constant dense<0.000000e+00> : vector<16x32xf32>
    %373 = tpu.matmul %370, %372, %cst_201 {dimension_numbers = #tpu.dot_dimension_numbers<[1], [0], [0], [1], [0, 0, 1, 1], [], []>} : vector<16x32xbf16>, vector<32x32xbf16>, vector<16x32xf32> -> vector<16x32xf32>
    %c1_202 = arith.constant 1 : index
    %c0_203 = arith.constant 0 : index
    %c0_204 = arith.constant 0 : index
    %374 = vector.load %arg8[%c1_202, %c0_203, %c0_204] : memref<2x1x32xf32, #tpu.memory_space<vmem>>, vector<1x1x32xf32>
    %375 = vector.shape_cast %374 : vector<1x1x32xf32> to vector<1x32xf32>
    %376 = vector.broadcast %375 : vector<1x32xf32> to vector<16x32xf32>
    %377 = arith.addf %373, %376 : vector<16x32xf32>
    %c1_205 = arith.constant 1 : index
    %c0_206 = arith.constant 0 : index
    %c0_207 = arith.constant 0 : index
    %378 = vector.load %arg5[%c1_205, %c0_206, %c0_207] : memref<2x32x32xbf16, #tpu.memory_space<vmem>>, vector<1x32x32xbf16>
    %379 = vector.shape_cast %378 : vector<1x32x32xbf16> to vector<32x32xbf16>
    %cst_208 = arith.constant dense<0.000000e+00> : vector<16x32xf32>
    %380 = tpu.matmul %370, %379, %cst_208 {dimension_numbers = #tpu.dot_dimension_numbers<[1], [0], [0], [1], [0, 0, 1, 1], [], []>} : vector<16x32xbf16>, vector<32x32xbf16>, vector<16x32xf32> -> vector<16x32xf32>
    %c1_209 = arith.constant 1 : index
    %c0_210 = arith.constant 0 : index
    %c0_211 = arith.constant 0 : index
    %381 = vector.load %arg9[%c1_209, %c0_210, %c0_211] : memref<2x1x32xf32, #tpu.memory_space<vmem>>, vector<1x1x32xf32>
    %382 = vector.shape_cast %381 : vector<1x1x32xf32> to vector<1x32xf32>
    %383 = vector.broadcast %382 : vector<1x32xf32> to vector<16x32xf32>
    %384 = arith.addf %380, %383 : vector<16x32xf32>
    %c1_212 = arith.constant 1 : index
    %c0_213 = arith.constant 0 : index
    %c0_214 = arith.constant 0 : index
    %385 = vector.load %arg6[%c1_212, %c0_213, %c0_214] : memref<2x32x32xbf16, #tpu.memory_space<vmem>>, vector<1x32x32xbf16>
    %386 = vector.shape_cast %385 : vector<1x32x32xbf16> to vector<32x32xbf16>
    %cst_215 = arith.constant dense<0.000000e+00> : vector<16x32xf32>
    %387 = tpu.matmul %370, %386, %cst_215 {dimension_numbers = #tpu.dot_dimension_numbers<[1], [0], [0], [1], [0, 0, 1, 1], [], []>} : vector<16x32xbf16>, vector<32x32xbf16>, vector<16x32xf32> -> vector<16x32xf32>
    %c1_216 = arith.constant 1 : index
    %c0_217 = arith.constant 0 : index
    %c0_218 = arith.constant 0 : index
    %388 = vector.load %arg10[%c1_216, %c0_217, %c0_218] : memref<2x1x32xf32, #tpu.memory_space<vmem>>, vector<1x1x32xf32>
    %389 = vector.shape_cast %388 : vector<1x1x32xf32> to vector<1x32xf32>
    %390 = vector.broadcast %389 : vector<1x32xf32> to vector<16x32xf32>
    %391 = arith.addf %387, %390 : vector<16x32xf32>
    %392 = arith.truncf %377 : vector<16x32xf32> to vector<16x32xbf16>
    %393 = arith.truncf %384 : vector<16x32xf32> to vector<16x32xbf16>
    %394 = arith.truncf %391 : vector<16x32xf32> to vector<16x32xbf16>
    %395 = vector.extract_strided_slice %392 {offsets = [0, 0], sizes = [16, 8], strides = [1, 1]} : vector<16x32xbf16> to vector<16x8xbf16>
    %396 = vector.extract_strided_slice %393 {offsets = [0, 0], sizes = [16, 8], strides = [1, 1]} : vector<16x32xbf16> to vector<16x8xbf16>
    %cst_219 = arith.constant dense<0.000000e+00> : vector<16x16xf32>
    %397 = tpu.matmul %395, %396, %cst_219 {dimension_numbers = #tpu.dot_dimension_numbers<[1], [1], [0], [0], [0, 0, 1, 0], [], []>} : vector<16x8xbf16>, vector<16x8xbf16>, vector<16x16xf32> -> vector<16x16xf32>
    %cst_220 = arith.constant 0.353553385 : f32
    %398 = vector.broadcast %cst_220 : f32 to vector<16x16xf32>
    %399 = arith.mulf %397, %398 : vector<16x16xf32>
    %400 = arith.addf %399, %3 : vector<16x16xf32>
    %cst_221 = arith.constant dense<0xFF800000> : vector<16xf32>
    %401 = vector.multi_reduction <maximumf>, %400, %cst_221 [1] : vector<16x16xf32> to vector<16xf32>
    %402 = vector.shape_cast %401 : vector<16xf32> to vector<16x1xf32>
    %403 = vector.broadcast %402 : vector<16x1xf32> to vector<16x16xf32>
    %404 = arith.subf %400, %403 : vector<16x16xf32>
    %405 = math.exp %404 : vector<16x16xf32>
    %cst_222 = arith.constant dense<0.000000e+00> : vector<16xf32>
    %406 = vector.multi_reduction <add>, %405, %cst_222 [1] : vector<16x16xf32> to vector<16xf32>
    %407 = vector.shape_cast %406 : vector<16xf32> to vector<16x1xf32>
    %408 = tpu.reciprocal %407 {approx = true} : vector<16x1xf32> -> vector<16x1xf32>
    %409 = vector.broadcast %408 : vector<16x1xf32> to vector<16x16xf32>
    %410 = arith.mulf %405, %409 : vector<16x16xf32>
    %411 = arith.truncf %410 : vector<16x16xf32> to vector<16x16xbf16>
    %412 = vector.extract_strided_slice %394 {offsets = [0, 0], sizes = [16, 8], strides = [1, 1]} : vector<16x32xbf16> to vector<16x8xbf16>
    %cst_223 = arith.constant dense<0.000000e+00> : vector<16x8xf32>
    %413 = tpu.matmul %411, %412, %cst_223 {dimension_numbers = #tpu.dot_dimension_numbers<[1], [0], [0], [1], [0, 0, 1, 1], [], []>} : vector<16x16xbf16>, vector<16x8xbf16>, vector<16x8xf32> -> vector<16x8xf32>
    %414 = arith.truncf %413 : vector<16x8xf32> to vector<16x8xbf16>
    %c1_224 = arith.constant 1 : index
    %c0_225 = arith.constant 0 : index
    %c0_226 = arith.constant 0 : index
    %c0_227 = arith.constant 0 : index
    %415 = vector.load %arg7[%c1_224, %c0_225, %c0_226, %c0_227] : memref<2x4x8x32xbf16, #tpu.memory_space<vmem>>, vector<1x1x8x32xbf16>
    %416 = vector.shape_cast %415 : vector<1x1x8x32xbf16> to vector<8x32xbf16>
    %cst_228 = arith.constant dense<0.000000e+00> : vector<16x32xf32>
    %417 = tpu.matmul %414, %416, %cst_228 {dimension_numbers = #tpu.dot_dimension_numbers<[1], [0], [0], [1], [0, 0, 1, 1], [], []>} : vector<16x8xbf16>, vector<8x32xbf16>, vector<16x32xf32> -> vector<16x32xf32>
    %418 = vector.extract_strided_slice %392 {offsets = [0, 8], sizes = [16, 8], strides = [1, 1]} : vector<16x32xbf16> to vector<16x8xbf16>
    %419 = vector.extract_strided_slice %393 {offsets = [0, 8], sizes = [16, 8], strides = [1, 1]} : vector<16x32xbf16> to vector<16x8xbf16>
    %cst_229 = arith.constant dense<0.000000e+00> : vector<16x16xf32>
    %420 = tpu.matmul %418, %419, %cst_229 {dimension_numbers = #tpu.dot_dimension_numbers<[1], [1], [0], [0], [0, 0, 1, 0], [], []>} : vector<16x8xbf16>, vector<16x8xbf16>, vector<16x16xf32> -> vector<16x16xf32>
    %cst_230 = arith.constant 0.353553385 : f32
    %421 = vector.broadcast %cst_230 : f32 to vector<16x16xf32>
    %422 = arith.mulf %420, %421 : vector<16x16xf32>
    %423 = arith.addf %422, %3 : vector<16x16xf32>
    %cst_231 = arith.constant dense<0xFF800000> : vector<16xf32>
    %424 = vector.multi_reduction <maximumf>, %423, %cst_231 [1] : vector<16x16xf32> to vector<16xf32>
    %425 = vector.shape_cast %424 : vector<16xf32> to vector<16x1xf32>
    %426 = vector.broadcast %425 : vector<16x1xf32> to vector<16x16xf32>
    %427 = arith.subf %423, %426 : vector<16x16xf32>
    %428 = math.exp %427 : vector<16x16xf32>
    %cst_232 = arith.constant dense<0.000000e+00> : vector<16xf32>
    %429 = vector.multi_reduction <add>, %428, %cst_232 [1] : vector<16x16xf32> to vector<16xf32>
    %430 = vector.shape_cast %429 : vector<16xf32> to vector<16x1xf32>
    %431 = tpu.reciprocal %430 {approx = true} : vector<16x1xf32> -> vector<16x1xf32>
    %432 = vector.broadcast %431 : vector<16x1xf32> to vector<16x16xf32>
    %433 = arith.mulf %428, %432 : vector<16x16xf32>
    %434 = arith.truncf %433 : vector<16x16xf32> to vector<16x16xbf16>
    %435 = vector.extract_strided_slice %394 {offsets = [0, 8], sizes = [16, 8], strides = [1, 1]} : vector<16x32xbf16> to vector<16x8xbf16>
    %cst_233 = arith.constant dense<0.000000e+00> : vector<16x8xf32>
    %436 = tpu.matmul %434, %435, %cst_233 {dimension_numbers = #tpu.dot_dimension_numbers<[1], [0], [0], [1], [0, 0, 1, 1], [], []>} : vector<16x16xbf16>, vector<16x8xbf16>, vector<16x8xf32> -> vector<16x8xf32>
    %437 = arith.truncf %436 : vector<16x8xf32> to vector<16x8xbf16>
    %c1_234 = arith.constant 1 : index
    %c1_235 = arith.constant 1 : index
    %c0_236 = arith.constant 0 : index
    %c0_237 = arith.constant 0 : index
    %438 = vector.load %arg7[%c1_234, %c1_235, %c0_236, %c0_237] : memref<2x4x8x32xbf16, #tpu.memory_space<vmem>>, vector<1x1x8x32xbf16>
    %439 = vector.shape_cast %438 : vector<1x1x8x32xbf16> to vector<8x32xbf16>
    %cst_238 = arith.constant dense<0.000000e+00> : vector<16x32xf32>
    %440 = tpu.matmul %437, %439, %cst_238 {dimension_numbers = #tpu.dot_dimension_numbers<[1], [0], [0], [1], [0, 0, 1, 1], [], []>} : vector<16x8xbf16>, vector<8x32xbf16>, vector<16x32xf32> -> vector<16x32xf32>
    %441 = arith.addf %417, %440 : vector<16x32xf32>
    %442 = vector.extract_strided_slice %392 {offsets = [0, 16], sizes = [16, 8], strides = [1, 1]} : vector<16x32xbf16> to vector<16x8xbf16>
    %443 = vector.extract_strided_slice %393 {offsets = [0, 16], sizes = [16, 8], strides = [1, 1]} : vector<16x32xbf16> to vector<16x8xbf16>
    %cst_239 = arith.constant dense<0.000000e+00> : vector<16x16xf32>
    %444 = tpu.matmul %442, %443, %cst_239 {dimension_numbers = #tpu.dot_dimension_numbers<[1], [1], [0], [0], [0, 0, 1, 0], [], []>} : vector<16x8xbf16>, vector<16x8xbf16>, vector<16x16xf32> -> vector<16x16xf32>
    %cst_240 = arith.constant 0.353553385 : f32
    %445 = vector.broadcast %cst_240 : f32 to vector<16x16xf32>
    %446 = arith.mulf %444, %445 : vector<16x16xf32>
    %447 = arith.addf %446, %3 : vector<16x16xf32>
    %cst_241 = arith.constant dense<0xFF800000> : vector<16xf32>
    %448 = vector.multi_reduction <maximumf>, %447, %cst_241 [1] : vector<16x16xf32> to vector<16xf32>
    %449 = vector.shape_cast %448 : vector<16xf32> to vector<16x1xf32>
    %450 = vector.broadcast %449 : vector<16x1xf32> to vector<16x16xf32>
    %451 = arith.subf %447, %450 : vector<16x16xf32>
    %452 = math.exp %451 : vector<16x16xf32>
    %cst_242 = arith.constant dense<0.000000e+00> : vector<16xf32>
    %453 = vector.multi_reduction <add>, %452, %cst_242 [1] : vector<16x16xf32> to vector<16xf32>
    %454 = vector.shape_cast %453 : vector<16xf32> to vector<16x1xf32>
    %455 = tpu.reciprocal %454 {approx = true} : vector<16x1xf32> -> vector<16x1xf32>
    %456 = vector.broadcast %455 : vector<16x1xf32> to vector<16x16xf32>
    %457 = arith.mulf %452, %456 : vector<16x16xf32>
    %458 = arith.truncf %457 : vector<16x16xf32> to vector<16x16xbf16>
    %459 = vector.extract_strided_slice %394 {offsets = [0, 16], sizes = [16, 8], strides = [1, 1]} : vector<16x32xbf16> to vector<16x8xbf16>
    %cst_243 = arith.constant dense<0.000000e+00> : vector<16x8xf32>
    %460 = tpu.matmul %458, %459, %cst_243 {dimension_numbers = #tpu.dot_dimension_numbers<[1], [0], [0], [1], [0, 0, 1, 1], [], []>} : vector<16x16xbf16>, vector<16x8xbf16>, vector<16x8xf32> -> vector<16x8xf32>
    %461 = arith.truncf %460 : vector<16x8xf32> to vector<16x8xbf16>
    %c1_244 = arith.constant 1 : index
    %c2_245 = arith.constant 2 : index
    %c0_246 = arith.constant 0 : index
    %c0_247 = arith.constant 0 : index
    %462 = vector.load %arg7[%c1_244, %c2_245, %c0_246, %c0_247] : memref<2x4x8x32xbf16, #tpu.memory_space<vmem>>, vector<1x1x8x32xbf16>
    %463 = vector.shape_cast %462 : vector<1x1x8x32xbf16> to vector<8x32xbf16>
    %cst_248 = arith.constant dense<0.000000e+00> : vector<16x32xf32>
    %464 = tpu.matmul %461, %463, %cst_248 {dimension_numbers = #tpu.dot_dimension_numbers<[1], [0], [0], [1], [0, 0, 1, 1], [], []>} : vector<16x8xbf16>, vector<8x32xbf16>, vector<16x32xf32> -> vector<16x32xf32>
    %465 = arith.addf %441, %464 : vector<16x32xf32>
    %466 = vector.extract_strided_slice %392 {offsets = [0, 24], sizes = [16, 8], strides = [1, 1]} : vector<16x32xbf16> to vector<16x8xbf16>
    %467 = vector.extract_strided_slice %393 {offsets = [0, 24], sizes = [16, 8], strides = [1, 1]} : vector<16x32xbf16> to vector<16x8xbf16>
    %cst_249 = arith.constant dense<0.000000e+00> : vector<16x16xf32>
    %468 = tpu.matmul %466, %467, %cst_249 {dimension_numbers = #tpu.dot_dimension_numbers<[1], [1], [0], [0], [0, 0, 1, 0], [], []>} : vector<16x8xbf16>, vector<16x8xbf16>, vector<16x16xf32> -> vector<16x16xf32>
    %cst_250 = arith.constant 0.353553385 : f32
    %469 = vector.broadcast %cst_250 : f32 to vector<16x16xf32>
    %470 = arith.mulf %468, %469 : vector<16x16xf32>
    %471 = arith.addf %470, %3 : vector<16x16xf32>
    %cst_251 = arith.constant dense<0xFF800000> : vector<16xf32>
    %472 = vector.multi_reduction <maximumf>, %471, %cst_251 [1] : vector<16x16xf32> to vector<16xf32>
    %473 = vector.shape_cast %472 : vector<16xf32> to vector<16x1xf32>
    %474 = vector.broadcast %473 : vector<16x1xf32> to vector<16x16xf32>
    %475 = arith.subf %471, %474 : vector<16x16xf32>
    %476 = math.exp %475 : vector<16x16xf32>
    %cst_252 = arith.constant dense<0.000000e+00> : vector<16xf32>
    %477 = vector.multi_reduction <add>, %476, %cst_252 [1] : vector<16x16xf32> to vector<16xf32>
    %478 = vector.shape_cast %477 : vector<16xf32> to vector<16x1xf32>
    %479 = tpu.reciprocal %478 {approx = true} : vector<16x1xf32> -> vector<16x1xf32>
    %480 = vector.broadcast %479 : vector<16x1xf32> to vector<16x16xf32>
    %481 = arith.mulf %476, %480 : vector<16x16xf32>
    %482 = arith.truncf %481 : vector<16x16xf32> to vector<16x16xbf16>
    %483 = vector.extract_strided_slice %394 {offsets = [0, 24], sizes = [16, 8], strides = [1, 1]} : vector<16x32xbf16> to vector<16x8xbf16>
    %cst_253 = arith.constant dense<0.000000e+00> : vector<16x8xf32>
    %484 = tpu.matmul %482, %483, %cst_253 {dimension_numbers = #tpu.dot_dimension_numbers<[1], [0], [0], [1], [0, 0, 1, 1], [], []>} : vector<16x16xbf16>, vector<16x8xbf16>, vector<16x8xf32> -> vector<16x8xf32>
    %485 = arith.truncf %484 : vector<16x8xf32> to vector<16x8xbf16>
    %c1_254 = arith.constant 1 : index
    %c3_255 = arith.constant 3 : index
    %c0_256 = arith.constant 0 : index
    %c0_257 = arith.constant 0 : index
    %486 = vector.load %arg7[%c1_254, %c3_255, %c0_256, %c0_257] : memref<2x4x8x32xbf16, #tpu.memory_space<vmem>>, vector<1x1x8x32xbf16>
    %487 = vector.shape_cast %486 : vector<1x1x8x32xbf16> to vector<8x32xbf16>
    %cst_258 = arith.constant dense<0.000000e+00> : vector<16x32xf32>
    %488 = tpu.matmul %485, %487, %cst_258 {dimension_numbers = #tpu.dot_dimension_numbers<[1], [0], [0], [1], [0, 0, 1, 1], [], []>} : vector<16x8xbf16>, vector<8x32xbf16>, vector<16x32xf32> -> vector<16x32xf32>
    %489 = arith.addf %465, %488 : vector<16x32xf32>
    %c1_259 = arith.constant 1 : index
    %c0_260 = arith.constant 0 : index
    %c0_261 = arith.constant 0 : index
    %490 = vector.load %arg11[%c1_259, %c0_260, %c0_261] : memref<2x1x32xf32, #tpu.memory_space<vmem>>, vector<1x1x32xf32>
    %491 = vector.shape_cast %490 : vector<1x1x32xf32> to vector<1x32xf32>
    %492 = vector.broadcast %491 : vector<1x32xf32> to vector<16x32xf32>
    %493 = arith.addf %489, %492 : vector<16x32xf32>
    %494 = arith.addf %345, %493 : vector<16x32xf32>
    %c1_262 = arith.constant 1 : index
    %c1_263 = arith.constant 1 : index
    %c0_264 = arith.constant 0 : index
    %c0_265 = arith.constant 0 : index
    %495 = vector.load %arg24[%c1_262, %c1_263, %c0_264, %c0_265] : memref<2x3x1x32xf32, #tpu.memory_space<vmem>>, vector<1x1x1x32xf32>
    %496 = vector.shape_cast %495 : vector<1x1x1x32xf32> to vector<1x32xf32>
    %c1_266 = arith.constant 1 : index
    %c1_267 = arith.constant 1 : index
    %c0_268 = arith.constant 0 : index
    %c0_269 = arith.constant 0 : index
    %497 = vector.load %arg25[%c1_266, %c1_267, %c0_268, %c0_269] : memref<2x3x1x32xf32, #tpu.memory_space<vmem>>, vector<1x1x1x32xf32>
    %498 = vector.shape_cast %497 : vector<1x1x1x32xf32> to vector<1x32xf32>
    %cst_270 = arith.constant dense<0.000000e+00> : vector<16xf32>
    %499 = vector.multi_reduction <add>, %494, %cst_270 [1] : vector<16x32xf32> to vector<16xf32>
    %500 = vector.shape_cast %499 : vector<16xf32> to vector<16x1xf32>
    %cst_271 = arith.constant 3.200000e+01 : f32
    %501 = vector.broadcast %cst_271 : f32 to vector<16x1xf32>
    %502 = arith.divf %500, %501 : vector<16x1xf32>
    %503 = vector.broadcast %502 : vector<16x1xf32> to vector<16x32xf32>
    %504 = arith.subf %494, %503 : vector<16x32xf32>
    %505 = arith.mulf %504, %504 : vector<16x32xf32>
    %cst_272 = arith.constant dense<0.000000e+00> : vector<16xf32>
    %506 = vector.multi_reduction <add>, %505, %cst_272 [1] : vector<16x32xf32> to vector<16xf32>
    %507 = vector.shape_cast %506 : vector<16xf32> to vector<16x1xf32>
    %cst_273 = arith.constant 0.0322580636 : f32
    %508 = vector.broadcast %cst_273 : f32 to vector<16x1xf32>
    %509 = arith.mulf %507, %508 : vector<16x1xf32>
    %510 = vector.broadcast %496 : vector<1x32xf32> to vector<16x32xf32>
    %511 = arith.mulf %510, %504 : vector<16x32xf32>
    %512 = math.sqrt %509 : vector<16x1xf32>
    %cst_274 = arith.constant 9.99999997E-7 : f32
    %513 = vector.broadcast %cst_274 : f32 to vector<16x1xf32>
    %514 = arith.addf %512, %513 : vector<16x1xf32>
    %515 = vector.broadcast %514 : vector<16x1xf32> to vector<16x32xf32>
    %516 = arith.divf %511, %515 : vector<16x32xf32>
    %517 = vector.broadcast %498 : vector<1x32xf32> to vector<16x32xf32>
    %518 = arith.addf %516, %517 : vector<16x32xf32>
    %519 = arith.truncf %518 : vector<16x32xf32> to vector<16x32xbf16>
    %c1_275 = arith.constant 1 : index
    %c0_276 = arith.constant 0 : index
    %c0_277 = arith.constant 0 : index
    %520 = vector.load %arg12[%c1_275, %c0_276, %c0_277] : memref<2x32x32xbf16, #tpu.memory_space<vmem>>, vector<1x32x32xbf16>
    %521 = vector.shape_cast %520 : vector<1x32x32xbf16> to vector<32x32xbf16>
    %cst_278 = arith.constant dense<0.000000e+00> : vector<16x32xf32>
    %522 = tpu.matmul %519, %521, %cst_278 {dimension_numbers = #tpu.dot_dimension_numbers<[1], [0], [0], [1], [0, 0, 1, 1], [], []>} : vector<16x32xbf16>, vector<32x32xbf16>, vector<16x32xf32> -> vector<16x32xf32>
    %c1_279 = arith.constant 1 : index
    %c0_280 = arith.constant 0 : index
    %c0_281 = arith.constant 0 : index
    %523 = vector.load %arg16[%c1_279, %c0_280, %c0_281] : memref<2x1x32xf32, #tpu.memory_space<vmem>>, vector<1x1x32xf32>
    %524 = vector.shape_cast %523 : vector<1x1x32xf32> to vector<1x32xf32>
    %525 = vector.broadcast %524 : vector<1x32xf32> to vector<16x32xf32>
    %526 = arith.addf %522, %525 : vector<16x32xf32>
    %c1_282 = arith.constant 1 : index
    %c0_283 = arith.constant 0 : index
    %c0_284 = arith.constant 0 : index
    %527 = vector.load %arg13[%c1_282, %c0_283, %c0_284] : memref<2x32x32xbf16, #tpu.memory_space<vmem>>, vector<1x32x32xbf16>
    %528 = vector.shape_cast %527 : vector<1x32x32xbf16> to vector<32x32xbf16>
    %cst_285 = arith.constant dense<0.000000e+00> : vector<16x32xf32>
    %529 = tpu.matmul %2, %528, %cst_285 {dimension_numbers = #tpu.dot_dimension_numbers<[1], [0], [0], [1], [0, 0, 1, 1], [], []>} : vector<16x32xbf16>, vector<32x32xbf16>, vector<16x32xf32> -> vector<16x32xf32>
    %c1_286 = arith.constant 1 : index
    %c0_287 = arith.constant 0 : index
    %c0_288 = arith.constant 0 : index
    %530 = vector.load %arg17[%c1_286, %c0_287, %c0_288] : memref<2x1x32xf32, #tpu.memory_space<vmem>>, vector<1x1x32xf32>
    %531 = vector.shape_cast %530 : vector<1x1x32xf32> to vector<1x32xf32>
    %532 = vector.broadcast %531 : vector<1x32xf32> to vector<16x32xf32>
    %533 = arith.addf %529, %532 : vector<16x32xf32>
    %c1_289 = arith.constant 1 : index
    %c0_290 = arith.constant 0 : index
    %c0_291 = arith.constant 0 : index
    %534 = vector.load %arg14[%c1_289, %c0_290, %c0_291] : memref<2x32x32xbf16, #tpu.memory_space<vmem>>, vector<1x32x32xbf16>
    %535 = vector.shape_cast %534 : vector<1x32x32xbf16> to vector<32x32xbf16>
    %cst_292 = arith.constant dense<0.000000e+00> : vector<16x32xf32>
    %536 = tpu.matmul %2, %535, %cst_292 {dimension_numbers = #tpu.dot_dimension_numbers<[1], [0], [0], [1], [0, 0, 1, 1], [], []>} : vector<16x32xbf16>, vector<32x32xbf16>, vector<16x32xf32> -> vector<16x32xf32>
    %c1_293 = arith.constant 1 : index
    %c0_294 = arith.constant 0 : index
    %c0_295 = arith.constant 0 : index
    %537 = vector.load %arg18[%c1_293, %c0_294, %c0_295] : memref<2x1x32xf32, #tpu.memory_space<vmem>>, vector<1x1x32xf32>
    %538 = vector.shape_cast %537 : vector<1x1x32xf32> to vector<1x32xf32>
    %539 = vector.broadcast %538 : vector<1x32xf32> to vector<16x32xf32>
    %540 = arith.addf %536, %539 : vector<16x32xf32>
    %541 = arith.truncf %526 : vector<16x32xf32> to vector<16x32xbf16>
    %542 = arith.truncf %533 : vector<16x32xf32> to vector<16x32xbf16>
    %543 = arith.truncf %540 : vector<16x32xf32> to vector<16x32xbf16>
    %544 = vector.extract_strided_slice %541 {offsets = [0, 0], sizes = [16, 8], strides = [1, 1]} : vector<16x32xbf16> to vector<16x8xbf16>
    %545 = vector.extract_strided_slice %542 {offsets = [0, 0], sizes = [16, 8], strides = [1, 1]} : vector<16x32xbf16> to vector<16x8xbf16>
    %cst_296 = arith.constant dense<0.000000e+00> : vector<16x16xf32>
    %546 = tpu.matmul %544, %545, %cst_296 {dimension_numbers = #tpu.dot_dimension_numbers<[1], [1], [0], [0], [0, 0, 1, 0], [], []>} : vector<16x8xbf16>, vector<16x8xbf16>, vector<16x16xf32> -> vector<16x16xf32>
    %cst_297 = arith.constant 0.353553385 : f32
    %547 = vector.broadcast %cst_297 : f32 to vector<16x16xf32>
    %548 = arith.mulf %546, %547 : vector<16x16xf32>
    %549 = arith.addf %548, %4 : vector<16x16xf32>
    %cst_298 = arith.constant dense<0xFF800000> : vector<16xf32>
    %550 = vector.multi_reduction <maximumf>, %549, %cst_298 [1] : vector<16x16xf32> to vector<16xf32>
    %551 = vector.shape_cast %550 : vector<16xf32> to vector<16x1xf32>
    %552 = vector.broadcast %551 : vector<16x1xf32> to vector<16x16xf32>
    %553 = arith.subf %549, %552 : vector<16x16xf32>
    %554 = math.exp %553 : vector<16x16xf32>
    %cst_299 = arith.constant dense<0.000000e+00> : vector<16xf32>
    %555 = vector.multi_reduction <add>, %554, %cst_299 [1] : vector<16x16xf32> to vector<16xf32>
    %556 = vector.shape_cast %555 : vector<16xf32> to vector<16x1xf32>
    %557 = tpu.reciprocal %556 {approx = true} : vector<16x1xf32> -> vector<16x1xf32>
    %558 = vector.broadcast %557 : vector<16x1xf32> to vector<16x16xf32>
    %559 = arith.mulf %554, %558 : vector<16x16xf32>
    %560 = arith.truncf %559 : vector<16x16xf32> to vector<16x16xbf16>
    %561 = vector.extract_strided_slice %543 {offsets = [0, 0], sizes = [16, 8], strides = [1, 1]} : vector<16x32xbf16> to vector<16x8xbf16>
    %cst_300 = arith.constant dense<0.000000e+00> : vector<16x8xf32>
    %562 = tpu.matmul %560, %561, %cst_300 {dimension_numbers = #tpu.dot_dimension_numbers<[1], [0], [0], [1], [0, 0, 1, 1], [], []>} : vector<16x16xbf16>, vector<16x8xbf16>, vector<16x8xf32> -> vector<16x8xf32>
    %563 = arith.truncf %562 : vector<16x8xf32> to vector<16x8xbf16>
    %c1_301 = arith.constant 1 : index
    %c0_302 = arith.constant 0 : index
    %c0_303 = arith.constant 0 : index
    %c0_304 = arith.constant 0 : index
    %564 = vector.load %arg15[%c1_301, %c0_302, %c0_303, %c0_304] : memref<2x4x8x32xbf16, #tpu.memory_space<vmem>>, vector<1x1x8x32xbf16>
    %565 = vector.shape_cast %564 : vector<1x1x8x32xbf16> to vector<8x32xbf16>
    %cst_305 = arith.constant dense<0.000000e+00> : vector<16x32xf32>
    %566 = tpu.matmul %563, %565, %cst_305 {dimension_numbers = #tpu.dot_dimension_numbers<[1], [0], [0], [1], [0, 0, 1, 1], [], []>} : vector<16x8xbf16>, vector<8x32xbf16>, vector<16x32xf32> -> vector<16x32xf32>
    %567 = vector.extract_strided_slice %541 {offsets = [0, 8], sizes = [16, 8], strides = [1, 1]} : vector<16x32xbf16> to vector<16x8xbf16>
    %568 = vector.extract_strided_slice %542 {offsets = [0, 8], sizes = [16, 8], strides = [1, 1]} : vector<16x32xbf16> to vector<16x8xbf16>
    %cst_306 = arith.constant dense<0.000000e+00> : vector<16x16xf32>
    %569 = tpu.matmul %567, %568, %cst_306 {dimension_numbers = #tpu.dot_dimension_numbers<[1], [1], [0], [0], [0, 0, 1, 0], [], []>} : vector<16x8xbf16>, vector<16x8xbf16>, vector<16x16xf32> -> vector<16x16xf32>
    %cst_307 = arith.constant 0.353553385 : f32
    %570 = vector.broadcast %cst_307 : f32 to vector<16x16xf32>
    %571 = arith.mulf %569, %570 : vector<16x16xf32>
    %572 = arith.addf %571, %4 : vector<16x16xf32>
    %cst_308 = arith.constant dense<0xFF800000> : vector<16xf32>
    %573 = vector.multi_reduction <maximumf>, %572, %cst_308 [1] : vector<16x16xf32> to vector<16xf32>
    %574 = vector.shape_cast %573 : vector<16xf32> to vector<16x1xf32>
    %575 = vector.broadcast %574 : vector<16x1xf32> to vector<16x16xf32>
    %576 = arith.subf %572, %575 : vector<16x16xf32>
    %577 = math.exp %576 : vector<16x16xf32>
    %cst_309 = arith.constant dense<0.000000e+00> : vector<16xf32>
    %578 = vector.multi_reduction <add>, %577, %cst_309 [1] : vector<16x16xf32> to vector<16xf32>
    %579 = vector.shape_cast %578 : vector<16xf32> to vector<16x1xf32>
    %580 = tpu.reciprocal %579 {approx = true} : vector<16x1xf32> -> vector<16x1xf32>
    %581 = vector.broadcast %580 : vector<16x1xf32> to vector<16x16xf32>
    %582 = arith.mulf %577, %581 : vector<16x16xf32>
    %583 = arith.truncf %582 : vector<16x16xf32> to vector<16x16xbf16>
    %584 = vector.extract_strided_slice %543 {offsets = [0, 8], sizes = [16, 8], strides = [1, 1]} : vector<16x32xbf16> to vector<16x8xbf16>
    %cst_310 = arith.constant dense<0.000000e+00> : vector<16x8xf32>
    %585 = tpu.matmul %583, %584, %cst_310 {dimension_numbers = #tpu.dot_dimension_numbers<[1], [0], [0], [1], [0, 0, 1, 1], [], []>} : vector<16x16xbf16>, vector<16x8xbf16>, vector<16x8xf32> -> vector<16x8xf32>
    %586 = arith.truncf %585 : vector<16x8xf32> to vector<16x8xbf16>
    %c1_311 = arith.constant 1 : index
    %c1_312 = arith.constant 1 : index
    %c0_313 = arith.constant 0 : index
    %c0_314 = arith.constant 0 : index
    %587 = vector.load %arg15[%c1_311, %c1_312, %c0_313, %c0_314] : memref<2x4x8x32xbf16, #tpu.memory_space<vmem>>, vector<1x1x8x32xbf16>
    %588 = vector.shape_cast %587 : vector<1x1x8x32xbf16> to vector<8x32xbf16>
    %cst_315 = arith.constant dense<0.000000e+00> : vector<16x32xf32>
    %589 = tpu.matmul %586, %588, %cst_315 {dimension_numbers = #tpu.dot_dimension_numbers<[1], [0], [0], [1], [0, 0, 1, 1], [], []>} : vector<16x8xbf16>, vector<8x32xbf16>, vector<16x32xf32> -> vector<16x32xf32>
    %590 = arith.addf %566, %589 : vector<16x32xf32>
    %591 = vector.extract_strided_slice %541 {offsets = [0, 16], sizes = [16, 8], strides = [1, 1]} : vector<16x32xbf16> to vector<16x8xbf16>
    %592 = vector.extract_strided_slice %542 {offsets = [0, 16], sizes = [16, 8], strides = [1, 1]} : vector<16x32xbf16> to vector<16x8xbf16>
    %cst_316 = arith.constant dense<0.000000e+00> : vector<16x16xf32>
    %593 = tpu.matmul %591, %592, %cst_316 {dimension_numbers = #tpu.dot_dimension_numbers<[1], [1], [0], [0], [0, 0, 1, 0], [], []>} : vector<16x8xbf16>, vector<16x8xbf16>, vector<16x16xf32> -> vector<16x16xf32>
    %cst_317 = arith.constant 0.353553385 : f32
    %594 = vector.broadcast %cst_317 : f32 to vector<16x16xf32>
    %595 = arith.mulf %593, %594 : vector<16x16xf32>
    %596 = arith.addf %595, %4 : vector<16x16xf32>
    %cst_318 = arith.constant dense<0xFF800000> : vector<16xf32>
    %597 = vector.multi_reduction <maximumf>, %596, %cst_318 [1] : vector<16x16xf32> to vector<16xf32>
    %598 = vector.shape_cast %597 : vector<16xf32> to vector<16x1xf32>
    %599 = vector.broadcast %598 : vector<16x1xf32> to vector<16x16xf32>
    %600 = arith.subf %596, %599 : vector<16x16xf32>
    %601 = math.exp %600 : vector<16x16xf32>
    %cst_319 = arith.constant dense<0.000000e+00> : vector<16xf32>
    %602 = vector.multi_reduction <add>, %601, %cst_319 [1] : vector<16x16xf32> to vector<16xf32>
    %603 = vector.shape_cast %602 : vector<16xf32> to vector<16x1xf32>
    %604 = tpu.reciprocal %603 {approx = true} : vector<16x1xf32> -> vector<16x1xf32>
    %605 = vector.broadcast %604 : vector<16x1xf32> to vector<16x16xf32>
    %606 = arith.mulf %601, %605 : vector<16x16xf32>
    %607 = arith.truncf %606 : vector<16x16xf32> to vector<16x16xbf16>
    %608 = vector.extract_strided_slice %543 {offsets = [0, 16], sizes = [16, 8], strides = [1, 1]} : vector<16x32xbf16> to vector<16x8xbf16>
    %cst_320 = arith.constant dense<0.000000e+00> : vector<16x8xf32>
    %609 = tpu.matmul %607, %608, %cst_320 {dimension_numbers = #tpu.dot_dimension_numbers<[1], [0], [0], [1], [0, 0, 1, 1], [], []>} : vector<16x16xbf16>, vector<16x8xbf16>, vector<16x8xf32> -> vector<16x8xf32>
    %610 = arith.truncf %609 : vector<16x8xf32> to vector<16x8xbf16>
    %c1_321 = arith.constant 1 : index
    %c2_322 = arith.constant 2 : index
    %c0_323 = arith.constant 0 : index
    %c0_324 = arith.constant 0 : index
    %611 = vector.load %arg15[%c1_321, %c2_322, %c0_323, %c0_324] : memref<2x4x8x32xbf16, #tpu.memory_space<vmem>>, vector<1x1x8x32xbf16>
    %612 = vector.shape_cast %611 : vector<1x1x8x32xbf16> to vector<8x32xbf16>
    %cst_325 = arith.constant dense<0.000000e+00> : vector<16x32xf32>
    %613 = tpu.matmul %610, %612, %cst_325 {dimension_numbers = #tpu.dot_dimension_numbers<[1], [0], [0], [1], [0, 0, 1, 1], [], []>} : vector<16x8xbf16>, vector<8x32xbf16>, vector<16x32xf32> -> vector<16x32xf32>
    %614 = arith.addf %590, %613 : vector<16x32xf32>
    %615 = vector.extract_strided_slice %541 {offsets = [0, 24], sizes = [16, 8], strides = [1, 1]} : vector<16x32xbf16> to vector<16x8xbf16>
    %616 = vector.extract_strided_slice %542 {offsets = [0, 24], sizes = [16, 8], strides = [1, 1]} : vector<16x32xbf16> to vector<16x8xbf16>
    %cst_326 = arith.constant dense<0.000000e+00> : vector<16x16xf32>
    %617 = tpu.matmul %615, %616, %cst_326 {dimension_numbers = #tpu.dot_dimension_numbers<[1], [1], [0], [0], [0, 0, 1, 0], [], []>} : vector<16x8xbf16>, vector<16x8xbf16>, vector<16x16xf32> -> vector<16x16xf32>
    %cst_327 = arith.constant 0.353553385 : f32
    %618 = vector.broadcast %cst_327 : f32 to vector<16x16xf32>
    %619 = arith.mulf %617, %618 : vector<16x16xf32>
    %620 = arith.addf %619, %4 : vector<16x16xf32>
    %cst_328 = arith.constant dense<0xFF800000> : vector<16xf32>
    %621 = vector.multi_reduction <maximumf>, %620, %cst_328 [1] : vector<16x16xf32> to vector<16xf32>
    %622 = vector.shape_cast %621 : vector<16xf32> to vector<16x1xf32>
    %623 = vector.broadcast %622 : vector<16x1xf32> to vector<16x16xf32>
    %624 = arith.subf %620, %623 : vector<16x16xf32>
    %625 = math.exp %624 : vector<16x16xf32>
    %cst_329 = arith.constant dense<0.000000e+00> : vector<16xf32>
    %626 = vector.multi_reduction <add>, %625, %cst_329 [1] : vector<16x16xf32> to vector<16xf32>
    %627 = vector.shape_cast %626 : vector<16xf32> to vector<16x1xf32>
    %628 = tpu.reciprocal %627 {approx = true} : vector<16x1xf32> -> vector<16x1xf32>
    %629 = vector.broadcast %628 : vector<16x1xf32> to vector<16x16xf32>
    %630 = arith.mulf %625, %629 : vector<16x16xf32>
    %631 = arith.truncf %630 : vector<16x16xf32> to vector<16x16xbf16>
    %632 = vector.extract_strided_slice %543 {offsets = [0, 24], sizes = [16, 8], strides = [1, 1]} : vector<16x32xbf16> to vector<16x8xbf16>
    %cst_330 = arith.constant dense<0.000000e+00> : vector<16x8xf32>
    %633 = tpu.matmul %631, %632, %cst_330 {dimension_numbers = #tpu.dot_dimension_numbers<[1], [0], [0], [1], [0, 0, 1, 1], [], []>} : vector<16x16xbf16>, vector<16x8xbf16>, vector<16x8xf32> -> vector<16x8xf32>
    %634 = arith.truncf %633 : vector<16x8xf32> to vector<16x8xbf16>
    %c1_331 = arith.constant 1 : index
    %c3_332 = arith.constant 3 : index
    %c0_333 = arith.constant 0 : index
    %c0_334 = arith.constant 0 : index
    %635 = vector.load %arg15[%c1_331, %c3_332, %c0_333, %c0_334] : memref<2x4x8x32xbf16, #tpu.memory_space<vmem>>, vector<1x1x8x32xbf16>
    %636 = vector.shape_cast %635 : vector<1x1x8x32xbf16> to vector<8x32xbf16>
    %cst_335 = arith.constant dense<0.000000e+00> : vector<16x32xf32>
    %637 = tpu.matmul %634, %636, %cst_335 {dimension_numbers = #tpu.dot_dimension_numbers<[1], [0], [0], [1], [0, 0, 1, 1], [], []>} : vector<16x8xbf16>, vector<8x32xbf16>, vector<16x32xf32> -> vector<16x32xf32>
    %638 = arith.addf %614, %637 : vector<16x32xf32>
    %c1_336 = arith.constant 1 : index
    %c0_337 = arith.constant 0 : index
    %c0_338 = arith.constant 0 : index
    %639 = vector.load %arg19[%c1_336, %c0_337, %c0_338] : memref<2x1x32xf32, #tpu.memory_space<vmem>>, vector<1x1x32xf32>
    %640 = vector.shape_cast %639 : vector<1x1x32xf32> to vector<1x32xf32>
    %641 = vector.broadcast %640 : vector<1x32xf32> to vector<16x32xf32>
    %642 = arith.addf %638, %641 : vector<16x32xf32>
    %643 = arith.addf %494, %642 : vector<16x32xf32>
    %c1_339 = arith.constant 1 : index
    %c2_340 = arith.constant 2 : index
    %c0_341 = arith.constant 0 : index
    %c0_342 = arith.constant 0 : index
    %644 = vector.load %arg24[%c1_339, %c2_340, %c0_341, %c0_342] : memref<2x3x1x32xf32, #tpu.memory_space<vmem>>, vector<1x1x1x32xf32>
    %645 = vector.shape_cast %644 : vector<1x1x1x32xf32> to vector<1x32xf32>
    %c1_343 = arith.constant 1 : index
    %c2_344 = arith.constant 2 : index
    %c0_345 = arith.constant 0 : index
    %c0_346 = arith.constant 0 : index
    %646 = vector.load %arg25[%c1_343, %c2_344, %c0_345, %c0_346] : memref<2x3x1x32xf32, #tpu.memory_space<vmem>>, vector<1x1x1x32xf32>
    %647 = vector.shape_cast %646 : vector<1x1x1x32xf32> to vector<1x32xf32>
    %cst_347 = arith.constant dense<0.000000e+00> : vector<16xf32>
    %648 = vector.multi_reduction <add>, %643, %cst_347 [1] : vector<16x32xf32> to vector<16xf32>
    %649 = vector.shape_cast %648 : vector<16xf32> to vector<16x1xf32>
    %cst_348 = arith.constant 3.200000e+01 : f32
    %650 = vector.broadcast %cst_348 : f32 to vector<16x1xf32>
    %651 = arith.divf %649, %650 : vector<16x1xf32>
    %652 = vector.broadcast %651 : vector<16x1xf32> to vector<16x32xf32>
    %653 = arith.subf %643, %652 : vector<16x32xf32>
    %654 = arith.mulf %653, %653 : vector<16x32xf32>
    %cst_349 = arith.constant dense<0.000000e+00> : vector<16xf32>
    %655 = vector.multi_reduction <add>, %654, %cst_349 [1] : vector<16x32xf32> to vector<16xf32>
    %656 = vector.shape_cast %655 : vector<16xf32> to vector<16x1xf32>
    %cst_350 = arith.constant 0.0322580636 : f32
    %657 = vector.broadcast %cst_350 : f32 to vector<16x1xf32>
    %658 = arith.mulf %656, %657 : vector<16x1xf32>
    %659 = vector.broadcast %645 : vector<1x32xf32> to vector<16x32xf32>
    %660 = arith.mulf %659, %653 : vector<16x32xf32>
    %661 = math.sqrt %658 : vector<16x1xf32>
    %cst_351 = arith.constant 9.99999997E-7 : f32
    %662 = vector.broadcast %cst_351 : f32 to vector<16x1xf32>
    %663 = arith.addf %661, %662 : vector<16x1xf32>
    %664 = vector.broadcast %663 : vector<16x1xf32> to vector<16x32xf32>
    %665 = arith.divf %660, %664 : vector<16x32xf32>
    %666 = vector.broadcast %647 : vector<1x32xf32> to vector<16x32xf32>
    %667 = arith.addf %665, %666 : vector<16x32xf32>
    %668 = arith.truncf %667 : vector<16x32xf32> to vector<16x32xbf16>
    %c1_352 = arith.constant 1 : index
    %c0_353 = arith.constant 0 : index
    %c0_354 = arith.constant 0 : index
    %669 = vector.load %arg20[%c1_352, %c0_353, %c0_354] : memref<2x32x64xbf16, #tpu.memory_space<vmem>>, vector<1x32x64xbf16>
    %670 = vector.shape_cast %669 : vector<1x32x64xbf16> to vector<32x64xbf16>
    %cst_355 = arith.constant dense<0.000000e+00> : vector<16x64xf32>
    %671 = tpu.matmul %668, %670, %cst_355 {dimension_numbers = #tpu.dot_dimension_numbers<[1], [0], [0], [1], [0, 0, 1, 1], [], []>} : vector<16x32xbf16>, vector<32x64xbf16>, vector<16x64xf32> -> vector<16x64xf32>
    %c1_356 = arith.constant 1 : index
    %c0_357 = arith.constant 0 : index
    %c0_358 = arith.constant 0 : index
    %672 = vector.load %arg21[%c1_356, %c0_357, %c0_358] : memref<2x1x64xf32, #tpu.memory_space<vmem>>, vector<1x1x64xf32>
    %673 = vector.shape_cast %672 : vector<1x1x64xf32> to vector<1x64xf32>
    %674 = vector.broadcast %673 : vector<1x64xf32> to vector<16x64xf32>
    %675 = arith.addf %671, %674 : vector<16x64xf32>
    %cst_359 = arith.constant 0.000000e+00 : f32
    %676 = vector.broadcast %cst_359 : f32 to vector<16x64xf32>
    %677 = arith.maximumf %675, %676 : vector<16x64xf32>
    %678 = arith.truncf %677 : vector<16x64xf32> to vector<16x64xbf16>
    %c1_360 = arith.constant 1 : index
    %c0_361 = arith.constant 0 : index
    %c0_362 = arith.constant 0 : index
    %679 = vector.load %arg22[%c1_360, %c0_361, %c0_362] : memref<2x64x32xbf16, #tpu.memory_space<vmem>>, vector<1x64x32xbf16>
    %680 = vector.shape_cast %679 : vector<1x64x32xbf16> to vector<64x32xbf16>
    %cst_363 = arith.constant dense<0.000000e+00> : vector<16x32xf32>
    %681 = tpu.matmul %678, %680, %cst_363 {dimension_numbers = #tpu.dot_dimension_numbers<[1], [0], [0], [1], [0, 0, 1, 1], [], []>} : vector<16x64xbf16>, vector<64x32xbf16>, vector<16x32xf32> -> vector<16x32xf32>
    %682 = arith.addf %643, %681 : vector<16x32xf32>
    %c1_364 = arith.constant 1 : index
    %c0_365 = arith.constant 0 : index
    %c0_366 = arith.constant 0 : index
    %683 = vector.load %arg23[%c1_364, %c0_365, %c0_366] : memref<2x1x32xf32, #tpu.memory_space<vmem>>, vector<1x1x32xf32>
    %684 = vector.shape_cast %683 : vector<1x1x32xf32> to vector<1x32xf32>
    %685 = vector.broadcast %684 : vector<1x32xf32> to vector<16x32xf32>
    %686 = arith.addf %682, %685 : vector<16x32xf32>
    %c0_367 = arith.constant 0 : index
    %c0_368 = arith.constant 0 : index
    %687 = vector.load %arg26[%c0_367, %c0_368] : memref<1x32xf32, #tpu.memory_space<vmem>>, vector<1x32xf32>
    %c0_369 = arith.constant 0 : index
    %c0_370 = arith.constant 0 : index
    %688 = vector.load %arg27[%c0_369, %c0_370] : memref<1x32xf32, #tpu.memory_space<vmem>>, vector<1x32xf32>
    %cst_371 = arith.constant dense<0.000000e+00> : vector<16xf32>
    %689 = vector.multi_reduction <add>, %686, %cst_371 [1] : vector<16x32xf32> to vector<16xf32>
    %690 = vector.shape_cast %689 : vector<16xf32> to vector<16x1xf32>
    %cst_372 = arith.constant 3.200000e+01 : f32
    %691 = vector.broadcast %cst_372 : f32 to vector<16x1xf32>
    %692 = arith.divf %690, %691 : vector<16x1xf32>
    %693 = vector.broadcast %692 : vector<16x1xf32> to vector<16x32xf32>
    %694 = arith.subf %686, %693 : vector<16x32xf32>
    %695 = arith.mulf %694, %694 : vector<16x32xf32>
    %cst_373 = arith.constant dense<0.000000e+00> : vector<16xf32>
    %696 = vector.multi_reduction <add>, %695, %cst_373 [1] : vector<16x32xf32> to vector<16xf32>
    %697 = vector.shape_cast %696 : vector<16xf32> to vector<16x1xf32>
    %cst_374 = arith.constant 0.0322580636 : f32
    %698 = vector.broadcast %cst_374 : f32 to vector<16x1xf32>
    %699 = arith.mulf %697, %698 : vector<16x1xf32>
    %700 = vector.broadcast %687 : vector<1x32xf32> to vector<16x32xf32>
    %701 = arith.mulf %700, %694 : vector<16x32xf32>
    %702 = math.sqrt %699 : vector<16x1xf32>
    %cst_375 = arith.constant 9.99999997E-7 : f32
    %703 = vector.broadcast %cst_375 : f32 to vector<16x1xf32>
    %704 = arith.addf %702, %703 : vector<16x1xf32>
    %705 = vector.broadcast %704 : vector<16x1xf32> to vector<16x32xf32>
    %706 = arith.divf %701, %705 : vector<16x32xf32>
    %707 = vector.broadcast %688 : vector<1x32xf32> to vector<16x32xf32>
    %708 = arith.addf %706, %707 : vector<16x32xf32>
    %c0_376 = arith.constant 0 : index
    %c0_377 = arith.constant 0 : index
    %709 = vector.load %arg28[%c0_376, %c0_377] : memref<16x32xf32, #tpu.memory_space<vmem>>, vector<16x32xf32>
    tpu.vector_store %arg28[%c0_376, %c0_377], %708 {strides = array<i32>} : memref<16x32xf32, #tpu.memory_space<vmem>>, vector<16x32xf32>,
    return
  }
}

</mosaic_0001>

<bundles_post_ra>
// kernel: decoder_apply.1
= control target key start
LH: loop header
LB: loop body
LE: loop exit
PB: predicated region body
PF: predicated region fallthrough
CT: control target
= control target key end

     0   :  { %s4937_s0 = inlined_call_operand.vmem [shape: f32[16,32], index: 0, kind: input, shape index: {}]   ;;  %s4938_s1 = inlined_call_operand.hbm [shape: f32[16,32], index: 1, kind: input, shape index: {}]   ;;  %s4939_s2 = inlined_call_operand.vmem [shape: f32[16,16], index: 2, kind: input, shape index: {}]   ;;  %s4940_s3 = inlined_call_operand.vmem [shape: f32[16,16], index: 3, kind: input, shape index: {}]   ;;  %s4941_s4 = inlined_call_operand.vmem [shape: bf16[2,32,32], index: 4, kind: input, shape index: {}]   ;;  %s4942_s5 = inlined_call_operand.vmem [shape: bf16[2,32,32], index: 5, kind: input, shape index: {}]   ;;  %s4943_s6 = inlined_call_operand.vmem [shape: bf16[2,32,32], index: 6, kind: input, shape index: {}]   ;;  %s4944_s7 = inlined_call_operand.vmem [shape: bf16[2,4,8,32], index: 7, kind: input, shape index: {}]   ;;  %s4945_s8 = inlined_call_operand.vmem [shape: f32[2,1,32], index: 8, kind: input, shape index: {}]   ;;  %s4946_s9 = inlined_call_operand.hbm [shape: f32[2,1,32], index: 9, kind: input, shape index: {}]   ;;  %s4947_s10 = inlined_call_operand.vmem [shape: f32[2,1,32], index: 10, kind: input, shape index: {}]   ;;  %s4948_s11 = inlined_call_operand.hbm [shape: f32[2,1,32], index: 11, kind: input, shape index: {}]   ;;  %s4949_s12 = inlined_call_operand.vmem [shape: bf16[2,32,32], index: 12, kind: input, shape index: {}]   ;;  %s4950_s13 = inlined_call_operand.vmem [shape: bf16[2,32,32], index: 13, kind: input, shape index: {}]   ;;  %s4951_s14 = inlined_call_operand.vmem [shape: bf16[2,32,32], index: 14, kind: input, shape index: {}]   ;;  %s4952_s15 = inlined_call_operand.vmem [shape: bf16[2,4,8,32], index: 15, kind: input, shape index: {}]   ;;  %s4953_s16 = inlined_call_operand.vmem [shape: f32[2,1,32], index: 16, kind: input, shape index: {}]   ;;  %s4954_s17 = inlined_call_operand.hbm [shape: f32[2,1,32], index: 17, kind: input, shape index: {}]   ;;  %s4955_s18 = inlined_call_operand.hbm [shape: f32[2,1,32], index: 18, kind: input, shape index: {}]   ;;  %s4956_s19 = inlined_call_operand.hbm [shape: f32[2,1,32], index: 19, kind: input, shape index: {}]   ;;  %s4957_s20 = inlined_call_operand.hbm [shape: bf16[2,32,64], index: 20, kind: input, shape index: {}]   ;;  %s4958_s21 = inlined_call_operand.hbm [shape: f32[2,1,64], index: 21, kind: input, shape index: {}]   ;;  %s4959_s22 = inlined_call_operand.vmem [shape: bf16[2,64,32], index: 22, kind: input, shape index: {}]   ;;  %s4960_s23 = inlined_call_operand.hbm [shape: f32[2,1,32], index: 23, kind: input, shape index: {}]   ;;  %s4961_s24 = inlined_call_operand.vmem [shape: f32[2,3,1,32], index: 24, kind: input, shape index: {}]   ;;  %s4962_s25 = inlined_call_operand.vmem [shape: f32[2,3,1,32], index: 25, kind: input, shape index: {}]   ;;  %s4963_s26 = inlined_call_operand.vmem [shape: f32[1,32], index: 26, kind: input, shape index: {}]   ;;  %s4964_s27 = inlined_call_operand.hbm [shape: f32[1,32], index: 27, kind: input, shape index: {}]   ;;  %s4965_s28 = inlined_call_operand.hbm [shape: f32[16,32], index: 28, kind: output, shape index: {}]  }
   0x1   :  { %4978 = sst [smem:[#allocation27_spill]] %s4937_s0 }
   0x2   :  { %4979 = sst [smem:[#allocation28_spill]] %s4938_s1 }
   0x3   :  { %4980 = sst [smem:[#allocation29_spill]] %s4939_s2 }
   0x4   :  { %4981 = sst [smem:[#allocation30_spill]] %s4940_s3 }
   0x5   :  { %4982 = sst [smem:[#allocation31_spill]] %s4941_s4 }
   0x6   :  { %4983 = sst [smem:[#allocation32_spill]] %s4942_s5 }
   0x7   :  { %4984 = sst [smem:[#allocation33_spill]] %s4943_s6 }
   0x8   :  { %4985 = sst [smem:[#allocation34_spill]] %s4944_s7 }
   0x9   :  { %4986 = sst [smem:[#allocation35_spill]] %s4945_s8 }
   0xa   :  { %4987 = sst [smem:[#allocation36_spill]] %s4946_s9 }
   0xb   :  { %4988 = sst [smem:[#allocation37_spill]] %s4947_s10 }
   0xc   :  { %4989 = sst [smem:[#allocation38_spill]] %s4948_s11 }
   0xd   :  { %4990 = sst [smem:[#allocation39_spill]] %s4949_s12 }
   0xe   :  { %33 = vsyncpa [#allocation3], 0 }
   0xf   :  { %34 = vsyncpa [#allocation6], 0 }
  0x10   :  { %35 = vsyncpa [#allocation9], 0 }
  0x11   :  { %36 = vsyncpa [#allocation12], 0 }
  0x12   :  { %37 = vsyncpa [#allocation15], 0 }
  0x13   :  { %38 = vsyncpa [#allocation18], 0  ;;  %s4991_s9 = sld [smem:[#allocation36_spill]] }
  0x19   :  { %s73_s30 = sshll.u32 %s4991_s9, 4  ;;  %s74_s30 = int_to_ptr.hbm [resolvable:$true] %s73_s30 }
  0x1a   :  { %39 = vsyncpa [#allocation4], 0  ;;  %s3995_s3 = smov [#allocation5]   ;;  %s111_s11 = sshll.u32 %s4954_s17, 4  ;;  %s112_s11 = int_to_ptr.hbm [resolvable:$true] %s111_s11 }
  0x1b   :  { %s75_s6 = sshll.u32 %s3995_s3, 4  ;;  %s3996_s29 = smov 16   ;;  %s76_s6 = int_to_ptr.vmem [resolvable:$true] %s75_s6 }
  0x1c   :  { %s3997_s2 = smov 1   ;;  %s3998_s7 = smov [#allocation8]  }
  0x1d   :  { %81 = dma.hbm_to_vmem [thread:$0]  %s74_s30, 32, %s76_s6, [#allocation6], %s3996_s29, %s3996_s29, %s3997_s2  }
  0x1e   :  { %s113_s12 = sshll.u32 %s3998_s7, 4  ;;  %s137_s8 = sshll.u32 %s4956_s19, 4  ;;  %s114_s12 = int_to_ptr.vmem [resolvable:$true] %s113_s12  ;;  %s138_s8 = int_to_ptr.hbm [resolvable:$true] %s137_s8 }
  0x1f   :  { %119 = dma.hbm_to_vmem [thread:$0]  %s112_s11, 32, %s114_s12, [#allocation9], %s3996_s29, %s3996_s29, %s3997_s2  }
  0x20   :  { %s163_s9 = sshll.u32 %s4958_s21, 4  ;;  %s3999_s3 = smov [#allocation11]   ;;  %s164_s9 = int_to_ptr.hbm [resolvable:$true] %s163_s9 }
  0x21   :  { %s139_s10 = sshll.u32 %s3999_s3, 4  ;;  %s4000_s30 = smov [#allocation14]   ;;  %s140_s10 = int_to_ptr.vmem [resolvable:$true] %s139_s10 }
  0x22   :  { %145 = dma.hbm_to_vmem [thread:$0]  %s138_s8, 32, %s140_s10, [#allocation12], %s3996_s29, %s3996_s29, %s3997_s2  }
  0x23   :  { %s165_s19 = sshll.u32 %s4000_s30, 4  ;;  %s4992_s7 = sld [smem:[#allocation28_spill]]  ;;  %s166_s19 = int_to_ptr.vmem [resolvable:$true] %s165_s19 }
  0x24   :  { %171 = dma.hbm_to_vmem [thread:$0]  %s164_s9, 32, %s166_s19, [#allocation15], %s3996_s29, %s3996_s29, %s3997_s2  }
  0x25   :  { %s4001_s21 = smov [#allocation2]   ;;  %s4993_s17 = sld [smem:[#allocation38_spill]] }
  0x26   :  { %s48_s11 = sshll.u32 %s4001_s21, 4  ;;  %s4976_s8 = smov 128   ;;  %s49_s11 = int_to_ptr.vmem [resolvable:$true] %s48_s11 }
  0x27   :  { %s4977_s3 = smov 8   ;;  %s4004_s10 = smov [#allocation7]  }
  0x28   :  { %s90_s30 = sshll.u32 %s4004_s10, 4  ;;  %s124_s9 = sshll.u32 %s4955_s18, 4  ;;  %s91_s30 = int_to_ptr.vmem [resolvable:$true] %s90_s30  ;;  %s125_s9 = int_to_ptr.hbm [resolvable:$true] %s124_s9 }
  0x29   :  { %s46_s1 = sshll.u32 %s4992_s7, 4  ;;  %s150_s21 = sshll.u32 %s4957_s20, 4  ;;  %s47_s1 = int_to_ptr.hbm [resolvable:$true] %s46_s1  ;;  %s151_s21 = int_to_ptr.hbm [resolvable:$true] %s150_s21 }
  0x2a   :  { %54 = dma.hbm_to_vmem [thread:$0]  %s47_s1, 256, %s49_s11, [#allocation3], %s4976_s8, %s4976_s8, %s4977_s3  }
  0x2b   :  { %s88_s5 = sshll.u32 %s4993_s17, 4  ;;  %s4005_s12 = smov [#allocation10]   ;;  %s89_s5 = int_to_ptr.hbm [resolvable:$true] %s88_s5 }
  0x2c   :  { %96 = dma.hbm_to_vmem [thread:$0]  %s89_s5, 32, %s91_s30, [#allocation6], %s3996_s29, %s3996_s29, %s3997_s2  }
  0x2d   :  { %s126_s4 = sshll.u32 %s4005_s12, 4  ;;  %s4006_s1 = smov [#allocation13]   ;;  %s127_s4 = int_to_ptr.vmem [resolvable:$true] %s126_s4 }
  0x2e   :  { %132 = dma.hbm_to_vmem [thread:$0]  %s125_s9, 32, %s127_s4, [#allocation9], %s3996_s29, %s3996_s29, %s3997_s2  }
  0x2f   :  { %s152_s18 = sshll.u32 %s4006_s1, 4  ;;  %s4007_s11 = smov 64   ;;  %s153_s18 = int_to_ptr.vmem [resolvable:$true] %s152_s18 }
  0x30   :  { %s4008_s17 = smov 4   ;;  %s178_s30 = sshll.u32 %s4960_s23, 4  ;;  %s179_s30 = int_to_ptr.hbm [resolvable:$true] %s178_s30 }
  0x31   :  { %158 = dma.hbm_to_vmem [thread:$0]  %s151_s21, 512, %s153_s18, [#allocation12], %s4007_s11, %s4007_s11, %s4008_s17  }
  0x32   :  { %s4009_s20 = smov [#allocation16]   ;;  %s198_s7 = sshll.u32 %s4964_s27, 4  ;;  %s199_s7 = int_to_ptr.hbm [resolvable:$true] %s198_s7 }
  0x33   :  { %s180_s6 = sshll.u32 %s4009_s20, 4  ;;  %s4010_s9 = smov [#allocation17]   ;;  %s181_s6 = int_to_ptr.vmem [resolvable:$true] %s180_s6 }
  0x34   :  { %186 = dma.hbm_to_vmem [thread:$0]  %s179_s30, 32, %s181_s6, [#allocation15], %s3996_s29, %s3996_s29, %s3997_s2  }
  0x35   :  { %s200_s12 = sshll.u32 %s4010_s9, 4  ;;  %s201_s12 = int_to_ptr.vmem [resolvable:$true] %s200_s12 }
  0x36   :  { %203 = dma.hbm_to_vmem [thread:$0]  %s199_s7, 16, %s201_s12, [#allocation18]  }
  0x37   :  { %3981 = dma.done.wait [#allocation3], 256  }
  0x38   :  { %3982 = vsyncadd [#allocation3], 4294967040 }
  0x39   :  { %3983 = dma.done.wait [#allocation6], 64  }
  0x3a   :  { %3984 = vsyncadd [#allocation6], 4294967232 }
  0x3b   :  { %3985 = dma.done.wait [#allocation9], 64  }
  0x3c   :  { %3986 = vsyncadd [#allocation9], 4294967232 }
  0x3d   :  { %3987 = dma.done.wait [#allocation12], 544  }
  0x3e   :  { %3988 = vsyncadd [#allocation12], 4294966752 }
  0x3f   :  { %3989 = dma.done.wait [#allocation15], 64  }
  0x40   :  { %3990 = vsyncadd [#allocation15], 4294967232 }
  0x41   :  { %3991 = dma.done.wait [#allocation18], 16  }
  0x42   :  { %3992 = vsyncadd [#allocation18], 4294967280  ;;  %vm256_vm0 = vcmask 261120   ;;  %s4994_s29 = sld [smem:[#allocation27_spill]]  ;;  %v4011_v4 = vmov 32.0   ;;  %vm472_vm14 = vcmask 64512  }
  0x43   :  { %3527 = vrcp.f32 %v4011_v4  ;;  %s4995_s18 = sld [smem:[#allocation31_spill]]  ;;  %v3493_v62 = vld [vmem:[%s4961_s24] ss:$0 sm:$0xff]  ;;  %vm497_vm15 = vcmask 130048   ;;  %s4012_s9 = smov 120  }
  0x44   :  { %s4996_s10 = sld [smem:[#allocation32_spill]]  ;;  %s4013_s12 = smov 112  }
  0x45   :  { %s4997_s20 = sld [smem:[#allocation33_spill]]  ;;  %s4014_s23 = smov 104  }
  0x46   :  { %s4998_s1 = sld [smem:[#allocation37_spill]] }
  0x47   :  { %s4999_s5 = sld [smem:[#allocation35_spill]] }
  0x48   :  { %v4218_v0 = vld [vmem:[%s4994_s29] sm:$0xff]  ;;  %v4223_v1 = vld [vmem:[%s4994_s29 + $0x8] sm:$0xff]  ;;  %s5000_s0 = sld [smem:[#allocation29_spill]] }
  0x49   :  { %v257_v2 = vsel %vm256_vm0, %v4218_v0, 0.0  ;;  %v260_v3 = vsel %vm256_vm0, %v4223_v1, 0.0  ;;  %v3528_v5 = vpop.eup %3527  ;;  %v3437_v21 = vld [vmem:[%s4995_s18 + $0x8] sm:$0xff]  ;;  %v3436_v25 = vld [vmem:[%s4995_s18] sm:$0xff]  ;;  %s5001_s2 = sld [smem:[#allocation34_spill]] }
  0x4a   :  { %258 = vadd.xlane.f32.xlu0 %v257_v2  ;;  %v264_v6 = vmul.f32 32.0, %v3528_v5  ;;  %vm268_vm1 = vweird.f32 %v3528_v5  ;;  %v3439_v22 = vld [vmem:[%s4996_s10 + $0x8] sm:$0xff]  ;;  %380 = vmatpush.bf16.msra.mxu0 %v3437_v21  ;;  %v3438_v26 = vld [vmem:[%s4996_s10] sm:$0xff]  ;;  %s5002_s21 = sld [smem:[#allocation39_spill]] }
  0x4b   :  { %v3441_v23 = vld [vmem:[%s4997_s20 + $0x8] sm:$0xff]  ;;  %414 = vmatpush.bf16.msra.mxu1 %v3439_v22  ;;  %v3440_v28 = vld [vmem:[%s4997_s20] sm:$0xff]  ;;  %s5003_s30 = sld [smem:[#allocation30_spill]] }
  0x4c   :  { %v265_v7 = vsub.f32 1.0, %v264_v6  ;;  %448 = vmatpush.bf16.msra.mxu2 %v3441_v23  ;;  %v3496_v23 = vld [vmem:[#allocation5] ss:$0 sm:$0xff] }
  0x4e   :  { %v266_v8 = vmul.f32 %v3528_v5, %v265_v7  ;;  %381 = vmatpush.bf16.msra.mxu0 %v3436_v25 }
  0x4f   :  { %415 = vmatpush.bf16.msra.mxu1 %v3438_v26  ;;  %v3497_v26 = vld [vmem:[%s4998_s1] ss:$0 sm:$0xff] }
  0x50   :  { %v267_v9 = vadd.f32 %v3528_v5, %v266_v8  ;;  %449 = vmatpush.bf16.msra.mxu2 %v3440_v28 }
  0x52   :  { %261 = vadd.xlane.f32.xlu0 %v260_v3  ;;  %v4229_v10 = vsel %vm268_vm1, %v3528_v5, %v267_v9  ;;  %vm623_vm1 = vcmask 1043456  }
  0xbd   :  { %v259_v11 = vpop.xlane.xlu0 %258 }
  0xbe   :  { %v270_v12 = vmul.f32 %v4229_v10, %v259_v11 }
  0xc0   :  { %v4233_v13 = vsub.f32 %v4218_v0, %v270_v12 }
  0xc2   :  { %v274_v14 = vmul.f32 %v4233_v13, %v4233_v13  ;;  %v287_v8 = vmul.f32 %v3493_v62, %v4233_v13 }
  0xc4   :  { %v276_v15 = vsel %vm256_vm0, %v274_v14, 0.0 }
  0xc5   :  { %277 = vadd.xlane.f32.xlu1 %v276_v15  ;;  %v262_v16 = vpop.xlane.xlu0 %261 }
  0xc6   :  { %v271_v17 = vmul.f32 %v4229_v10, %v262_v16  ;;  %v3494_v16 = vld [vmem:[%s4962_s25] ss:$0 sm:$0xff] }
  0xc8   :  { %v4240_v18 = vsub.f32 %v4223_v1, %v271_v17 }
  0xca   :  { %v275_v19 = vmul.f32 %v4240_v18, %v4240_v18  ;;  %v288_v12 = vmul.f32 %v3493_v62, %v4240_v18 }
  0xcc   :  { %v279_v20 = vsel %vm256_vm0, %v275_v19, 0.0 }
  0xcd   :  { %280 = vadd.xlane.f32.xlu1 %v279_v20 }
 0x138   :  { %v278_v24 = vpop.xlane.xlu1 %277 }
 0x139   :  { %v282_v27 = vmul.f32 0.032258064, %v278_v24 }
 0x13b   :  { %3529 = vrsqrt.f32 %v282_v27  ;;  %vm296_vm2 = vcmp.eq.f32.partialorder %v282_v27, inf  ;;  %v299_v41 = vand.u32 2147483648, %v282_v27  ;;  %vm298_vm3 = vcmp.eq.f32.partialorder %v282_v27, 0.0 }
 0x140   :  { %v281_v29 = vpop.xlane.xlu1 %280 }
 0x141   :  { %v3530_v30 = vpop.eup %3529  ;;  %v283_v31 = vmul.f32 0.032258064, %v281_v29  ;;  %v3495_v29 = vld [vmem:[%s4999_s5] ss:$0 sm:$0xff] }
 0x142   :  { %v290_v32 = vmul.f32 %v3530_v30, %v282_v27 }
 0x143   :  { %3531 = vrsqrt.f32 %v283_v31  ;;  %vm308_vm4 = vcmp.eq.f32.partialorder %v283_v31, inf  ;;  %v311_v49 = vand.u32 2147483648, %v283_v31  ;;  %vm310_vm5 = vcmp.eq.f32.partialorder %v283_v31, 0.0 }
 0x144   :  { %v291_v33 = vmul.f32 %v3530_v30, %v290_v32 }
 0x146   :  { %v292_v34 = vmul.f32 0.5, %v291_v33 }
 0x148   :  { %v293_v35 = vsub.f32 1.5, %v292_v34 }
 0x149   :  { %v3532_v36 = vpop.eup %3531 }
 0x14a   :  { %v294_v37 = vmul.f32 %v3530_v30, %v293_v35  ;;  %v302_v38 = vmul.f32 %v3532_v36, %v283_v31 }
 0x14c   :  { %v295_v39 = vmul.f32 %v294_v37, %v282_v27  ;;  %v303_v40 = vmul.f32 %v3532_v36, %v302_v38 }
 0x14e   :  { %v297_v42 = vsel %vm296_vm2, %v282_v27, %v295_v39  ;;  %v304_v43 = vmul.f32 0.5, %v303_v40 }
 0x14f   :  { %v300_v44 = vsel %vm298_vm3, %v299_v41, %v297_v42 }
 0x150   :  { %v305_v45 = vsub.f32 1.5, %v304_v43  ;;  %v313_v46 = vadd.f32 1e-06, %v300_v44 }
 0x152   :  { %v306_v47 = vmul.f32 %v3532_v36, %v305_v45  ;;  %3533 = vrcp.f32 %v313_v46  ;;  %v326_v59 = vand.u32 2147483648, %v313_v46  ;;  %vm320_vm7 = vweird.f32 %v313_v46 }
 0x153   :  { %v324_v60 = vand.u32 2147483647, %v313_v46 }
 0x154   :  { %v307_v48 = vmul.f32 %v306_v47, %v283_v31  ;;  %v327_v3 = vor.u32 1.1754944e-38, %v326_v59 }
 0x155   :  { %vm325_vm9 = vcmp.eq.f32.partialorder %v324_v60, 8.507059e+37 }
 0x156   :  { %v309_v50 = vsel %vm308_vm4, %v283_v31, %v307_v48 }
 0x157   :  { %v312_v51 = vsel %vm310_vm5, %v311_v49, %v309_v50 }
 0x158   :  { %v3534_v52 = vpop.eup %3533  ;;  %v314_v53 = vadd.f32 1e-06, %v312_v51 }
 0x159   :  { %v316_v54 = vmul.f32 %v3534_v52, %v313_v46  ;;  %vm321_vm6 = vweird.f32 %v3534_v52 }
 0x15a   :  { %3535 = vrcp.f32 %v314_v53  ;;  %vm322_vm8 = vmor %vm320_vm7, %vm321_vm6  ;;  %v341_v4 = vand.u32 2147483648, %v314_v53  ;;  %v339_v6 = vand.u32 2147483647, %v314_v53  ;;  %vm335_vm11 = vweird.f32 %v314_v53 }
 0x15b   :  { %v317_v55 = vsub.f32 1.0, %v316_v54 }
 0x15c   :  { %v342_v11 = vor.u32 1.1754944e-38, %v341_v4  ;;  %vm340_vm13 = vcmp.eq.f32.partialorder %v339_v6, 8.507059e+37 }
 0x15d   :  { %v318_v56 = vmul.f32 %v3534_v52, %v317_v55 }
 0x15f   :  { %v319_v57 = vadd.f32 %v3534_v52, %v318_v56 }
 0x160   :  { %v3536_v58 = vpop.eup %3535 }
 0x161   :  { %v331_v61 = vmul.f32 %v3536_v58, %v314_v53  ;;  %v323_v63 = vsel %vm322_vm8, %v3534_v52, %v319_v57  ;;  %vm336_vm10 = vweird.f32 %v3536_v58  ;;  %v4288_v53 = vld [vmem:[%s5000_s0] sm:$0xff] }
 0x162   :  { %v328_v7 = vsel %vm325_vm9, %v327_v3, %v323_v63  ;;  %vm337_vm12 = vmor %vm335_vm11, %vm336_vm10 }
 0x163   :  { %v332_v2 = vsub.f32 1.0, %v331_v61  ;;  %v329_v14 = vmul.f32 %v328_v7, %v287_v8 }
 0x165   :  { %v333_v5 = vmul.f32 %v3536_v58, %v332_v2  ;;  %v348_v20 = vadd.f32 %v3494_v16, %v329_v14  ;;  %v545_v14 = vld [vmem:[%s5001_s2] sm:$0xf] }
 0x167   :  { %v334_v9 = vadd.f32 %v3536_v58, %v333_v5 }
 0x169   :  { %v338_v15 = vsel %vm337_vm12, %v3536_v58, %v334_v9  ;;  %v4295_v58 = vld [vmem:[%s5000_s0 + $0x8] sm:$0xff] }
 0x16a   :  { %v343_v17 = vsel %vm340_vm13, %v342_v11, %v338_v15  ;;  %v645_v15 = vsel %vm623_vm1, %v545_v14, 0 }
 0x16b   :  { %v344_v19 = vmul.f32 %v343_v17, %v288_v12 }
 0x16d   :  { %v349_v21 = vadd.f32 %v3494_v16, %v344_v19 }
 0x16f   :  { %v350_v22 = vpack.c.bf16 %v349_v21, %v348_v20 }
 0x171   :  { %3177 = vmatmul.msk.bf16.vlgmr.msra.gmra.mxu0 %vm256_vm0, %v350_v22  ;;  %3186 = vmatmul.msk.bf16.vlgmr.msra.gmra.mxu1 %vm256_vm0, %v350_v22 }
 0x172   :  { %3195 = vmatmul.msk.bf16.vlgmr.msra.gmra.mxu2 %vm256_vm0, %v350_v22 }
 0x1ee   :  { %v383_v13 = vpop.f32.mrf.mxu0  ;;  %v417_v18 = vpop.f32.mrf.mxu1 }
 0x1ef   :  { %v418_v24 = vadd.f32 %v3496_v23, %v417_v18  ;;  %v384_v35 = vadd.f32 %v3495_v29, %v383_v13 }
 0x1f1   :  { %v458_v30 = vpack.c.bf16 %v418_v24, %v418_v24  ;;  %v456_v43 = vpack.c.bf16 %v384_v35, %v384_v35 }
 0x1f3   :  { %v469_v36 = vunpack.c.l.b16 %v458_v30  ;;  %v464_v49 = vunpack.c.l.b16 %v456_v43 }
 0x1f5   :  { %v451_v25 = vpop.f32.mrf.mxu2 }
 0x1f6   :  { %v385_v27 = vpop.f32.mrf.mxu0  ;;  %v419_v28 = vpop.f32.mrf.mxu1  ;;  %v452_v34 = vadd.f32 %v3497_v26, %v451_v25 }
 0x1f7   :  { %v420_v31 = vadd.f32 %v3496_v23, %v419_v28  ;;  %v386_v32 = vadd.f32 %v3495_v29, %v385_v27 }
 0x1f8   :  { %v460_v41 = vpack.c.bf16 %v452_v34, %v452_v34 }
 0x1f9   :  { %v459_v33 = vpack.c.bf16 %v420_v31, %v420_v31  ;;  %v457_v38 = vpack.c.bf16 %v386_v32, %v386_v32 }
 0x1fa   :  { %v523_v47 = vunpack.c.l.b16 %v460_v41 }
 0x1fb   :  { %v470_v37 = vunpack.c.l.b16 %v459_v33  ;;  %v465_v46 = vunpack.c.l.b16 %v457_v38 }
 0x1fd   :  { %v471_v39 = vpack.c.b16 %v470_v37, %v469_v36  ;;  %v453_v40 = vpop.f32.mrf.mxu2  ;;  %v466_v51 = vpack.c.b16 %v465_v46, %v464_v49 }
 0x1fe   :  { %v454_v42 = vadd.f32 %v3497_v26, %v453_v40 }
 0x1ff   :  { %v477_v44 = vsel %vm472_vm14, %v471_v39, 0 }
 0x200   :  { %v461_v45 = vpack.c.bf16 %v454_v42, %v454_v42  ;;  %486 = vmatpush.bf16.xpose.msra.mxu3 %v477_v44 }
 0x202   :  { %v524_v48 = vunpack.c.l.b16 %v461_v45 }
 0x204   :  { %v4281_v50 = vpack.c.b16 %v524_v48, %v523_v47 }
 0x206   :  { %537 = vmatpush.bf16.msrb.mxu0 %v4281_v50 }
 0x207   :  { %3196 = vmatmul.msk.bf16.vlgmr.msra.gmra.mxu3 %vm472_vm14, %v466_v51 }
 0x20a   :  { %654 = vmatpush.bf16.msra.mxu0 %v645_v15 }
 0x28a   :  { %v488_v52 = vpop.f32.mrf.mxu3 }
 0x28b   :  { %v493_v54 = vmul.f32 0.35355338, %v488_v52 }
 0x28d   :  { %v495_v55 = vadd.f32 %v493_v54, %v4288_v53 }
 0x28f   :  { %v498_v56 = vsel %vm497_vm15, %v495_v55, -inf }
 0x290   :  { %499 = vmax.xlane.f32.xlu2 %v498_v56 }
 0x292   :  { %v490_v57 = vpop.f32.mrf.mxu3 }
 0x293   :  { %v494_v59 = vmul.f32 0.35355338, %v490_v57 }
 0x295   :  { %v496_v60 = vadd.f32 %v494_v59, %v4295_v58 }
 0x297   :  { %v501_v61 = vsel %vm497_vm15, %v496_v60, -inf }
 0x298   :  { %502 = vmax.xlane.f32.xlu2 %v501_v61 }
 0x2b0   :  { %548 = vrot.lane.b32.xlu2 %v471_v39, %s4012_s9 }
 0x2b8   :  { %661 = vrot.lane.b32.xlu2 %v466_v51, %s4013_s12 }
 0x2c0   :  { %757 = vrot.lane.b32.xlu2 %v466_v51, %s4014_s23 }
 0x303   :  { %v500_v62 = vpop.xlane.xlu2 %499 }
 0x304   :  { %v504_v63 = vsub.f32 %v495_v55, %v500_v62 }
 0x306   :  { %v506_v2 = vmul.f32 1.442695, %v504_v63 }
 0x308   :  { %3537 = vpow2.f32 %v506_v2 }
 0x30b   :  { %v503_v3 = vpop.xlane.xlu2 %502 }
 0x30c   :  { %v505_v4 = vsub.f32 %v496_v60, %v503_v3 }
 0x30e   :  { %v3538_v5 = vpop.eup %3537  ;;  %v508_v6 = vmul.f32 1.442695, %v505_v4 }
 0x30f   :  { %v510_v7 = vsel %vm497_vm15, %v3538_v5, 0.0 }
 0x310   :  { %3539 = vpow2.f32 %v508_v6  ;;  %511 = vadd.xlane.f32.xlu0 %v510_v7 }
 0x313   :  { %v549_v8 = vpop.permute.xlu2 %548 }
 0x314   :  { %v554_v9 = vsel %vm472_vm14, %v549_v8, 0 }
 0x315   :  { %563 = vmatpush.bf16.xpose.msrb.mxu1 %v554_v9 }
 0x316   :  { %v3540_v11 = vpop.eup %3539 }
 0x317   :  { %v513_v12 = vsel %vm497_vm15, %v3540_v11, 0.0 }
 0x318   :  { %514 = vadd.xlane.f32.xlu1 %v513_v12 }
 0x31b   :  { %v662_v27 = vpop.permute.xlu2 %661 }
 0x323   :  { %v758_v42 = vpop.permute.xlu2 %757 }
 0x324   :  { %546 = vrot.lane.b32.xlu0 %v466_v51, %s4012_s9 }
 0x32c   :  { %759 = vrot.lane.b32.xlu0 %v471_v39, %s4014_s23 }
 0x331   :  { %663 = vrot.lane.b32.xlu1 %v471_v39, %s4013_s12 }
 0x383   :  { %v512_v16 = vpop.xlane.xlu0 %511 }
 0x384   :  { %3541 = vrcp.f32 %v512_v16 }
 0x38a   :  { %v3542_v19 = vpop.eup %3541 }
 0x38b   :  { %v515_v17 = vpop.xlane.xlu1 %514  ;;  %v518_v21 = vmul.f32 %v3542_v19, %v3538_v5 }
 0x38c   :  { %3543 = vrcp.f32 %v515_v17 }
 0x392   :  { %v3544_v20 = vpop.eup %3543 }
 0x393   :  { %v519_v22 = vmul.f32 %v3544_v20, %v3540_v11 }
 0x395   :  { %v520_v13 = vpack.c.bf16 %v519_v22, %v518_v21 }
 0x396   :  { %v547_v18 = vpop.permute.xlu0 %546 }
 0x397   :  { %3197 = vmatmul.msk.bf16.vlgmr.msrb.gmra.mxu0 %vm497_vm15, %v520_v13  ;;  %3198 = vmatmul.msk.bf16.vlgmr.msrb.gmra.mxu1 %vm472_vm14, %v547_v18 }
 0x39e   :  { %v760_v23 = vpop.permute.xlu0 %759 }
 0x39f   :  { %v765_v24 = vsel %vm472_vm14, %v760_v23, 0 }
 0x3a0   :  { %774 = vmatpush.bf16.xpose.msrb.mxu0 %v765_v24 }
 0x3a3   :  { %v664_v25 = vpop.permute.xlu1 %663 }
 0x3a4   :  { %v669_v26 = vsel %vm472_vm14, %v664_v25, 0 }
 0x3a5   :  { %678 = vmatpush.bf16.xpose.msra.mxu1 %v669_v26 }
 0x3ac   :  { %3203 = vmatmul.msk.bf16.vlgmr.msra.gmra.mxu1 %vm472_vm14, %v662_v27 }
 0x414   :  { %v539_v28 = vpop.f32.mrf.mxu0  ;;  %v565_v29 = vpop.f32.mrf.mxu1 }
 0x415   :  { %v570_v30 = vmul.f32 0.35355338, %v565_v29 }
 0x417   :  { %v572_v31 = vadd.f32 %v570_v30, %v4288_v53 }
 0x419   :  { %v574_v32 = vsel %vm497_vm15, %v572_v31, -inf }
 0x41a   :  { %575 = vmax.xlane.f32.xlu1 %v574_v32 }
 0x41c   :  { %v541_v33 = vpop.f32.mrf.mxu0  ;;  %v567_v34 = vpop.f32.mrf.mxu1 }
 0x41d   :  { %v544_v35 = vpack.c.bf16 %v541_v33, %v539_v28  ;;  %v571_v36 = vmul.f32 0.35355338, %v567_v34 }
 0x41f   :  { %3202 = vmatmul.msk.bf16.vlgmr.msra.gmra.mxu0 %vm472_vm14, %v544_v35  ;;  %v573_v37 = vadd.f32 %v571_v36, %v4295_v58  ;;  %v3200_v36 = vld [vmem:[%s5001_s2 + $0x4] sm:$0xf] }
 0x421   :  { %v577_v38 = vsel %vm497_vm15, %v573_v37, -inf }
 0x422   :  { %578 = vmax.xlane.f32.xlu0 %v577_v38 }
 0x429   :  { %v680_v39 = vpop.f32.mrf.mxu1 }
 0x42a   :  { %v685_v40 = vmul.f32 0.35355338, %v680_v39 }
 0x42c   :  { %v687_v41 = vadd.f32 %v685_v40, %v4288_v53 }
 0x42e   :  { %v689_v43 = vsel %vm497_vm15, %v687_v41, -inf }
 0x42f   :  { %690 = vmax.xlane.f32.xlu2 %v689_v43  ;;  %3207 = vmatmul.msk.bf16.vlgmr.msrb.gmra.mxu0 %vm472_vm14, %v758_v42 }
 0x431   :  { %v682_v44 = vpop.f32.mrf.mxu1 }
 0x432   :  { %v686_v45 = vmul.f32 0.35355338, %v682_v44 }
 0x434   :  { %v688_v46 = vadd.f32 %v686_v45, %v4295_v58 }
 0x436   :  { %v692_v47 = vsel %vm497_vm15, %v688_v46, -inf }
 0x437   :  { %693 = vmax.xlane.f32.xlu1 %v692_v47 }
 0x48d   :  { %v576_v48 = vpop.xlane.xlu1 %575 }
 0x48e   :  { %v580_v49 = vsub.f32 %v572_v31, %v576_v48 }
 0x490   :  { %v582_v51 = vmul.f32 1.442695, %v580_v49 }
 0x492   :  { %3545 = vpow2.f32 %v582_v51 }
 0x495   :  { %v579_v60 = vpop.xlane.xlu0 %578 }
 0x496   :  { %v581_v62 = vsub.f32 %v573_v37, %v579_v60  ;;  %v625_v37 = vsel %vm623_vm1, %v3200_v36, 0  ;;  %v3443_v36 = vld [vmem:[%s5002_s21 + $0x8] sm:$0xff] }
 0x497   :  { %634 = vmatpush.bf16.msrb.mxu3 %v625_v37  ;;  %v3444_v37 = vld [vmem:[%s4950_s13] sm:$0xff] }
 0x498   :  { %v3546_v52 = vpop.eup %3545  ;;  %v584_v63 = vmul.f32 1.442695, %v581_v62 }
 0x499   :  { %v586_v54 = vsel %vm497_vm15, %v3546_v52, 0.0 }
 0x49a   :  { %587 = vadd.xlane.f32.xlu1 %v586_v54 }
 0x49c   :  { %v4328_v55 = vpop.f32.mrf.mxu0 }
 0x4a2   :  { %v691_v56 = vpop.xlane.xlu2 %690 }
 0x4a3   :  { %v695_v57 = vsub.f32 %v687_v41, %v691_v56 }
 0x4a4   :  { %v4330_v59 = vpop.f32.mrf.mxu0 }
 0x4a5   :  { %v697_v61 = vmul.f32 1.442695, %v695_v57 }
 0x4a7   :  { %3547 = vpow2.f32 %v697_v61  ;;  %v3209_v61 = vld [vmem:[%s5001_s2 + $0xc] sm:$0xf] }
 0x4a8   :  { %3549 = vpow2.f32 %v584_v63  ;;  %v835_v62 = vsel %vm623_vm1, %v3209_v61, 0  ;;  %v3205_v63 = vld [vmem:[%s5001_s2 + $0x8] sm:$0xf] }
 0x4aa   :  { %v694_v4 = vpop.xlane.xlu1 %693 }
 0x4ab   :  { %v696_v8 = vsub.f32 %v688_v46, %v694_v4 }
 0x4ac   :  { %v776_v2 = vpop.f32.mrf.mxu0 }
 0x4ad   :  { %v4332_v3 = vpop.eup %3547  ;;  %v781_v5 = vmul.f32 0.35355338, %v776_v2  ;;  %v699_v11 = vmul.f32 1.442695, %v696_v8  ;;  %v739_v2 = vsel %vm623_vm1, %v3205_v63, 0 }
 0x4ae   :  { %v701_v6 = vsel %vm497_vm15, %v4332_v3, 0.0  ;;  %v3550_v15 = vpop.eup %3549  ;;  %748 = vmatpush.bf16.msra.mxu3 %v739_v2 }
 0x4af   :  { %702 = vadd.xlane.f32.xlu1 %v701_v6  ;;  %v783_v7 = vadd.f32 %v781_v5, %v4288_v53  ;;  %3551 = vpow2.f32 %v699_v11  ;;  %v589_v17 = vsel %vm497_vm15, %v3550_v15, 0.0 }
 0x4b1   :  { %v785_v9 = vsel %vm497_vm15, %v783_v7, -inf }
 0x4b2   :  { %786 = vmax.xlane.f32.xlu0 %v785_v9 }
 0x4b4   :  { %v778_v12 = vpop.f32.mrf.mxu0 }
 0x4b5   :  { %v782_v14 = vmul.f32 0.35355338, %v778_v12  ;;  %v3552_v20 = vpop.eup %3551 }
 0x4b6   :  { %v704_v53 = vsel %vm497_vm15, %v3552_v20, 0.0 }
 0x4b7   :  { %v784_v16 = vadd.f32 %v782_v14, %v4295_v58 }
 0x4b9   :  { %v788_v19 = vsel %vm497_vm15, %v784_v16, -inf }
 0x4ba   :  { %590 = vadd.xlane.f32.xlu0 %v589_v17  ;;  %789 = vmax.xlane.f32.xlu2 %v788_v19  ;;  %v3498_v17 = vld [vmem:[#allocation7] ss:$0 sm:$0xff] }
 0x4c2   :  { %705 = vadd.xlane.f32.xlu0 %v704_v53 }
 0x4d2   :  { %597 = vrot.lane.b32.xlu2 %v4281_v50, %s4012_s9 }
 0x50d   :  { %v588_v18 = vpop.xlane.xlu1 %587 }
 0x522   :  { %v703_v39 = vpop.xlane.xlu1 %702 }
 0x525   :  { %v787_v21 = vpop.xlane.xlu0 %786 }
 0x526   :  { %v791_v22 = vsub.f32 %v783_v7, %v787_v21 }
 0x528   :  { %v793_v13 = vmul.f32 1.442695, %v791_v22 }
 0x52a   :  { %3553 = vpow2.f32 %v793_v13 }
 0x52b   :  { %3555 = vrcp.f32 %v588_v18 }
 0x52d   :  { %v591_v58 = vpop.xlane.xlu0 %590  ;;  %v790_v23 = vpop.xlane.xlu2 %789 }
 0x52e   :  { %3557 = vrcp.f32 %v591_v58  ;;  %v792_v24 = vsub.f32 %v784_v16, %v790_v23 }
 0x530   :  { %v3554_v25 = vpop.eup %3553  ;;  %v795_v26 = vmul.f32 1.442695, %v792_v24 }
 0x531   :  { %v797_v27 = vsel %vm497_vm15, %v3554_v25, 0.0  ;;  %v3556_v28 = vpop.eup %3555 }
 0x532   :  { %3559 = vpow2.f32 %v795_v26  ;;  %798 = vadd.xlane.f32.xlu1 %v797_v27  ;;  %v594_v30 = vmul.f32 %v3556_v28, %v3546_v52 }
 0x534   :  { %v3558_v29 = vpop.eup %3557 }
 0x535   :  { %v595_v31 = vmul.f32 %v3558_v29, %v3550_v15  ;;  %v598_v32 = vpop.permute.xlu2 %597  ;;  %v706_v38 = vpop.xlane.xlu0 %705 }
 0x536   :  { %610 = vmatpush.bf16.msrb.mxu2 %v598_v32  ;;  %3561 = vrcp.f32 %v706_v38  ;;  %v247_v38 = vld [vmem:[#allocation2] sm:$0xff] }
 0x537   :  { %v596_v33 = vpack.c.bf16 %v595_v31, %v594_v30  ;;  %3563 = vrcp.f32 %v703_v39  ;;  %v248_v39 = vld [vmem:[#allocation2 + $0x8] sm:$0xff] }
 0x538   :  { %v3560_v34 = vpop.eup %3559 }
 0x539   :  { %3199 = vmatmul.msk.bf16.vlgmr.msrb.gmra.mxu2 %vm497_vm15, %v596_v33  ;;  %v800_v35 = vsel %vm497_vm15, %v3560_v34, 0.0 }
 0x53a   :  { %801 = vadd.xlane.f32.xlu0 %v800_v35  ;;  %v3445_v35 = vld [vmem:[%s4950_s13 + $0x8] sm:$0xff] }
 0x53b   :  { %1018 = vmatpush.bf16.msra.mxu0 %v3445_v35 }
 0x53c   :  { %v3562_v42 = vpop.eup %3561 }
 0x53d   :  { %v3564_v43 = vpop.eup %3563  ;;  %v710_v45 = vmul.f32 %v3562_v42, %v3552_v20 }
 0x53e   :  { %v709_v47 = vmul.f32 %v3564_v43, %v4332_v3 }
 0x53f   :  { %1019 = vmatpush.bf16.msra.mxu0 %v3444_v37 }
 0x540   :  { %v711_v51 = vpack.c.bf16 %v710_v45, %v709_v47 }
 0x54b   :  { %712 = vrot.lane.b32.xlu1 %v4281_v50, %s4013_s12 }
 0x54e   :  { %808 = vrot.lane.b32.xlu0 %v4281_v50, %s4014_s23 }
 0x5a5   :  { %v799_v41 = vpop.xlane.xlu1 %798 }
 0x5ad   :  { %v802_v40 = vpop.xlane.xlu0 %801 }
 0x5ae   :  { %3565 = vrcp.f32 %v802_v40  ;;  %v3442_v40 = vld [vmem:[%s5002_s21] sm:$0xff] }
 0x5af   :  { %3567 = vrcp.f32 %v799_v41  ;;  %v4407_v41 = vpack.c.bf16 %v248_v39, %v247_v38 }
 0x5b1   :  { %3230 = vmatmul.msk.bf16.vlgmr.msra.gmra.mxu0 %vm256_vm0, %v4407_v41 }
 0x5b4   :  { %v3566_v44 = vpop.eup %3565 }
 0x5b5   :  { %v3568_v46 = vpop.eup %3567  ;;  %v806_v49 = vmul.f32 %v3566_v44, %v3560_v34 }
 0x5b6   :  { %v805_v52 = vmul.f32 %v3568_v46, %v3554_v25 }
 0x5b8   :  { %v807_v56 = vpack.c.bf16 %v806_v49, %v805_v52 }
 0x5bc   :  { %v612_v50 = vpop.f32.mrf.mxu2 }
 0x5bd   :  { %v713_v48 = vpop.permute.xlu1 %712 }
 0x5be   :  { %725 = vmatpush.bf16.msra.mxu2 %v713_v48 }
 0x5c0   :  { %v809_v54 = vpop.permute.xlu0 %808 }
 0x5c1   :  { %3204 = vmatmul.msk.bf16.vlgmr.msra.gmra.mxu2 %vm497_vm15, %v711_v51  ;;  %821 = vmatpush.bf16.msrb.mxu1 %v809_v54 }
 0x5c2   :  { %844 = vmatpush.bf16.msrb.mxu2 %v835_v62 }
 0x5c4   :  { %v614_v57 = vpop.f32.mrf.mxu2  ;;  %3208 = vmatmul.msk.bf16.vlgmr.msrb.gmra.mxu1 %vm497_vm15, %v807_v56 }
 0x5c5   :  { %v617_v60 = vpack.c.bf16 %v614_v57, %v612_v50 }
 0x5c7   :  { %3201 = vmatmul.msk.bf16.vlgmr.msrb.gmra.mxu3 %vm472_vm14, %v617_v60 }
 0x5c8   :  { %981 = vmatpush.bf16.msrb.mxu3 %v3443_v36  ;;  %v3501_v36 = vld [vmem:[#allocation8] ss:$0 sm:$0xff] }
 0x5cc   :  { %982 = vmatpush.bf16.msrb.mxu3 %v3442_v40 }
 0x641   :  { %v823_v3 = vpop.f32.mrf.mxu1 }
 0x644   :  { %v727_v4 = vpop.f32.mrf.mxu2 }
 0x649   :  { %v825_v5 = vpop.f32.mrf.mxu1 }
 0x64a   :  { %v828_v6 = vpack.c.bf16 %v825_v5, %v823_v3  ;;  %v636_v9 = vpop.f32.mrf.mxu3 }
 0x64b   :  { %v657_v12 = vadd.f32 %v4328_v55, %v636_v9 }
 0x64c   :  { %v729_v7 = vpop.f32.mrf.mxu2  ;;  %3210 = vmatmul.msk.bf16.vlgmr.msrb.gmra.mxu2 %vm472_vm14, %v828_v6 }
 0x64d   :  { %v732_v8 = vpack.c.bf16 %v729_v7, %v727_v4 }
 0x64f   :  { %3206 = vmatmul.msk.bf16.vlgmr.msra.gmra.mxu3 %vm472_vm14, %v732_v8 }
 0x652   :  { %v638_v11 = vpop.f32.mrf.mxu3 }
 0x653   :  { %v659_v53 = vadd.f32 %v4330_v59, %v638_v11 }
 0x6cf   :  { %v846_v14 = vpop.f32.mrf.mxu2 }
 0x6d2   :  { %v750_v15 = vpop.f32.mrf.mxu3 }
 0x6d3   :  { %v755_v16 = vadd.f32 %v750_v15, %v657_v12 }
 0x6d5   :  { %v851_v19 = vadd.f32 %v846_v14, %v755_v16 }
 0x6d7   :  { %v857_v20 = vadd.f32 %v3498_v17, %v851_v19  ;;  %v848_v58 = vpop.f32.mrf.mxu2 }
 0x6d9   :  { %v4372_v21 = vadd.f32 %v857_v20, %v4218_v0  ;;  %v3499_v20 = vld [vmem:[%s4961_s24 + $0x1] ss:$0 sm:$0xff] }
 0x6da   :  { %v752_v22 = vpop.f32.mrf.mxu3 }
 0x6db   :  { %v756_v13 = vadd.f32 %v752_v22, %v659_v53  ;;  %v865_v18 = vsel %vm256_vm0, %v4372_v21, 0.0 }
 0x6dc   :  { %866 = vadd.xlane.f32.xlu2 %v865_v18 }
 0x6dd   :  { %v852_v23 = vadd.f32 %v848_v58, %v756_v13 }
 0x6df   :  { %v858_v55 = vadd.f32 %v3498_v17, %v852_v23 }
 0x6e1   :  { %v4377_v24 = vadd.f32 %v858_v55, %v4223_v1 }
 0x6e3   :  { %v868_v25 = vsel %vm256_vm0, %v4377_v24, 0.0 }
 0x6e4   :  { %869 = vadd.xlane.f32.xlu0 %v868_v25 }
 0x74f   :  { %v867_v59 = vpop.xlane.xlu2 %866 }
 0x750   :  { %v871_v0 = vmul.f32 %v867_v59, %v4229_v10 }
 0x752   :  { %v4383_v26 = vsub.f32 %v4372_v21, %v871_v0 }
 0x754   :  { %v875_v27 = vmul.f32 %v4383_v26, %v4383_v26  ;;  %v888_v25 = vmul.f32 %v3499_v20, %v4383_v26  ;;  %v1021_v26 = vpop.f32.mrf.mxu0 }
 0x755   :  { %v1022_v37 = vadd.f32 %v3501_v36, %v1021_v26 }
 0x756   :  { %v877_v28 = vsel %vm256_vm0, %v875_v27, 0.0 }
 0x757   :  { %878 = vadd.xlane.f32.xlu1 %v877_v28  ;;  %v870_v29 = vpop.xlane.xlu0 %869 }
 0x758   :  { %v872_v1 = vmul.f32 %v870_v29, %v4229_v10 }
 0x75a   :  { %v4390_v30 = vsub.f32 %v4377_v24, %v872_v1  ;;  %v3500_v1 = vld [vmem:[%s4962_s25 + $0x1] ss:$0 sm:$0xff] }
 0x75c   :  { %v876_v31 = vmul.f32 %v4390_v30, %v4390_v30  ;;  %v889_v27 = vmul.f32 %v3499_v20, %v4390_v30  ;;  %v1023_v38 = vpop.f32.mrf.mxu0  ;;  %v1062_v30 = vpack.c.bf16 %v1022_v37, %v1022_v37 }
 0x75d   :  { %v1024_v39 = vadd.f32 %v3501_v36, %v1023_v38 }
 0x75e   :  { %v880_v32 = vsel %vm256_vm0, %v876_v31, 0.0 }
 0x75f   :  { %881 = vadd.xlane.f32.xlu2 %v880_v32  ;;  %v1063_v40 = vpack.c.bf16 %v1024_v39, %v1024_v39 }
 0x7ca   :  { %v879_v33 = vpop.xlane.xlu1 %878 }
 0x7cb   :  { %v883_v34 = vmul.f32 0.032258064, %v879_v33 }
 0x7cd   :  { %3569 = vrsqrt.f32 %v883_v34  ;;  %vm897_vm2 = vcmp.eq.f32.partialorder %v883_v34, inf  ;;  %v900_v56 = vand.u32 2147483648, %v883_v34  ;;  %vm899_vm3 = vcmp.eq.f32.partialorder %v883_v34, 0.0 }
 0x7d2   :  { %v882_v42 = vpop.xlane.xlu2 %881 }
 0x7d3   :  { %v3570_v43 = vpop.eup %3569  ;;  %v884_v44 = vmul.f32 0.032258064, %v882_v42  ;;  %v1073_v42 = vunpack.c.l.b16 %v1062_v30 }
 0x7d4   :  { %v891_v45 = vmul.f32 %v3570_v43, %v883_v34 }
 0x7d5   :  { %3571 = vrsqrt.f32 %v884_v44  ;;  %vm909_vm4 = vcmp.eq.f32.partialorder %v884_v44, inf  ;;  %v912_v4 = vand.u32 2147483648, %v884_v44  ;;  %vm911_vm5 = vcmp.eq.f32.partialorder %v884_v44, 0.0 }
 0x7d6   :  { %v892_v50 = vmul.f32 %v3570_v43, %v891_v45 }
 0x7d8   :  { %v893_v46 = vmul.f32 0.5, %v892_v50 }
 0x7da   :  { %v894_v47 = vsub.f32 1.5, %v893_v46  ;;  %v3502_v46 = vld [vmem:[%s4953_s16] ss:$0 sm:$0xff] }
 0x7db   :  { %v3572_v48 = vpop.eup %3571 }
 0x7dc   :  { %v895_v49 = vmul.f32 %v3570_v43, %v894_v47  ;;  %v903_v51 = vmul.f32 %v3572_v48, %v884_v44  ;;  %v1074_v43 = vunpack.c.l.b16 %v1063_v40 }
 0x7de   :  { %v896_v52 = vmul.f32 %v895_v49, %v883_v34  ;;  %v904_v54 = vmul.f32 %v3572_v48, %v903_v51 }
 0x7e0   :  { %v898_v57 = vsel %vm897_vm2, %v883_v34, %v896_v52  ;;  %v905_v60 = vmul.f32 0.5, %v904_v54 }
 0x7e1   :  { %v901_v61 = vsel %vm899_vm3, %v900_v56, %v898_v57 }
 0x7e2   :  { %v914_v62 = vadd.f32 1e-06, %v901_v61  ;;  %v906_v63 = vsub.f32 1.5, %v905_v60  ;;  %v4428_v61 = vld [vmem:[%s5003_s30] sm:$0xff] }
 0x7e4   :  { %3573 = vrcp.f32 %v914_v62  ;;  %v907_v2 = vmul.f32 %v3572_v48, %v906_v63  ;;  %v927_v16 = vand.u32 2147483648, %v914_v62  ;;  %vm921_vm7 = vweird.f32 %v914_v62 }
 0x7e5   :  { %v925_v17 = vand.u32 2147483647, %v914_v62 }
 0x7e6   :  { %v908_v3 = vmul.f32 %v907_v2, %v884_v44  ;;  %v928_v13 = vor.u32 1.1754944e-38, %v927_v16 }
 0x7e7   :  { %vm926_vm9 = vcmp.eq.f32.partialorder %v925_v17, 8.507059e+37 }
 0x7e8   :  { %v910_v5 = vsel %vm909_vm4, %v884_v44, %v908_v3  ;;  %v1075_v44 = vpack.c.b16 %v1074_v43, %v1073_v42 }
 0x7e9   :  { %v913_v6 = vsel %vm911_vm5, %v912_v4, %v910_v5  ;;  %v4435_v4 = vld [vmem:[%s5003_s30 + $0x8] sm:$0xff] }
 0x7ea   :  { %v3574_v7 = vpop.eup %3573  ;;  %v915_v8 = vadd.f32 1e-06, %v913_v6  ;;  %v1080_v45 = vsel %vm472_vm14, %v1075_v44, 0 }
 0x7eb   :  { %v917_v9 = vmul.f32 %v3574_v7, %v914_v62  ;;  %vm922_vm6 = vweird.f32 %v3574_v7  ;;  %1089 = vmatpush.bf16.xpose.msra.mxu2 %v1080_v45 }
 0x7ec   :  { %3575 = vrcp.f32 %v915_v8  ;;  %vm923_vm8 = vmor %vm921_vm7, %vm922_vm6  ;;  %v942_v18 = vand.u32 2147483648, %v915_v8  ;;  %v940_v23 = vand.u32 2147483647, %v915_v8  ;;  %vm936_vm11 = vweird.f32 %v915_v8 }
 0x7ed   :  { %v918_v11 = vsub.f32 1.0, %v917_v9  ;;  %v3446_v9 = vld [vmem:[%s4951_s14] sm:$0xff] }
 0x7ee   :  { %v943_v0 = vor.u32 1.1754944e-38, %v942_v18  ;;  %vm941_vm13 = vcmp.eq.f32.partialorder %v940_v23, 8.507059e+37 }
 0x7ef   :  { %v919_v12 = vmul.f32 %v3574_v7, %v918_v11 }
 0x7f1   :  { %v920_v14 = vadd.f32 %v3574_v7, %v919_v12 }
 0x7f2   :  { %v3576_v15 = vpop.eup %3575 }
 0x7f3   :  { %v932_v19 = vmul.f32 %v3576_v15, %v915_v8  ;;  %v924_v53 = vsel %vm923_vm8, %v3574_v7, %v920_v14  ;;  %vm937_vm10 = vweird.f32 %v3576_v15  ;;  %v3447_v8 = vld [vmem:[%s4951_s14 + $0x8] sm:$0xff] }
 0x7f4   :  { %v929_v55 = vsel %vm926_vm9, %v928_v13, %v924_v53  ;;  %vm938_vm12 = vmor %vm936_vm11, %vm937_vm10  ;;  %1052 = vmatpush.bf16.msra.mxu1 %v3447_v8 }
 0x7f5   :  { %v933_v22 = vsub.f32 1.0, %v932_v19  ;;  %v930_v28 = vmul.f32 %v929_v55, %v888_v25 }
 0x7f7   :  { %v934_v58 = vmul.f32 %v3576_v15, %v933_v22  ;;  %v949_v33 = vadd.f32 %v3500_v1, %v930_v28 }
 0x7f8   :  { %1053 = vmatpush.bf16.msra.mxu1 %v3446_v9 }
 0x7f9   :  { %v935_v59 = vadd.f32 %v3576_v15, %v934_v58  ;;  %v3503_v58 = vld [vmem:[#allocation10] ss:$0 sm:$0xff] }
 0x7fb   :  { %v939_v29 = vsel %vm938_vm12, %v3576_v15, %v935_v59  ;;  %3239 = vmatmul.msk.bf16.vlgmr.msra.gmra.mxu1 %vm256_vm0, %v4407_v41 }
 0x7fc   :  { %v944_v31 = vsel %vm941_vm13, %v943_v0, %v939_v29 }
 0x7fd   :  { %v945_v32 = vmul.f32 %v944_v31, %v889_v27  ;;  %v1147_v31 = vld [vmem:[%s4952_s15] sm:$0xf] }
 0x7ff   :  { %v950_v34 = vadd.f32 %v3500_v1, %v945_v32  ;;  %v1246_v32 = vsel %vm623_vm1, %v1147_v31, 0 }
 0x801   :  { %v951_v35 = vpack.c.bf16 %v950_v34, %v949_v33 }
 0x803   :  { %3221 = vmatmul.msk.bf16.vlgmr.msrb.gmra.mxu3 %vm256_vm0, %v951_v35 }
 0x878   :  { %v1055_v23 = vpop.f32.mrf.mxu1 }
 0x879   :  { %v1056_v55 = vadd.f32 %v3503_v58, %v1055_v23 }
 0x87b   :  { %v1064_v25 = vpack.c.bf16 %v1056_v55, %v1056_v55 }
 0x87d   :  { %v1125_v27 = vunpack.c.l.b16 %v1064_v25 }
 0x880   :  { %v1057_v59 = vpop.f32.mrf.mxu1 }
 0x881   :  { %v1058_v0 = vadd.f32 %v3503_v58, %v1057_v59 }
 0x883   :  { %v1065_v28 = vpack.c.bf16 %v1058_v0, %v1058_v0 }
 0x885   :  { %v1126_v29 = vunpack.c.l.b16 %v1065_v28 }
 0x886   :  { %v984_v50 = vpop.f32.mrf.mxu3 }
 0x887   :  { %v985_v47 = vadd.f32 %v3502_v46, %v984_v50  ;;  %v4454_v1 = vpack.c.b16 %v1126_v29, %v1125_v27 }
 0x889   :  { %v1060_v49 = vpack.c.bf16 %v985_v47, %v985_v47  ;;  %1139 = vmatpush.bf16.msra.mxu3 %v4454_v1 }
 0x88b   :  { %v1068_v54 = vunpack.c.l.b16 %v1060_v49 }
 0x88d   :  { %1255 = vmatpush.bf16.msrb.mxu3 %v1246_v32 }
 0x88e   :  { %v986_v48 = vpop.f32.mrf.mxu3 }
 0x88f   :  { %v987_v51 = vadd.f32 %v3502_v46, %v986_v48 }
 0x891   :  { %v1061_v52 = vpack.c.bf16 %v987_v51, %v987_v51 }
 0x893   :  { %v1069_v56 = vunpack.c.l.b16 %v1061_v52 }
 0x895   :  { %v1070_v57 = vpack.c.b16 %v1069_v56, %v1068_v54 }
 0x897   :  { %3240 = vmatmul.msk.bf16.vlgmr.msra.gmra.mxu2 %vm472_vm14, %v1070_v57 }
 0x91a   :  { %v1091_v60 = vpop.f32.mrf.mxu2 }
 0x91b   :  { %v1096_v62 = vmul.f32 0.35355338, %v1091_v60 }
 0x91d   :  { %v1098_v63 = vadd.f32 %v1096_v62, %v4428_v61 }
 0x91f   :  { %v1100_v2 = vsel %vm497_vm15, %v1098_v63, -inf }
 0x920   :  { %1101 = vmax.xlane.f32.xlu2 %v1100_v2 }
 0x922   :  { %v1093_v3 = vpop.f32.mrf.mxu2 }
 0x923   :  { %v1097_v5 = vmul.f32 0.35355338, %v1093_v3 }
 0x925   :  { %v1099_v6 = vadd.f32 %v1097_v5, %v4435_v4 }
 0x927   :  { %v1103_v7 = vsel %vm497_vm15, %v1099_v6, -inf }
 0x928   :  { %1104 = vmax.xlane.f32.xlu2 %v1103_v7 }
 0x940   :  { %1150 = vrot.lane.b32.xlu2 %v1075_v44, %s4012_s9 }
 0x948   :  { %1262 = vrot.lane.b32.xlu2 %v1070_v57, %s4013_s12 }
 0x993   :  { %v1102_v11 = vpop.xlane.xlu2 %1101 }
 0x994   :  { %v1106_v12 = vsub.f32 %v1098_v63, %v1102_v11 }
 0x996   :  { %v1108_v14 = vmul.f32 1.442695, %v1106_v12 }
 0x998   :  { %3577 = vpow2.f32 %v1108_v14 }
 0x99b   :  { %v1105_v15 = vpop.xlane.xlu2 %1104 }
 0x99c   :  { %v1107_v16 = vsub.f32 %v1099_v6, %v1105_v15 }
 0x99e   :  { %v3578_v17 = vpop.eup %3577  ;;  %v1110_v19 = vmul.f32 1.442695, %v1107_v16 }
 0x99f   :  { %v1112_v20 = vsel %vm497_vm15, %v3578_v17, 0.0 }
 0x9a0   :  { %3579 = vpow2.f32 %v1110_v19  ;;  %1113 = vadd.xlane.f32.xlu0 %v1112_v20 }
 0x9a3   :  { %v1151_v53 = vpop.permute.xlu2 %1150 }
 0x9a4   :  { %v1156_v22 = vsel %vm472_vm14, %v1151_v53, 0 }
 0x9a5   :  { %1165 = vmatpush.bf16.xpose.msrb.mxu0 %v1156_v22 }
 0x9a6   :  { %v3580_v13 = vpop.eup %3579 }
 0x9a7   :  { %v1115_v18 = vsel %vm497_vm15, %v3580_v13, 0.0 }
 0x9a8   :  { %1116 = vadd.xlane.f32.xlu1 %v1115_v18 }
 0x9b4   :  { %1148 = vrot.lane.b32.xlu0 %v1070_v57, %s4012_s9 }
 0x9bc   :  { %1360 = vrot.lane.b32.xlu0 %v1075_v44, %s4014_s23 }
 0x9c1   :  { %1264 = vrot.lane.b32.xlu1 %v1075_v44, %s4013_s12  ;;  %v1263_v44 = vpop.permute.xlu2 %1262 }
 0x9c9   :  { %1358 = vrot.lane.b32.xlu1 %v1070_v57, %s4014_s23 }
 0xa13   :  { %v1114_v33 = vpop.xlane.xlu0 %1113 }
 0xa14   :  { %3581 = vrcp.f32 %v1114_v33 }
 0xa1a   :  { %v3582_v35 = vpop.eup %3581 }
 0xa1b   :  { %v1117_v34 = vpop.xlane.xlu1 %1116  ;;  %v1120_v36 = vmul.f32 %v3582_v35, %v3578_v17 }
 0xa1c   :  { %3583 = vrcp.f32 %v1117_v34 }
 0xa22   :  { %v3584_v26 = vpop.eup %3583 }
 0xa23   :  { %v1121_v37 = vmul.f32 %v3584_v26, %v3580_v13 }
 0xa25   :  { %v1122_v38 = vpack.c.bf16 %v1121_v37, %v1120_v36 }
 0xa26   :  { %v1149_v39 = vpop.permute.xlu0 %1148 }
 0xa27   :  { %3241 = vmatmul.msk.bf16.vlgmr.msra.gmra.mxu3 %vm497_vm15, %v1122_v38  ;;  %3242 = vmatmul.msk.bf16.vlgmr.msrb.gmra.mxu0 %vm472_vm14, %v1149_v39 }
 0xa2e   :  { %v1361_v30 = vpop.permute.xlu0 %1360 }
 0xa2f   :  { %v1366_v40 = vsel %vm472_vm14, %v1361_v30, 0 }
 0xa30   :  { %1375 = vmatpush.bf16.xpose.msra.mxu3 %v1366_v40 }
 0xa33   :  { %v1265_v42 = vpop.permute.xlu1 %1264 }
 0xa34   :  { %v1270_v43 = vsel %vm472_vm14, %v1265_v42, 0 }
 0xa35   :  { %1279 = vmatpush.bf16.xpose.msra.mxu0 %v1270_v43 }
 0xa3b   :  { %v1359_v6 = vpop.permute.xlu1 %1358 }
 0xa3c   :  { %3247 = vmatmul.msk.bf16.vlgmr.msra.gmra.mxu0 %vm472_vm14, %v1263_v44 }
 0xaa4   :  { %v1167_v45 = vpop.f32.mrf.mxu0 }
 0xaa5   :  { %v1172_v50 = vmul.f32 0.35355338, %v1167_v45 }
 0xaa7   :  { %v1174_v46 = vadd.f32 %v1172_v50, %v4428_v61 }
 0xaa9   :  { %v1176_v47 = vsel %vm497_vm15, %v1174_v46, -inf }
 0xaaa   :  { %v1141_v48 = vpop.f32.mrf.mxu3  ;;  %1177 = vmax.xlane.f32.xlu0 %v1176_v47 }
 0xaac   :  { %v1169_v49 = vpop.f32.mrf.mxu0 }
 0xaad   :  { %v1173_v51 = vmul.f32 0.35355338, %v1169_v49 }
 0xaaf   :  { %v1175_v52 = vadd.f32 %v1173_v51, %v4435_v4 }
 0xab1   :  { %v1179_v54 = vsel %vm497_vm15, %v1175_v52, -inf }
 0xab2   :  { %v1143_v56 = vpop.f32.mrf.mxu3  ;;  %1180 = vmax.xlane.f32.xlu2 %v1179_v54 }
 0xab3   :  { %v1146_v57 = vpack.c.bf16 %v1143_v56, %v1141_v48 }
 0xab5   :  { %3246 = vmatmul.msk.bf16.vlgmr.msrb.gmra.mxu3 %vm472_vm14, %v1146_v57 }
 0xab9   :  { %v1281_v60 = vpop.f32.mrf.mxu0 }
 0xaba   :  { %v1286_v62 = vmul.f32 0.35355338, %v1281_v60 }
 0xabc   :  { %v1288_v63 = vadd.f32 %v1286_v62, %v4428_v61 }
 0xabe   :  { %v1290_v2 = vsel %vm497_vm15, %v1288_v63, -inf }
 0xabf   :  { %1291 = vmax.xlane.f32.xlu1 %v1290_v2 }
 0xac1   :  { %v1283_v3 = vpop.f32.mrf.mxu0 }
 0xac2   :  { %v1287_v5 = vmul.f32 0.35355338, %v1283_v3 }
 0xac4   :  { %v1289_v7 = vadd.f32 %v1287_v5, %v4435_v4 }
 0xac5   :  { %3251 = vmatmul.msk.bf16.vlgmr.msra.gmra.mxu3 %vm472_vm14, %v1359_v6 }
 0xac6   :  { %v1293_v8 = vsel %vm497_vm15, %v1289_v7, -inf }
 0xac7   :  { %1294 = vmax.xlane.f32.xlu0 %v1293_v8 }
 0xb1d   :  { %v1178_v9 = vpop.xlane.xlu0 %1177 }
 0xb1e   :  { %v1182_v11 = vsub.f32 %v1174_v46, %v1178_v9 }
 0xb20   :  { %v1184_v12 = vmul.f32 1.442695, %v1182_v11 }
 0xb22   :  { %3585 = vpow2.f32 %v1184_v12 }
 0xb25   :  { %v1181_v18 = vpop.xlane.xlu2 %1180 }
 0xb26   :  { %v1183_v58 = vsub.f32 %v1175_v52, %v1181_v18  ;;  %v3253_v18 = vld [vmem:[%s4952_s15 + $0xc] sm:$0xf] }
 0xb28   :  { %v3586_v14 = vpop.eup %3585  ;;  %v1186_v23 = vmul.f32 1.442695, %v1183_v58  ;;  %v1436_v58 = vsel %vm623_vm1, %v3253_v18, 0 }
 0xb29   :  { %v1188_v15 = vsel %vm497_vm15, %v3586_v14, 0.0 }
 0xb2a   :  { %1189 = vadd.xlane.f32.xlu0 %v1188_v15 }
 0xb32   :  { %v1292_v16 = vpop.xlane.xlu1 %1291 }
 0xb33   :  { %v1296_v17 = vsub.f32 %v1288_v63, %v1292_v16  ;;  %v3244_v63 = vld [vmem:[%s4952_s15 + $0x4] sm:$0xf] }
 0xb34   :  { %v1226_v2 = vsel %vm623_vm1, %v3244_v63, 0 }
 0xb35   :  { %v1298_v19 = vmul.f32 1.442695, %v1296_v17  ;;  %1235 = vmatpush.bf16.msrb.mxu2 %v1226_v2 }
 0xb37   :  { %3587 = vpow2.f32 %v1298_v19 }
 0xb38   :  { %v4479_v20 = vpop.f32.mrf.mxu3  ;;  %3589 = vpow2.f32 %v1186_v23 }
 0xb3a   :  { %v1295_v25 = vpop.xlane.xlu0 %1294 }
 0xb3b   :  { %v1297_v27 = vsub.f32 %v1289_v7, %v1295_v25 }
 0xb3d   :  { %v4481_v53 = vpop.eup %3587  ;;  %v1300_v29 = vmul.f32 1.442695, %v1297_v27 }
 0xb3e   :  { %v1302_v22 = vsel %vm497_vm15, %v4481_v53, 0.0  ;;  %v3590_v33 = vpop.eup %3589 }
 0xb3f   :  { %1303 = vadd.xlane.f32.xlu0 %v1302_v22  ;;  %3591 = vpow2.f32 %v1300_v29  ;;  %v1191_v26 = vsel %vm497_vm15, %v3590_v33, 0.0 }
 0xb40   :  { %v4485_v13 = vpop.f32.mrf.mxu3 }
 0xb45   :  { %v3592_v36 = vpop.eup %3591 }
 0xb48   :  { %v1377_v55 = vpop.f32.mrf.mxu3 }
 0xb49   :  { %v1382_v59 = vmul.f32 0.35355338, %v1377_v55 }
 0xb4b   :  { %v1384_v0 = vadd.f32 %v1382_v59, %v4428_v61  ;;  %v1305_v61 = vsel %vm497_vm15, %v3592_v36, 0.0 }
 0xb4d   :  { %v1386_v28 = vsel %vm497_vm15, %v1384_v0, -inf }
 0xb4e   :  { %1387 = vmax.xlane.f32.xlu2 %v1386_v28 }
 0xb50   :  { %v1379_v31 = vpop.f32.mrf.mxu3 }
 0xb51   :  { %v1383_v32 = vmul.f32 0.35355338, %v1379_v31 }
 0xb53   :  { %v1385_v34 = vadd.f32 %v1383_v32, %v4435_v4 }
 0xb55   :  { %v1389_v35 = vsel %vm497_vm15, %v1385_v34, -inf }
 0xb56   :  { %1390 = vmax.xlane.f32.xlu1 %v1389_v35  ;;  %1192 = vadd.xlane.f32.xlu2 %v1191_v26  ;;  %v3504_v26 = vld [vmem:[#allocation11] ss:$0 sm:$0xff] }
 0xb5e   :  { %1306 = vadd.xlane.f32.xlu2 %v1305_v61 }
 0xb6f   :  { %1199 = vrot.lane.b32.xlu1 %v4454_v1, %s4012_s9 }
 0xb9d   :  { %v1190_v50 = vpop.xlane.xlu0 %1189 }
 0xbb2   :  { %v1304_v56 = vpop.xlane.xlu0 %1303 }
 0xbc1   :  { %v1388_v37 = vpop.xlane.xlu2 %1387 }
 0xbc2   :  { %v1392_v38 = vsub.f32 %v1384_v0, %v1388_v37 }
 0xbc4   :  { %v1394_v39 = vmul.f32 1.442695, %v1392_v38 }
 0xbc6   :  { %3593 = vpow2.f32 %v1394_v39 }
 0xbc9   :  { %v1391_v30 = vpop.xlane.xlu1 %1390  ;;  %v1193_v44 = vpop.xlane.xlu2 %1192 }
 0xbca   :  { %v1393_v4 = vsub.f32 %v1385_v34, %v1391_v30 }
 0xbcc   :  { %v3594_v40 = vpop.eup %3593  ;;  %v1396_v42 = vmul.f32 1.442695, %v1393_v4 }
 0xbcd   :  { %v1398_v43 = vsel %vm497_vm15, %v3594_v40, 0.0 }
 0xbce   :  { %3595 = vpow2.f32 %v1396_v42  ;;  %1399 = vadd.xlane.f32.xlu0 %v1398_v43 }
 0xbcf   :  { %3597 = vrcp.f32 %v1193_v44 }
 0xbd0   :  { %3599 = vrcp.f32 %v1190_v50 }
 0xbd1   :  { %v1307_v57 = vpop.xlane.xlu2 %1306 }
 0xbd4   :  { %v3596_v45 = vpop.eup %3595 }
 0xbd5   :  { %v1401_v46 = vsel %vm497_vm15, %v3596_v45, 0.0  ;;  %v3598_v47 = vpop.eup %3597 }
 0xbd6   :  { %1402 = vadd.xlane.f32.xlu2 %v1401_v46  ;;  %v3600_v48 = vpop.eup %3599  ;;  %v1197_v49 = vmul.f32 %v3598_v47, %v3590_v33 }
 0xbd7   :  { %v1196_v51 = vmul.f32 %v3600_v48, %v3586_v14 }
 0xbd9   :  { %v1198_v54 = vpack.c.bf16 %v1197_v49, %v1196_v51 }
 0xbe1   :  { %v1200_v52 = vpop.permute.xlu1 %1199 }
 0xbe2   :  { %1212 = vmatpush.bf16.msrb.mxu1 %v1200_v52  ;;  %1313 = vrot.lane.b32.xlu0 %v4454_v1, %s4013_s12 }
 0xbe5   :  { %3243 = vmatmul.msk.bf16.vlgmr.msrb.gmra.mxu1 %vm497_vm15, %v1198_v54 }
 0xbee   :  { %1409 = vrot.lane.b32.xlu2 %v4454_v1, %s4014_s23 }
 0xc41   :  { %v1400_v60 = vpop.xlane.xlu0 %1399 }
 0xc42   :  { %3601 = vrcp.f32 %v1400_v60 }
 0xc43   :  { %3603 = vrcp.f32 %v1307_v57  ;;  %v3448_v57 = vld [vmem:[#allocation13] sm:$0xff] }
 0xc48   :  { %v3602_v3 = vpop.eup %3601 }
 0xc49   :  { %v1403_v62 = vpop.xlane.xlu2 %1402  ;;  %v3604_v5 = vpop.eup %3603  ;;  %v1406_v1 = vmul.f32 %v3602_v3, %v3594_v40 }
 0xc4a   :  { %3605 = vrcp.f32 %v1403_v62  ;;  %v1311_v11 = vmul.f32 %v3604_v5, %v3592_v36 }
 0xc4b   :  { %3607 = vrcp.f32 %v1304_v56  ;;  %v3449_v56 = vld [vmem:[#allocation13 + $0x8] sm:$0xff] }
 0xc50   :  { %v3606_v6 = vpop.eup %3605 }
 0xc51   :  { %v3608_v7 = vpop.eup %3607  ;;  %v1407_v8 = vmul.f32 %v3606_v6, %v3596_v45  ;;  %v1410_v9 = vpop.permute.xlu2 %1409 }
 0xc52   :  { %1422 = vmatpush.bf16.msrb.mxu0 %v1410_v9  ;;  %v1310_v14 = vmul.f32 %v3608_v7, %v4481_v53  ;;  %v3249_v53 = vld [vmem:[%s4952_s15 + $0x8] sm:$0xf] }
 0xc53   :  { %v1408_v12 = vpack.c.bf16 %v1407_v8, %v1406_v1  ;;  %v1340_v23 = vsel %vm623_vm1, %v3249_v53, 0 }
 0xc54   :  { %v1314_v15 = vpop.permute.xlu0 %1313  ;;  %v1312_v16 = vpack.c.bf16 %v1311_v11, %v1310_v14  ;;  %1349 = vmatpush.bf16.msra.mxu2 %v1340_v23 }
 0xc55   :  { %1326 = vmatpush.bf16.msra.mxu1 %v1314_v15  ;;  %3252 = vmatmul.msk.bf16.vlgmr.msrb.gmra.mxu0 %vm497_vm15, %v1408_v12 }
 0xc58   :  { %3248 = vmatmul.msk.bf16.vlgmr.msra.gmra.mxu1 %vm497_vm15, %v1312_v16 }
 0xc59   :  { %1445 = vmatpush.bf16.msrb.mxu1 %v1436_v58 }
 0xc62   :  { %v1214_v17 = vpop.f32.mrf.mxu1 }
 0xc6a   :  { %v1216_v19 = vpop.f32.mrf.mxu1 }
 0xc6b   :  { %v1219_v22 = vpack.c.bf16 %v1216_v19, %v1214_v17 }
 0xc6d   :  { %3245 = vmatmul.msk.bf16.vlgmr.msrb.gmra.mxu2 %vm472_vm14, %v1219_v22 }
 0xc6e   :  { %1582 = vmatpush.bf16.msrb.mxu2 %v3449_v56  ;;  %v3507_v56 = vld [vmem:[#allocation14] ss:$0 sm:$0xff] }
 0xc72   :  { %1583 = vmatpush.bf16.msrb.mxu2 %v3448_v57 }
 0xcd2   :  { %v1424_v55 = vpop.f32.mrf.mxu0 }
 0xcd5   :  { %v1328_v25 = vpop.f32.mrf.mxu1 }
 0xcda   :  { %v1426_v59 = vpop.f32.mrf.mxu0 }
 0xcdb   :  { %v1429_v0 = vpack.c.bf16 %v1426_v59, %v1424_v55 }
 0xcdd   :  { %v1330_v27 = vpop.f32.mrf.mxu1  ;;  %3254 = vmatmul.msk.bf16.vlgmr.msrb.gmra.mxu1 %vm472_vm14, %v1429_v0 }
 0xcde   :  { %v1333_v28 = vpack.c.bf16 %v1330_v27, %v1328_v25 }
 0xce0   :  { %3250 = vmatmul.msk.bf16.vlgmr.msra.gmra.mxu2 %vm472_vm14, %v1333_v28 }
 0xcf0   :  { %v1237_v29 = vpop.f32.mrf.mxu2 }
 0xcf1   :  { %v1258_v32 = vadd.f32 %v4479_v20, %v1237_v29 }
 0xcf8   :  { %v1239_v31 = vpop.f32.mrf.mxu2 }
 0xcf9   :  { %v1260_v37 = vadd.f32 %v4485_v13, %v1239_v31 }
 0xd5a   :  { %v1447_v33 = vpop.f32.mrf.mxu1 }
 0xd62   :  { %v1449_v40 = vpop.f32.mrf.mxu1 }
 0xd63   :  { %v1351_v34 = vpop.f32.mrf.mxu2 }
 0xd64   :  { %v1356_v35 = vadd.f32 %v1351_v34, %v1258_v32  ;;  %v3505_v34 = vld [vmem:[%s4961_s24 + $0x2] ss:$0 sm:$0xff] }
 0xd66   :  { %v1452_v36 = vadd.f32 %v1447_v33, %v1356_v35 }
 0xd68   :  { %v1458_v61 = vadd.f32 %v3504_v26, %v1452_v36 }
 0xd6a   :  { %v4523_v38 = vadd.f32 %v1458_v61, %v4372_v21 }
 0xd6b   :  { %v1353_v39 = vpop.f32.mrf.mxu2 }
 0xd6c   :  { %v1357_v30 = vadd.f32 %v1353_v39, %v1260_v37  ;;  %v1466_v4 = vsel %vm256_vm0, %v4523_v38, 0.0 }
 0xd6d   :  { %1467 = vadd.xlane.f32.xlu1 %v1466_v4 }
 0xd6e   :  { %v1453_v42 = vadd.f32 %v1449_v40, %v1357_v30 }
 0xd70   :  { %v1459_v20 = vadd.f32 %v3504_v26, %v1453_v42 }
 0xd72   :  { %v4528_v43 = vadd.f32 %v1459_v20, %v4377_v24 }
 0xd74   :  { %v1469_v44 = vsel %vm256_vm0, %v4528_v43, 0.0 }
 0xd75   :  { %1470 = vadd.xlane.f32.xlu0 %v1469_v44 }
 0xde0   :  { %v1468_v13 = vpop.xlane.xlu1 %1467 }
 0xde1   :  { %v1472_v21 = vmul.f32 %v1468_v13, %v4229_v10 }
 0xde3   :  { %v4534_v45 = vsub.f32 %v4523_v38, %v1472_v21  ;;  %v3506_v21 = vld [vmem:[%s4962_s25 + $0x2] ss:$0 sm:$0xff] }
 0xde5   :  { %v1476_v50 = vmul.f32 %v4534_v45, %v4534_v45  ;;  %v1489_v4 = vmul.f32 %v3505_v34, %v4534_v45  ;;  %v3453_v45 = vld [vmem:[%s4959_s22 + $0x18] sm:$0xff] }
 0xde6   :  { %1633 = vmatpush.bf16.msrb.mxu3 %v3453_v45 }
 0xde7   :  { %v1478_v46 = vsel %vm256_vm0, %v1476_v50, 0.0 }
 0xde8   :  { %1479 = vadd.xlane.f32.xlu2 %v1478_v46  ;;  %v1471_v47 = vpop.xlane.xlu0 %1470 }
 0xde9   :  { %v1473_v24 = vmul.f32 %v1471_v47, %v4229_v10 }
 0xdeb   :  { %v4541_v48 = vsub.f32 %v4528_v43, %v1473_v24 }
 0xded   :  { %v1477_v49 = vmul.f32 %v4541_v48, %v4541_v48  ;;  %v1490_v20 = vmul.f32 %v3505_v34, %v4541_v48  ;;  %v3452_v48 = vld [vmem:[%s4959_s22 + $0x10] sm:$0xff] }
 0xdee   :  { %1634 = vmatpush.bf16.msrb.mxu3 %v3452_v48 }
 0xdef   :  { %v1481_v51 = vsel %vm256_vm0, %v1477_v49, 0.0 }
 0xdf0   :  { %1482 = vadd.xlane.f32.xlu1 %v1481_v51  ;;  %v3451_v51 = vld [vmem:[%s4959_s22 + $0x8] sm:$0xff] }
 0xdf2   :  { %1635 = vmatpush.bf16.msrb.mxu3 %v3451_v51 }
 0xe5b   :  { %v1480_v52 = vpop.xlane.xlu2 %1479 }
 0xe5c   :  { %v1484_v54 = vmul.f32 0.032258064, %v1480_v52  ;;  %v3450_v52 = vld [vmem:[%s4959_s22] sm:$0xff] }
 0xe5d   :  { %1636 = vmatpush.bf16.msrb.mxu3 %v3450_v52 }
 0xe5e   :  { %3609 = vrsqrt.f32 %v1484_v54  ;;  %vm1498_vm2 = vcmp.eq.f32.partialorder %v1484_v54, inf  ;;  %v1501_v12 = vand.u32 2147483648, %v1484_v54  ;;  %vm1500_vm3 = vcmp.eq.f32.partialorder %v1484_v54, 0.0 }
 0xe63   :  { %v1483_v60 = vpop.xlane.xlu1 %1482 }
 0xe64   :  { %v3610_v62 = vpop.eup %3609  ;;  %v1485_v63 = vmul.f32 0.032258064, %v1483_v60 }
 0xe65   :  { %v1492_v2 = vmul.f32 %v3610_v62, %v1484_v54 }
 0xe66   :  { %3611 = vrsqrt.f32 %v1485_v63  ;;  %vm1510_vm4 = vcmp.eq.f32.partialorder %v1485_v63, inf  ;;  %v1513_v58 = vand.u32 2147483648, %v1485_v63  ;;  %vm1512_vm5 = vcmp.eq.f32.partialorder %v1485_v63, 0.0 }
 0xe67   :  { %v1493_v3 = vmul.f32 %v3610_v62, %v1492_v2 }
 0xe69   :  { %v1494_v5 = vmul.f32 0.5, %v1493_v3 }
 0xe6b   :  { %v1495_v6 = vsub.f32 1.5, %v1494_v5  ;;  %v3508_v5 = vld [vmem:[#allocation16] ss:$0 sm:$0xff] }
 0xe6c   :  { %v3612_v7 = vpop.eup %3611 }
 0xe6d   :  { %v1496_v1 = vmul.f32 %v3610_v62, %v1495_v6  ;;  %v1504_v8 = vmul.f32 %v3612_v7, %v1485_v63 }
 0xe6f   :  { %v1497_v9 = vmul.f32 %v1496_v1, %v1484_v54  ;;  %v1505_v11 = vmul.f32 %v3612_v7, %v1504_v8 }
 0xe71   :  { %v1499_v14 = vsel %vm1498_vm2, %v1484_v54, %v1497_v9  ;;  %v1506_v15 = vmul.f32 0.5, %v1505_v11  ;;  %vm1625_vm2 = vcmask 523264  }
 0xe72   :  { %v1502_v16 = vsel %vm1500_vm3, %v1501_v12, %v1499_v14 }
 0xe73   :  { %v1515_v17 = vadd.f32 1e-06, %v1502_v16  ;;  %v1507_v19 = vsub.f32 1.5, %v1506_v15 }
 0xe75   :  { %3613 = vrcp.f32 %v1515_v17  ;;  %v1508_v22 = vmul.f32 %v3612_v7, %v1507_v19  ;;  %v1528_v31 = vand.u32 2147483648, %v1515_v17  ;;  %vm1522_vm7 = vweird.f32 %v1515_v17 }
 0xe76   :  { %v1526_v32 = vand.u32 2147483647, %v1515_v17 }
 0xe77   :  { %v1509_v18 = vmul.f32 %v1508_v22, %v1485_v63  ;;  %v1529_v36 = vor.u32 1.1754944e-38, %v1528_v31 }
 0xe78   :  { %vm1527_vm9 = vcmp.eq.f32.partialorder %v1526_v32, 8.507059e+37 }
 0xe79   :  { %v1511_v53 = vsel %vm1510_vm4, %v1485_v63, %v1509_v18 }
 0xe7a   :  { %v1514_v23 = vsel %vm1512_vm5, %v1513_v58, %v1511_v53 }
 0xe7b   :  { %v3614_v55 = vpop.eup %3613  ;;  %v1516_v25 = vadd.f32 1e-06, %v1514_v23 }
 0xe7c   :  { %v1518_v59 = vmul.f32 %v3614_v55, %v1515_v17  ;;  %vm1523_vm6 = vweird.f32 %v3614_v55 }
 0xe7d   :  { %3615 = vrcp.f32 %v1516_v25  ;;  %vm1524_vm8 = vmor %vm1522_vm7, %vm1523_vm6  ;;  %v1543_v61 = vand.u32 2147483648, %v1516_v25  ;;  %v1541_v39 = vand.u32 2147483647, %v1516_v25  ;;  %vm1537_vm11 = vweird.f32 %v1516_v25 }
 0xe7e   :  { %v1519_v0 = vsub.f32 1.0, %v1518_v59  ;;  %v3457_v59 = vld [vmem:[%s4996_s10 + $0x18] sm:$0xff] }
 0xe7f   :  { %v1544_v42 = vor.u32 1.1754944e-38, %v1543_v61  ;;  %vm1542_vm13 = vcmp.eq.f32.partialorder %v1541_v39, 8.507059e+37  ;;  %1809 = vmatpush.bf16.msra.mxu1 %v3457_v59  ;;  %v3512_v59 = vld [vmem:[#allocation5 + $0x1] ss:$0 sm:$0xff] }
 0xe80   :  { %v1520_v27 = vmul.f32 %v3614_v55, %v1519_v0  ;;  %v3459_v0 = vld [vmem:[%s4997_s20 + $0x18] sm:$0xff] }
 0xe81   :  { %1845 = vmatpush.bf16.msra.mxu2 %v3459_v0 }
 0xe82   :  { %v1521_v28 = vadd.f32 %v3614_v55, %v1520_v27  ;;  %v3454_v27 = vld [vmem:[%s4995_s18 + $0x10] sm:$0xff] }
 0xe83   :  { %v3616_v29 = vpop.eup %3615 }
 0xe84   :  { %v1533_v33 = vmul.f32 %v3616_v29, %v1516_v25  ;;  %v1525_v35 = vsel %vm1524_vm8, %v3614_v55, %v1521_v28  ;;  %vm1538_vm10 = vweird.f32 %v3616_v29  ;;  %v3455_v25 = vld [vmem:[%s4995_s18 + $0x18] sm:$0xff]  ;;  %v3456_v28 = vld [vmem:[%s4996_s10 + $0x10] sm:$0xff]  ;;  %s3151_s18 = sshll.u32 %s4965_s28, 4  ;;  %s5004_s10 = smov 8   ;;  %s3152_s18 = int_to_ptr.hbm [resolvable:$true] %s3151_s18 }
 0xe85   :  { %v1530_v30 = vsel %vm1527_vm9, %v1529_v36, %v1525_v35  ;;  %vm1539_vm12 = vmor %vm1537_vm11, %vm1538_vm10  ;;  %1773 = vmatpush.bf16.msra.mxu0 %v3455_v25  ;;  %1810 = vmatpush.bf16.msra.mxu1 %v3456_v28  ;;  %v3513_v28 = vld [vmem:[%s4998_s1 + $0x1] ss:$0 sm:$0xff] }
 0xe86   :  { %v1534_v26 = vsub.f32 1.0, %v1533_v33  ;;  %v1531_v44 = vmul.f32 %v1530_v30, %v1489_v4 }
 0xe88   :  { %v1535_v37 = vmul.f32 %v3616_v29, %v1534_v26  ;;  %v1550_v47 = vadd.f32 %v3506_v21, %v1531_v44 }
 0xe89   :  { %1774 = vmatpush.bf16.msra.mxu0 %v3454_v27 }
 0xe8a   :  { %v1536_v40 = vadd.f32 %v3616_v29, %v1535_v37 }
 0xe8c   :  { %v1540_v13 = vsel %vm1539_vm12, %v3616_v29, %v1536_v40  ;;  %v3458_v29 = vld [vmem:[%s4997_s20 + $0x10] sm:$0xff] }
 0xe8d   :  { %v1545_v50 = vsel %vm1542_vm13, %v1544_v42, %v1540_v13  ;;  %1846 = vmatpush.bf16.msra.mxu2 %v3458_v29 }
 0xe8e   :  { %v1546_v46 = vmul.f32 %v1545_v50, %v1490_v20 }
 0xe90   :  { %v1551_v24 = vadd.f32 %v3506_v21, %v1546_v46 }
 0xe92   :  { %v1552_v49 = vpack.c.bf16 %v1551_v24, %v1550_v47 }
 0xe94   :  { %3265 = vmatmul.msk.bf16.vlgmr.msrb.gmra.mxu2 %vm256_vm0, %v1552_v49 }
 0xf17   :  { %v1585_v54 = vpop.f32.mrf.mxu2 }
 0xf18   :  { %v1586_v57 = vadd.f32 %v3507_v56, %v1585_v54 }
 0xf1a   :  { %v1590_v63 = vmax.f32 %v1586_v57, 0.0 }
 0xf1f   :  { %v1587_v60 = vpop.f32.mrf.mxu2 }
 0xf20   :  { %v1588_v62 = vadd.f32 %v3507_v56, %v1587_v60 }
 0xf22   :  { %v1591_v2 = vmax.f32 %v1588_v62, 0.0 }
 0xf24   :  { %v1592_v3 = vpack.c.bf16 %v1591_v2, %v1590_v63  ;;  %v3509_v2 = vld [vmem:[%s4961_s24 + $0x3] ss:$0 sm:$0xff] }
 0xf26   :  { %3282 = vmatmul.msk.bf16.vlgmr.msrb.gmra.mxu3 %vm1625_vm2, %v1592_v3 }
 0xfa9   :  { %v1638_v6 = vpop.f32.mrf.mxu3 }
 0xfaa   :  { %v1643_v7 = vadd.f32 %v1638_v6, %v4523_v38 }
 0xfac   :  { %v4569_v1 = vadd.f32 %v3508_v5, %v1643_v7 }
 0xfae   :  { %v1655_v8 = vsel %vm256_vm0, %v4569_v1, 0.0 }
 0xfaf   :  { %1656 = vadd.xlane.f32.xlu1 %v1655_v8 }
 0xfb1   :  { %v1640_v9 = vpop.f32.mrf.mxu3 }
 0xfb2   :  { %v1644_v11 = vadd.f32 %v1640_v9, %v4528_v43 }
 0xfb4   :  { %v4574_v12 = vadd.f32 %v3508_v5, %v1644_v11 }
 0xfb6   :  { %v1658_v14 = vsel %vm256_vm0, %v4574_v12, 0.0 }
 0xfb7   :  { %1659 = vadd.xlane.f32.xlu0 %v1658_v14 }
0x1022   :  { %v1657_v15 = vpop.xlane.xlu1 %1656 }
0x1023   :  { %v1661_v16 = vmul.f32 %v1657_v15, %v4229_v10 }
0x1025   :  { %v4580_v38 = vsub.f32 %v4569_v1, %v1661_v16 }
0x1027   :  { %v1665_v17 = vmul.f32 %v4580_v38, %v4580_v38  ;;  %v1678_v14 = vmul.f32 %v3509_v2, %v4580_v38 }
0x1029   :  { %v1667_v19 = vsel %vm256_vm0, %v1665_v17, 0.0 }
0x102a   :  { %1668 = vadd.xlane.f32.xlu1 %v1667_v19  ;;  %v1660_v22 = vpop.xlane.xlu0 %1659 }
0x102b   :  { %v1662_v43 = vmul.f32 %v1660_v22, %v4229_v10 }
0x102d   :  { %v4587_v18 = vsub.f32 %v4574_v12, %v1662_v43  ;;  %v3510_v43 = vld [vmem:[%s4962_s25 + $0x3] ss:$0 sm:$0xff] }
0x102f   :  { %v1666_v58 = vmul.f32 %v4587_v18, %v4587_v18  ;;  %v1679_v17 = vmul.f32 %v3509_v2, %v4587_v18 }
0x1031   :  { %v1670_v53 = vsel %vm256_vm0, %v1666_v58, 0.0 }
0x1032   :  { %1671 = vadd.xlane.f32.xlu2 %v1670_v53 }
0x109d   :  { %v1669_v23 = vpop.xlane.xlu1 %1668 }
0x109e   :  { %v1673_v55 = vmul.f32 0.032258064, %v1669_v23 }
0x10a0   :  { %3617 = vrsqrt.f32 %v1673_v55  ;;  %vm1687_vm3 = vcmp.eq.f32.partialorder %v1673_v55, inf  ;;  %v1690_v40 = vand.u32 2147483648, %v1673_v55  ;;  %vm1689_vm4 = vcmp.eq.f32.partialorder %v1673_v55, 0.0 }
0x10a5   :  { %v1672_v31 = vpop.xlane.xlu2 %1671 }
0x10a6   :  { %v3618_v32 = vpop.eup %3617  ;;  %v1674_v33 = vmul.f32 0.032258064, %v1672_v31 }
0x10a7   :  { %v1681_v34 = vmul.f32 %v3618_v32, %v1673_v55 }
0x10a8   :  { %3619 = vrsqrt.f32 %v1674_v33  ;;  %vm1699_vm5 = vcmp.eq.f32.partialorder %v1674_v33, inf  ;;  %v1702_v47 = vand.u32 2147483648, %v1674_v33  ;;  %vm1701_vm6 = vcmp.eq.f32.partialorder %v1674_v33, 0.0 }
0x10a9   :  { %v1682_v35 = vmul.f32 %v3618_v32, %v1681_v34 }
0x10ab   :  { %v1683_v26 = vmul.f32 0.5, %v1682_v35 }
0x10ad   :  { %v1684_v36 = vsub.f32 1.5, %v1683_v26 }
0x10ae   :  { %v3620_v61 = vpop.eup %3619 }
0x10af   :  { %v1685_v37 = vmul.f32 %v3618_v32, %v1684_v36  ;;  %v1693_v39 = vmul.f32 %v3620_v61, %v1674_v33  ;;  %v3511_v32 = vld [vmem:[%s4999_s5 + $0x1] ss:$0 sm:$0xff] }
0x10b1   :  { %v1686_v30 = vmul.f32 %v1685_v37, %v1673_v55  ;;  %v1694_v4 = vmul.f32 %v3620_v61, %v1693_v39 }
0x10b3   :  { %v1688_v42 = vsel %vm1687_vm3, %v1673_v55, %v1686_v30  ;;  %v1695_v20 = vmul.f32 0.5, %v1694_v4 }
0x10b4   :  { %v1691_v44 = vsel %vm1689_vm4, %v1690_v40, %v1688_v42 }
0x10b5   :  { %v1704_v13 = vadd.f32 1e-06, %v1691_v44  ;;  %v1696_v21 = vsub.f32 1.5, %v1695_v20 }
0x10b7   :  { %3621 = vrcp.f32 %v1704_v13  ;;  %v1697_v50 = vmul.f32 %v3620_v61, %v1696_v21  ;;  %v1717_v60 = vand.u32 2147483648, %v1704_v13  ;;  %vm1711_vm8 = vweird.f32 %v1704_v13 }
0x10b8   :  { %v1715_v62 = vand.u32 2147483647, %v1704_v13 }
0x10b9   :  { %v1698_v46 = vmul.f32 %v1697_v50, %v1674_v33  ;;  %v1718_v6 = vor.u32 1.1754944e-38, %v1717_v60 }
0x10ba   :  { %vm1716_vm10 = vcmp.eq.f32.partialorder %v1715_v62, 8.507059e+37  ;;  %v4642_v62 = vld [vmem:[%s5000_s0 + $0x8] sm:$0xff] }
0x10bb   :  { %v1700_v24 = vsel %vm1699_vm5, %v1674_v33, %v1698_v46 }
0x10bc   :  { %v1703_v49 = vsel %vm1701_vm6, %v1702_v47, %v1700_v24 }
0x10bd   :  { %v3622_v45 = vpop.eup %3621  ;;  %v1705_v48 = vadd.f32 1e-06, %v1703_v49 }
0x10be   :  { %v1707_v51 = vmul.f32 %v3622_v45, %v1704_v13  ;;  %vm1712_vm7 = vweird.f32 %v3622_v45 }
0x10bf   :  { %3623 = vrcp.f32 %v1705_v48  ;;  %vm1713_vm9 = vmor %vm1711_vm8, %vm1712_vm7  ;;  %v1732_v7 = vand.u32 2147483648, %v1705_v48  ;;  %v1730_v9 = vand.u32 2147483647, %v1705_v48  ;;  %vm1726_vm12 = vweird.f32 %v1705_v48 }
0x10c0   :  { %v1708_v52 = vsub.f32 1.0, %v1707_v51 }
0x10c1   :  { %v1733_v16 = vor.u32 1.1754944e-38, %v1732_v7  ;;  %vm1731_vm3 = vcmp.eq.f32.partialorder %v1730_v9, 8.507059e+37 }
0x10c2   :  { %v1709_v54 = vmul.f32 %v3622_v45, %v1708_v52  ;;  %v4635_v52 = vld [vmem:[%s5000_s0] sm:$0xff] }
0x10c4   :  { %v1710_v56 = vadd.f32 %v3622_v45, %v1709_v54 }
0x10c5   :  { %v3624_v57 = vpop.eup %3623 }
0x10c6   :  { %v1722_v63 = vmul.f32 %v3624_v57, %v1705_v48  ;;  %v1714_v3 = vsel %vm1713_vm9, %v3622_v45, %v1710_v56  ;;  %vm1727_vm11 = vweird.f32 %v3624_v57 }
0x10c7   :  { %v1719_v11 = vsel %vm1716_vm10, %v1718_v6, %v1714_v3  ;;  %vm1728_vm13 = vmor %vm1726_vm12, %vm1727_vm11 }
0x10c8   :  { %v1723_v5 = vsub.f32 1.0, %v1722_v63  ;;  %v1720_v19 = vmul.f32 %v1719_v11, %v1678_v14 }
0x10ca   :  { %v1724_v8 = vmul.f32 %v3624_v57, %v1723_v5  ;;  %v1739_v23 = vadd.f32 %v3510_v43, %v1720_v19 }
0x10cc   :  { %v1725_v15 = vadd.f32 %v3624_v57, %v1724_v8 }
0x10ce   :  { %v1729_v22 = vsel %vm1728_vm13, %v3624_v57, %v1725_v15 }
0x10cf   :  { %v1734_v58 = vsel %vm1731_vm3, %v1733_v16, %v1729_v22  ;;  %v3328_v22 = vld [vmem:[%s5001_s2 + $0x10] sm:$0xf] }
0x10d0   :  { %v1735_v53 = vmul.f32 %v1734_v58, %v1679_v17 }
0x10d2   :  { %v1740_v55 = vadd.f32 %v3510_v43, %v1735_v53  ;;  %v2040_v43 = vsel %vm623_vm1, %v3328_v22, 0 }
0x10d4   :  { %v1741_v25 = vpack.c.bf16 %v1740_v55, %v1739_v23 }
0x10d6   :  { %3298 = vmatmul.msk.bf16.vlgmr.msra.gmra.mxu0 %vm256_vm0, %v1741_v25  ;;  %3311 = vmatmul.msk.bf16.vlgmr.msra.gmra.mxu1 %vm256_vm0, %v1741_v25 }
0x10d7   :  { %3325 = vmatmul.msk.bf16.vlgmr.msra.gmra.mxu2 %vm256_vm0, %v1741_v25 }
0x1153   :  { %v1776_v38 = vpop.f32.mrf.mxu0  ;;  %v1812_v18 = vpop.f32.mrf.mxu1 }
0x1154   :  { %v1813_v0 = vadd.f32 %v3512_v59, %v1812_v18  ;;  %v1777_v61 = vadd.f32 %v3511_v32, %v1776_v38 }
0x1156   :  { %v1855_v33 = vpack.c.bf16 %v1813_v0, %v1813_v0  ;;  %v1853_v44 = vpack.c.bf16 %v1777_v61, %v1777_v61 }
0x1158   :  { %v1866_v37 = vunpack.c.l.b16 %v1855_v33  ;;  %v1861_v24 = vunpack.c.l.b16 %v1853_v44 }
0x115a   :  { %v1848_v27 = vpop.f32.mrf.mxu2 }
0x115b   :  { %v1778_v29 = vpop.f32.mrf.mxu0  ;;  %v1814_v31 = vpop.f32.mrf.mxu1  ;;  %v1849_v36 = vadd.f32 %v3513_v28, %v1848_v27 }
0x115c   :  { %v1815_v34 = vadd.f32 %v3512_v59, %v1814_v31  ;;  %v1779_v35 = vadd.f32 %v3511_v32, %v1778_v29 }
0x115d   :  { %v1857_v42 = vpack.c.bf16 %v1849_v36, %v1849_v36 }
0x115e   :  { %v1856_v26 = vpack.c.bf16 %v1815_v34, %v1815_v34  ;;  %v1854_v30 = vpack.c.bf16 %v1779_v35, %v1779_v35 }
0x115f   :  { %v1918_v46 = vunpack.c.l.b16 %v1857_v42 }
0x1160   :  { %v1867_v39 = vunpack.c.l.b16 %v1856_v26  ;;  %v1862_v50 = vunpack.c.l.b16 %v1854_v30 }
0x1162   :  { %v1868_v4 = vpack.c.b16 %v1867_v39, %v1866_v37  ;;  %v1850_v40 = vpop.f32.mrf.mxu2  ;;  %v1863_v45 = vpack.c.b16 %v1862_v50, %v1861_v24 }
0x1163   :  { %v1851_v20 = vadd.f32 %v3513_v28, %v1850_v40 }
0x1164   :  { %v1873_v13 = vsel %vm472_vm14, %v1868_v4, 0 }
0x1165   :  { %v1858_v21 = vpack.c.bf16 %v1851_v20, %v1851_v20  ;;  %1882 = vmatpush.bf16.xpose.msra.mxu3 %v1873_v13 }
0x1167   :  { %v1919_v47 = vunpack.c.l.b16 %v1858_v21 }
0x1169   :  { %v4628_v49 = vpack.c.b16 %v1919_v47, %v1918_v46 }
0x116b   :  { %1932 = vmatpush.bf16.msrb.mxu0 %v4628_v49 }
0x116c   :  { %3326 = vmatmul.msk.bf16.vlgmr.msra.gmra.mxu3 %vm472_vm14, %v1863_v45 }
0x116f   :  { %2049 = vmatpush.bf16.msra.mxu0 %v2040_v43 }
0x11ef   :  { %v1884_v48 = vpop.f32.mrf.mxu3 }
0x11f0   :  { %v1889_v51 = vmul.f32 0.35355338, %v1884_v48 }
0x11f2   :  { %v1891_v54 = vadd.f32 %v4635_v52, %v1889_v51 }
0x11f4   :  { %v1893_v56 = vsel %vm497_vm15, %v1891_v54, -inf }
0x11f5   :  { %1894 = vmax.xlane.f32.xlu0 %v1893_v56 }
0x11f7   :  { %v1886_v57 = vpop.f32.mrf.mxu3 }
0x11f8   :  { %v1890_v60 = vmul.f32 0.35355338, %v1886_v57 }
0x11fa   :  { %v1892_v63 = vadd.f32 %v4642_v62, %v1890_v60 }
0x11fc   :  { %v1896_v2 = vsel %vm497_vm15, %v1892_v63, -inf }
0x11fd   :  { %1897 = vmax.xlane.f32.xlu1 %v1896_v2 }
0x1216   :  { %1944 = vrot.lane.b32.xlu1 %v1868_v4, %s4012_s9 }
0x121e   :  { %2152 = vrot.lane.b32.xlu1 %v1863_v45, %s4014_s23 }
0x1268   :  { %v1895_v3 = vpop.xlane.xlu0 %1894 }
0x1269   :  { %v1899_v5 = vsub.f32 %v1891_v54, %v1895_v3 }
0x126b   :  { %v1901_v6 = vmul.f32 1.442695, %v1899_v5 }
0x126d   :  { %3625 = vpow2.f32 %v1901_v6 }
0x1270   :  { %v1898_v7 = vpop.xlane.xlu1 %1897 }
0x1271   :  { %v1900_v8 = vsub.f32 %v1892_v63, %v1898_v7 }
0x1273   :  { %v3626_v9 = vpop.eup %3625  ;;  %v1903_v11 = vmul.f32 1.442695, %v1900_v8 }
0x1274   :  { %v1905_v14 = vsel %vm497_vm15, %v3626_v9, 0.0 }
0x1275   :  { %3627 = vpow2.f32 %v1903_v11  ;;  %1906 = vadd.xlane.f32.xlu2 %v1905_v14 }
0x127b   :  { %v3628_v15 = vpop.eup %3627 }
0x127c   :  { %v1908_v16 = vsel %vm497_vm15, %v3628_v15, 0.0 }
0x127d   :  { %1909 = vadd.xlane.f32.xlu0 %v1908_v16 }
0x1288   :  { %v1945_v17 = vpop.permute.xlu1 %1944 }
0x1289   :  { %v1950_v19 = vsel %vm472_vm14, %v1945_v17, 0 }
0x128a   :  { %1959 = vmatpush.bf16.xpose.msrb.mxu1 %v1950_v19 }
0x128d   :  { %1942 = vrot.lane.b32.xlu2 %v1863_v45, %s4012_s9 }
0x1290   :  { %v2153_v50 = vpop.permute.xlu1 %2152 }
0x1291   :  { %2058 = vrot.lane.b32.xlu0 %v1868_v4, %s4013_s12 }
0x1295   :  { %2154 = vrot.lane.b32.xlu2 %v1868_v4, %s4014_s23 }
0x1299   :  { %2056 = vrot.lane.b32.xlu0 %v1863_v45, %s4013_s12 }
0x12e8   :  { %v1907_v58 = vpop.xlane.xlu2 %1906 }
0x12e9   :  { %3629 = vrcp.f32 %v1907_v58 }
0x12ef   :  { %v3630_v55 = vpop.eup %3629 }
0x12f0   :  { %v1943_v53 = vpop.permute.xlu2 %1942  ;;  %v1910_v23 = vpop.xlane.xlu0 %1909  ;;  %v1913_v38 = vmul.f32 %v3630_v55, %v3626_v9 }
0x12f1   :  { %3631 = vrcp.f32 %v1910_v23  ;;  %3329 = vmatmul.msk.bf16.vlgmr.msrb.gmra.mxu1 %vm472_vm14, %v1943_v53 }
0x12f7   :  { %v3632_v25 = vpop.eup %3631 }
0x12f8   :  { %v1914_v18 = vmul.f32 %v3632_v25, %v3628_v15  ;;  %v2155_v59 = vpop.permute.xlu2 %2154 }
0x12f9   :  { %v2160_v27 = vsel %vm472_vm14, %v2155_v59, 0 }
0x12fa   :  { %v1915_v0 = vpack.c.bf16 %v1914_v18, %v1913_v38 }
0x12fc   :  { %3327 = vmatmul.msk.bf16.vlgmr.msrb.gmra.mxu0 %vm497_vm15, %v1915_v0 }
0x12fd   :  { %2169 = vmatpush.bf16.xpose.msrb.mxu0 %v2160_v27 }
0x1303   :  { %v2059_v28 = vpop.permute.xlu0 %2058 }
0x1304   :  { %v2064_v29 = vsel %vm472_vm14, %v2059_v28, 0 }
0x1305   :  { %2073 = vmatpush.bf16.xpose.msra.mxu1 %v2064_v29 }
0x130b   :  { %v2057_v31 = vpop.permute.xlu0 %2056 }
0x130c   :  { %3334 = vmatmul.msk.bf16.vlgmr.msra.gmra.mxu1 %vm472_vm14, %v2057_v31 }
0x136e   :  { %v1961_v32 = vpop.f32.mrf.mxu1 }
0x136f   :  { %v1966_v33 = vmul.f32 0.35355338, %v1961_v32 }
0x1371   :  { %v1968_v34 = vadd.f32 %v4635_v52, %v1966_v33 }
0x1373   :  { %v1970_v35 = vsel %vm497_vm15, %v1968_v34, -inf }
0x1374   :  { %1971 = vmax.xlane.f32.xlu0 %v1970_v35 }
0x1376   :  { %v1963_v26 = vpop.f32.mrf.mxu1 }
0x1377   :  { %v1967_v36 = vmul.f32 0.35355338, %v1963_v26 }
0x1379   :  { %v1934_v61 = vpop.f32.mrf.mxu0  ;;  %v1969_v37 = vadd.f32 %v4642_v62, %v1967_v36 }
0x137b   :  { %v1973_v39 = vsel %vm497_vm15, %v1969_v37, -inf }
0x137c   :  { %1974 = vmax.xlane.f32.xlu2 %v1973_v39 }
0x1381   :  { %v1936_v30 = vpop.f32.mrf.mxu0 }
0x1382   :  { %v1939_v4 = vpack.c.bf16 %v1936_v30, %v1934_v61 }
0x1384   :  { %3333 = vmatmul.msk.bf16.vlgmr.msra.gmra.mxu0 %vm472_vm14, %v1939_v4 }
0x1389   :  { %v2075_v40 = vpop.f32.mrf.mxu1 }
0x138a   :  { %v2080_v42 = vmul.f32 0.35355338, %v2075_v40 }
0x138c   :  { %v2082_v20 = vadd.f32 %v4635_v52, %v2080_v42 }
0x138e   :  { %v2084_v44 = vsel %vm497_vm15, %v2082_v20, -inf }
0x138f   :  { %2085 = vmax.xlane.f32.xlu1 %v2084_v44 }
0x1391   :  { %v2077_v13 = vpop.f32.mrf.mxu1 }
0x1392   :  { %v2081_v21 = vmul.f32 0.35355338, %v2077_v13 }
0x1394   :  { %3338 = vmatmul.msk.bf16.vlgmr.msrb.gmra.mxu0 %vm472_vm14, %v2153_v50  ;;  %v2083_v46 = vadd.f32 %v4642_v62, %v2081_v21 }
0x1396   :  { %v2087_v47 = vsel %vm497_vm15, %v2083_v46, -inf }
0x1397   :  { %2088 = vmax.xlane.f32.xlu2 %v2087_v47 }
0x13e7   :  { %v1972_v24 = vpop.xlane.xlu0 %1971 }
0x13e8   :  { %v1976_v45 = vsub.f32 %v1968_v34, %v1972_v24 }
0x13ea   :  { %v1978_v48 = vmul.f32 1.442695, %v1976_v45 }
0x13ec   :  { %3633 = vpow2.f32 %v1978_v48 }
0x13ef   :  { %v1975_v3 = vpop.xlane.xlu2 %1974 }
0x13f0   :  { %v1977_v6 = vsub.f32 %v1969_v37, %v1975_v3 }
0x13f2   :  { %v3634_v51 = vpop.eup %3633  ;;  %v1980_v8 = vmul.f32 1.442695, %v1977_v6 }
0x13f3   :  { %v1982_v54 = vsel %vm497_vm15, %v3634_v51, 0.0 }
0x13f4   :  { %1983 = vadd.xlane.f32.xlu2 %v1982_v54 }
0x1401   :  { %v4675_v56 = vpop.f32.mrf.mxu0 }
0x1402   :  { %v2086_v57 = vpop.xlane.xlu1 %2085 }
0x1403   :  { %v2090_v60 = vsub.f32 %v2082_v20, %v2086_v57 }
0x1405   :  { %v2092_v63 = vmul.f32 1.442695, %v2090_v60 }
0x1407   :  { %3635 = vpow2.f32 %v2092_v63 }
0x1408   :  { %3637 = vpow2.f32 %v1980_v8 }
0x1409   :  { %v4677_v2 = vpop.f32.mrf.mxu0 }
0x140a   :  { %v2089_v11 = vpop.xlane.xlu2 %2088 }
0x140b   :  { %v2091_v16 = vsub.f32 %v2083_v46, %v2089_v11 }
0x140d   :  { %v4679_v5 = vpop.eup %3635  ;;  %v2094_v19 = vmul.f32 1.442695, %v2091_v16 }
0x140e   :  { %v2096_v7 = vsel %vm497_vm15, %v4679_v5, 0.0  ;;  %v3638_v58 = vpop.eup %3637 }
0x140f   :  { %2097 = vadd.xlane.f32.xlu2 %v2096_v7  ;;  %3639 = vpow2.f32 %v2094_v19  ;;  %v1985_v23 = vsel %vm497_vm15, %v3638_v58, 0.0  ;;  %v3340_v7 = vld [vmem:[%s5001_s2 + $0x1c] sm:$0xf] }
0x1410   :  { %v2230_v8 = vsel %vm623_vm1, %v3340_v7, 0 }
0x1411   :  { %v2171_v9 = vpop.f32.mrf.mxu0 }
0x1412   :  { %v2176_v14 = vmul.f32 0.35355338, %v2171_v9 }
0x1414   :  { %v2178_v15 = vadd.f32 %v4635_v52, %v2176_v14 }
0x1415   :  { %v3640_v25 = vpop.eup %3639 }
0x1416   :  { %v2180_v17 = vsel %vm497_vm15, %v2178_v15, -inf  ;;  %v2099_v52 = vsel %vm497_vm15, %v3640_v25, 0.0 }
0x1417   :  { %2181 = vmax.xlane.f32.xlu0 %v2180_v17 }
0x1419   :  { %v2173_v22 = vpop.f32.mrf.mxu0 }
0x141a   :  { %v2177_v43 = vmul.f32 0.35355338, %v2173_v22 }
0x141c   :  { %v2179_v53 = vadd.f32 %v4642_v62, %v2177_v43 }
0x141e   :  { %v2183_v55 = vsel %vm497_vm15, %v2179_v53, -inf }
0x141f   :  { %1986 = vadd.xlane.f32.xlu0 %v1985_v23  ;;  %2184 = vmax.xlane.f32.xlu1 %v2183_v55  ;;  %v3514_v23 = vld [vmem:[#allocation7 + $0x1] ss:$0 sm:$0xff] }
0x1427   :  { %2100 = vadd.xlane.f32.xlu0 %v2099_v52 }
0x1438   :  { %1993 = vrot.lane.b32.xlu1 %v4628_v49, %s4012_s9 }
0x1467   :  { %v1984_v33 = vpop.xlane.xlu2 %1983 }
0x1482   :  { %v2098_v30 = vpop.xlane.xlu2 %2097 }
0x148a   :  { %v2182_v38 = vpop.xlane.xlu0 %2181 }
0x148b   :  { %v2186_v18 = vsub.f32 %v2178_v15, %v2182_v38 }
0x148d   :  { %v2188_v59 = vmul.f32 1.442695, %v2186_v18 }
0x148f   :  { %3641 = vpow2.f32 %v2188_v59 }
0x1492   :  { %v2185_v0 = vpop.xlane.xlu1 %2184  ;;  %v1987_v31 = vpop.xlane.xlu0 %1986 }
0x1493   :  { %v2187_v62 = vsub.f32 %v2179_v53, %v2185_v0 }
0x1495   :  { %v3642_v27 = vpop.eup %3641  ;;  %v2190_v28 = vmul.f32 1.442695, %v2187_v62 }
0x1496   :  { %v2192_v29 = vsel %vm497_vm15, %v3642_v27, 0.0 }
0x1497   :  { %3643 = vpow2.f32 %v2190_v28  ;;  %2193 = vadd.xlane.f32.xlu2 %v2192_v29 }
0x1498   :  { %3645 = vrcp.f32 %v1987_v31 }
0x1499   :  { %3647 = vrcp.f32 %v1984_v33 }
0x149a   :  { %v2101_v4 = vpop.xlane.xlu0 %2100 }
0x149b   :  { %3649 = vrcp.f32 %v2101_v4  ;;  %v3461_v4 = vld [vmem:[%s5002_s21 + $0x18] sm:$0xff] }
0x149c   :  { %3651 = vrcp.f32 %v2098_v30  ;;  %v3463_v30 = vld [vmem:[%s4950_s13 + $0x18] sm:$0xff] }
0x149d   :  { %v3644_v32 = vpop.eup %3643  ;;  %2415 = vmatpush.bf16.msra.mxu0 %v3463_v30 }
0x149e   :  { %v2195_v34 = vsel %vm497_vm15, %v3644_v32, 0.0  ;;  %v3646_v35 = vpop.eup %3645 }
0x149f   :  { %2196 = vadd.xlane.f32.xlu0 %v2195_v34  ;;  %v3648_v26 = vpop.eup %3647  ;;  %v1991_v36 = vmul.f32 %v3646_v35, %v3638_v58 }
0x14a0   :  { %v1990_v61 = vmul.f32 %v3648_v26, %v3634_v51 }
0x14a1   :  { %v3650_v42 = vpop.eup %3649 }
0x14a2   :  { %v1992_v39 = vpack.c.bf16 %v1991_v36, %v1990_v61  ;;  %v3652_v20 = vpop.eup %3651  ;;  %v2105_v44 = vmul.f32 %v3650_v42, %v3640_v25  ;;  %v3460_v42 = vld [vmem:[%s5002_s21 + $0x10] sm:$0xff] }
0x14a3   :  { %v2104_v13 = vmul.f32 %v3652_v20, %v4679_v5  ;;  %v3336_v5 = vld [vmem:[%s5001_s2 + $0x18] sm:$0xf] }
0x14a4   :  { %v2134_v6 = vsel %vm623_vm1, %v3336_v5, 0 }
0x14a5   :  { %v2106_v50 = vpack.c.bf16 %v2105_v44, %v2104_v13 }
0x14aa   :  { %v1994_v37 = vpop.permute.xlu1 %1993 }
0x14ab   :  { %2006 = vmatpush.bf16.msrb.mxu2 %v1994_v37 }
0x14ae   :  { %3330 = vmatmul.msk.bf16.vlgmr.msrb.gmra.mxu2 %vm497_vm15, %v1992_v39 }
0x14af   :  { %2107 = vrot.lane.b32.xlu2 %v4628_v49, %s4013_s12 }
0x14b3   :  { %2203 = vrot.lane.b32.xlu0 %v4628_v49, %s4014_s23  ;;  %v3331_v49 = vld [vmem:[%s5001_s2 + $0x14] sm:$0xf]  ;;  %s5005_s2 = smov 128  }
0x14b4   :  { %v2020_v47 = vsel %vm623_vm1, %v3331_v49, 0 }
0x14b5   :  { %2029 = vmatpush.bf16.msrb.mxu3 %v2020_v47 }
0x14b9   :  { %2143 = vmatpush.bf16.msra.mxu3 %v2134_v6 }
0x150a   :  { %v2194_v40 = vpop.xlane.xlu2 %2193 }
0x1512   :  { %v2108_v21 = vpop.permute.xlu2 %2107  ;;  %v2197_v46 = vpop.xlane.xlu0 %2196 }
0x1513   :  { %2120 = vmatpush.bf16.msra.mxu2 %v2108_v21  ;;  %3653 = vrcp.f32 %v2197_v46 }
0x1514   :  { %3655 = vrcp.f32 %v2194_v40  ;;  %v3462_v40 = vld [vmem:[%s4950_s13 + $0x10] sm:$0xff] }
0x1515   :  { %2416 = vmatpush.bf16.msra.mxu0 %v3462_v40 }
0x1516   :  { %3335 = vmatmul.msk.bf16.vlgmr.msra.gmra.mxu2 %vm497_vm15, %v2106_v50 }
0x1517   :  { %2239 = vmatpush.bf16.msrb.mxu2 %v2230_v8 }
0x1518   :  { %3370 = vmatmul.msk.bf16.vlgmr.msra.gmra.mxu0 %vm256_vm0, %v4407_v41 }
0x1519   :  { %v3654_v24 = vpop.eup %3653 }
0x151a   :  { %v3656_v45 = vpop.eup %3655  ;;  %v2201_v48 = vmul.f32 %v3654_v24, %v3644_v32 }
0x151b   :  { %v2200_v51 = vmul.f32 %v3656_v45, %v3642_v27 }
0x151d   :  { %v2202_v57 = vpack.c.bf16 %v2201_v48, %v2200_v51 }
0x1525   :  { %v2204_v54 = vpop.permute.xlu0 %2203 }
0x1526   :  { %2216 = vmatpush.bf16.msrb.mxu1 %v2204_v54 }
0x1529   :  { %3339 = vmatmul.msk.bf16.vlgmr.msrb.gmra.mxu1 %vm497_vm15, %v2202_v57 }
0x1531   :  { %v2008_v60 = vpop.f32.mrf.mxu2 }
0x1539   :  { %v2010_v63 = vpop.f32.mrf.mxu2 }
0x153a   :  { %v2013_v3 = vpack.c.bf16 %v2010_v63, %v2008_v60 }
0x153c   :  { %3332 = vmatmul.msk.bf16.vlgmr.msrb.gmra.mxu3 %vm472_vm14, %v2013_v3 }
0x153d   :  { %2379 = vmatpush.bf16.msrb.mxu3 %v3461_v4 }
0x1541   :  { %2380 = vmatpush.bf16.msrb.mxu3 %v3460_v42 }
0x1599   :  { %v2122_v9 = vpop.f32.mrf.mxu2 }
0x15a1   :  { %v2124_v11 = vpop.f32.mrf.mxu2 }
0x15a2   :  { %v2127_v14 = vpack.c.bf16 %v2124_v11, %v2122_v9 }
0x15a4   :  { %3337 = vmatmul.msk.bf16.vlgmr.msra.gmra.mxu3 %vm472_vm14, %v2127_v14 }
0x15a6   :  { %v2218_v15 = vpop.f32.mrf.mxu1 }
0x15ae   :  { %v2220_v16 = vpop.f32.mrf.mxu1 }
0x15af   :  { %v2223_v17 = vpack.c.bf16 %v2220_v16, %v2218_v15 }
0x15b1   :  { %3341 = vmatmul.msk.bf16.vlgmr.msrb.gmra.mxu2 %vm472_vm14, %v2223_v17 }
0x15bf   :  { %v2031_v19 = vpop.f32.mrf.mxu3 }
0x15c0   :  { %v2052_v58 = vadd.f32 %v4675_v56, %v2031_v19 }
0x15c7   :  { %v2033_v22 = vpop.f32.mrf.mxu3 }
0x15c8   :  { %v2054_v18 = vadd.f32 %v4677_v2, %v2033_v22 }
0x1627   :  { %v2145_v43 = vpop.f32.mrf.mxu3 }
0x1628   :  { %v2150_v53 = vadd.f32 %v2145_v43, %v2052_v58 }
0x162f   :  { %v2147_v38 = vpop.f32.mrf.mxu3 }
0x1630   :  { %v2151_v0 = vadd.f32 %v2147_v38, %v2054_v18 }
0x1634   :  { %v2241_v55 = vpop.f32.mrf.mxu2 }
0x1635   :  { %v2246_v25 = vadd.f32 %v2241_v55, %v2150_v53  ;;  %v3515_v55 = vld [vmem:[%s4961_s24 + $0x4] ss:$0 sm:$0xff] }
0x1637   :  { %v2253_v52 = vadd.f32 %v3514_v23, %v2246_v25 }
0x1639   :  { %v4719_v59 = vadd.f32 %v2253_v52, %v4569_v1 }
0x163b   :  { %v2261_v62 = vsel %vm256_vm0, %v4719_v59, 0.0 }
0x163c   :  { %v2243_v27 = vpop.f32.mrf.mxu2  ;;  %2262 = vadd.xlane.f32.xlu1 %v2261_v62 }
0x163d   :  { %v2247_v28 = vadd.f32 %v2243_v27, %v2151_v0 }
0x163f   :  { %v2254_v29 = vadd.f32 %v3514_v23, %v2247_v28 }
0x1641   :  { %v4724_v56 = vadd.f32 %v2254_v29, %v4574_v12 }
0x1643   :  { %v2264_v31 = vsel %vm256_vm0, %v4724_v56, 0.0 }
0x1644   :  { %2265 = vadd.xlane.f32.xlu0 %v2264_v31 }
0x16af   :  { %v2263_v32 = vpop.xlane.xlu1 %2262 }
0x16b0   :  { %v2267_v2 = vmul.f32 %v2263_v32, %v4229_v10 }
0x16b2   :  { %v4730_v1 = vsub.f32 %v4719_v59, %v2267_v2 }
0x16b4   :  { %v2271_v33 = vmul.f32 %v4730_v1, %v4730_v1  ;;  %v2284_v28 = vmul.f32 %v3515_v55, %v4730_v1  ;;  %v2418_v1 = vpop.f32.mrf.mxu0 }
0x16b6   :  { %v2273_v34 = vsel %vm256_vm0, %v2271_v33, 0.0 }
0x16b7   :  { %2274 = vadd.xlane.f32.xlu2 %v2273_v34  ;;  %v2266_v35 = vpop.xlane.xlu0 %2265  ;;  %v3516_v34 = vld [vmem:[%s4962_s25 + $0x4] ss:$0 sm:$0xff] }
0x16b8   :  { %v2268_v12 = vmul.f32 %v2266_v35, %v4229_v10 }
0x16ba   :  { %v4737_v26 = vsub.f32 %v4724_v56, %v2268_v12 }
0x16bc   :  { %v2272_v36 = vmul.f32 %v4737_v26, %v4737_v26  ;;  %v2285_v32 = vmul.f32 %v3515_v55, %v4737_v26  ;;  %v2420_v4 = vpop.f32.mrf.mxu0 }
0x16be   :  { %v2276_v61 = vsel %vm256_vm0, %v2272_v36, 0.0 }
0x16bf   :  { %2277 = vadd.xlane.f32.xlu1 %v2276_v61 }
0x172a   :  { %v2275_v37 = vpop.xlane.xlu2 %2274 }
0x172b   :  { %v2279_v39 = vmul.f32 0.032258064, %v2275_v37 }
0x172d   :  { %3657 = vrsqrt.f32 %v2279_v39  ;;  %vm2293_vm4 = vcmp.eq.f32.partialorder %v2279_v39, inf  ;;  %v2296_v54 = vand.u32 2147483648, %v2279_v39  ;;  %vm2295_vm5 = vcmp.eq.f32.partialorder %v2279_v39, 0.0 }
0x1732   :  { %v2278_v20 = vpop.xlane.xlu1 %2277 }
0x1733   :  { %v3658_v44 = vpop.eup %3657  ;;  %v2280_v13 = vmul.f32 0.032258064, %v2278_v20 }
0x1734   :  { %v2287_v21 = vmul.f32 %v3658_v44, %v2279_v39 }
0x1735   :  { %3659 = vrsqrt.f32 %v2280_v13  ;;  %vm2305_vm6 = vcmp.eq.f32.partialorder %v2280_v13, inf  ;;  %v2308_v8 = vand.u32 2147483648, %v2280_v13  ;;  %vm2307_vm7 = vcmp.eq.f32.partialorder %v2280_v13, 0.0 }
0x1736   :  { %v2288_v50 = vmul.f32 %v3658_v44, %v2287_v21 }
0x1738   :  { %v2289_v46 = vmul.f32 0.5, %v2288_v50 }
0x173a   :  { %v2290_v49 = vsub.f32 1.5, %v2289_v46  ;;  %v3518_v46 = vld [vmem:[%s4953_s16 + $0x1] ss:$0 sm:$0xff] }
0x173b   :  { %v3660_v47 = vpop.eup %3659 }
0x173c   :  { %v2291_v24 = vmul.f32 %v3658_v44, %v2290_v49  ;;  %v2299_v45 = vmul.f32 %v3660_v47, %v2280_v13 }
0x173e   :  { %v2292_v48 = vmul.f32 %v2291_v24, %v2279_v39  ;;  %v2300_v51 = vmul.f32 %v3660_v47, %v2299_v45 }
0x1740   :  { %v2294_v57 = vsel %vm2293_vm4, %v2279_v39, %v2292_v48  ;;  %v2301_v60 = vmul.f32 0.5, %v2300_v51  ;;  %v3517_v39 = vld [vmem:[#allocation8 + $0x1] ss:$0 sm:$0xff] }
0x1741   :  { %v2297_v63 = vsel %vm2295_vm5, %v2296_v54, %v2294_v57  ;;  %v2419_v30 = vadd.f32 %v3517_v39, %v2418_v1  ;;  %v2421_v40 = vadd.f32 %v3517_v39, %v2420_v4 }
0x1742   :  { %v2310_v3 = vadd.f32 1e-06, %v2297_v63  ;;  %v2302_v5 = vsub.f32 1.5, %v2301_v60 }
0x1743   :  { %v2461_v26 = vpack.c.bf16 %v2419_v30, %v2419_v30  ;;  %v2462_v42 = vpack.c.bf16 %v2421_v40, %v2421_v40 }
0x1744   :  { %3661 = vrcp.f32 %v2310_v3  ;;  %v2303_v6 = vmul.f32 %v3660_v47, %v2302_v5  ;;  %v2323_v58 = vand.u32 2147483648, %v2310_v3  ;;  %vm2317_vm9 = vweird.f32 %v2310_v3 }
0x1745   :  { %v2321_v53 = vand.u32 2147483647, %v2310_v3  ;;  %v2472_v20 = vunpack.c.l.b16 %v2461_v26  ;;  %v2473_v44 = vunpack.c.l.b16 %v2462_v42 }
0x1746   :  { %v2304_v7 = vmul.f32 %v2303_v6, %v2280_v13  ;;  %v2324_v38 = vor.u32 1.1754944e-38, %v2323_v58 }
0x1747   :  { %vm2322_vm11 = vcmp.eq.f32.partialorder %v2321_v53, 8.507059e+37 }
0x1748   :  { %v2306_v9 = vsel %vm2305_vm6, %v2280_v13, %v2304_v7  ;;  %v2474_v13 = vpack.c.b16 %v2473_v44, %v2472_v20 }
0x1749   :  { %v2309_v11 = vsel %vm2307_vm7, %v2308_v8, %v2306_v9  ;;  %v4780_v9 = vld [vmem:[%s5003_s30 + $0x8] sm:$0xff] }
0x174a   :  { %v3662_v14 = vpop.eup %3661  ;;  %v2311_v15 = vadd.f32 1e-06, %v2309_v11  ;;  %v2479_v21 = vsel %vm472_vm14, %v2474_v13, 0 }
0x174b   :  { %v2313_v16 = vmul.f32 %v3662_v14, %v2310_v3  ;;  %vm2318_vm8 = vweird.f32 %v3662_v14  ;;  %2488 = vmatpush.bf16.xpose.msra.mxu2 %v2479_v21  ;;  %v4773_v3 = vld [vmem:[%s5003_s30] sm:$0xff] }
0x174c   :  { %3663 = vrcp.f32 %v2311_v15  ;;  %vm2319_vm10 = vmor %vm2317_vm9, %vm2318_vm8  ;;  %v2338_v18 = vand.u32 2147483648, %v2311_v15  ;;  %v2336_v62 = vand.u32 2147483647, %v2311_v15  ;;  %vm2332_vm13 = vweird.f32 %v2311_v15 }
0x174d   :  { %v2314_v17 = vsub.f32 1.0, %v2313_v16  ;;  %v3464_v16 = vld [vmem:[%s4951_s14 + $0x10] sm:$0xff] }
0x174e   :  { %v2339_v31 = vor.u32 1.1754944e-38, %v2338_v18  ;;  %vm2337_vm4 = vcmp.eq.f32.partialorder %v2336_v62, 8.507059e+37 }
0x174f   :  { %v2315_v19 = vmul.f32 %v3662_v14, %v2314_v17 }
0x1751   :  { %v2316_v22 = vadd.f32 %v3662_v14, %v2315_v19 }
0x1752   :  { %v3664_v43 = vpop.eup %3663 }
0x1753   :  { %v2328_v23 = vmul.f32 %v3664_v43, %v2311_v15  ;;  %v2320_v25 = vsel %vm2319_vm10, %v3662_v14, %v2316_v22  ;;  %vm2333_vm12 = vweird.f32 %v3664_v43  ;;  %v3465_v15 = vld [vmem:[%s4951_s14 + $0x18] sm:$0xff] }
0x1754   :  { %v2325_v27 = vsel %vm2322_vm11, %v2324_v38, %v2320_v25  ;;  %vm2334_vm3 = vmor %vm2332_vm13, %vm2333_vm12  ;;  %2451 = vmatpush.bf16.msra.mxu1 %v3465_v15 }
0x1755   :  { %v2329_v52 = vsub.f32 1.0, %v2328_v23  ;;  %v2326_v2 = vmul.f32 %v2325_v27, %v2284_v28 }
0x1757   :  { %v2330_v0 = vmul.f32 %v3664_v43, %v2329_v52  ;;  %v2345_v36 = vadd.f32 %v3516_v34, %v2326_v2 }
0x1758   :  { %2452 = vmatpush.bf16.msra.mxu1 %v3464_v16 }
0x1759   :  { %v2331_v29 = vadd.f32 %v3664_v43, %v2330_v0 }
0x175b   :  { %v2335_v33 = vsel %vm2334_vm3, %v3664_v43, %v2331_v29  ;;  %3383 = vmatmul.msk.bf16.vlgmr.msra.gmra.mxu1 %vm256_vm0, %v4407_v41  ;;  %v3519_v41 = vld [vmem:[#allocation10 + $0x1] ss:$0 sm:$0xff] }
0x175c   :  { %v2340_v35 = vsel %vm2337_vm4, %v2339_v31, %v2335_v33 }
0x175d   :  { %v2341_v12 = vmul.f32 %v2340_v35, %v2285_v32 }
0x175f   :  { %v2346_v61 = vadd.f32 %v3516_v34, %v2341_v12  ;;  %v3386_v34 = vld [vmem:[%s4952_s15 + $0x10] sm:$0xf] }
0x1760   :  { %v2646_v35 = vsel %vm623_vm1, %v3386_v34, 0 }
0x1761   :  { %v2347_v37 = vpack.c.bf16 %v2346_v61, %v2345_v36 }
0x1763   :  { %3357 = vmatmul.msk.bf16.vlgmr.msrb.gmra.mxu3 %vm256_vm0, %v2347_v37 }
0x17d8   :  { %v2454_v38 = vpop.f32.mrf.mxu1 }
0x17d9   :  { %v2455_v18 = vadd.f32 %v3519_v41, %v2454_v38 }
0x17db   :  { %v2463_v27 = vpack.c.bf16 %v2455_v18, %v2455_v18 }
0x17dd   :  { %v2524_v31 = vunpack.c.l.b16 %v2463_v27 }
0x17e0   :  { %v2456_v28 = vpop.f32.mrf.mxu1 }
0x17e1   :  { %v2457_v29 = vadd.f32 %v3519_v41, %v2456_v28 }
0x17e3   :  { %v2464_v32 = vpack.c.bf16 %v2457_v29, %v2457_v29 }
0x17e5   :  { %v2525_v2 = vunpack.c.l.b16 %v2464_v32 }
0x17e6   :  { %v2382_v50 = vpop.f32.mrf.mxu3 }
0x17e7   :  { %v2383_v49 = vadd.f32 %v3518_v46, %v2382_v50  ;;  %v4799_v33 = vpack.c.b16 %v2525_v2, %v2524_v31 }
0x17e9   :  { %v2459_v24 = vpack.c.bf16 %v2383_v49, %v2383_v49  ;;  %2538 = vmatpush.bf16.msra.mxu3 %v4799_v33 }
0x17eb   :  { %v2467_v51 = vunpack.c.l.b16 %v2459_v24 }
0x17ed   :  { %2655 = vmatpush.bf16.msrb.mxu3 %v2646_v35 }
0x17ee   :  { %v2384_v47 = vpop.f32.mrf.mxu3 }
0x17ef   :  { %v2385_v45 = vadd.f32 %v3518_v46, %v2384_v47 }
0x17f1   :  { %v2460_v48 = vpack.c.bf16 %v2385_v45, %v2385_v45 }
0x17f3   :  { %v2468_v54 = vunpack.c.l.b16 %v2460_v48 }
0x17f5   :  { %v2469_v57 = vpack.c.b16 %v2468_v54, %v2467_v51 }
0x17f7   :  { %3384 = vmatmul.msk.bf16.vlgmr.msra.gmra.mxu2 %vm472_vm14, %v2469_v57 }
0x187a   :  { %v2490_v60 = vpop.f32.mrf.mxu2 }
0x187b   :  { %v2495_v63 = vmul.f32 0.35355338, %v2490_v60 }
0x187d   :  { %v2497_v5 = vadd.f32 %v4773_v3, %v2495_v63 }
0x187f   :  { %v2499_v6 = vsel %vm497_vm15, %v2497_v5, -inf }
0x1880   :  { %2500 = vmax.xlane.f32.xlu1 %v2499_v6 }
0x1882   :  { %v2492_v7 = vpop.f32.mrf.mxu2 }
0x1883   :  { %v2496_v8 = vmul.f32 0.35355338, %v2492_v7 }
0x1885   :  { %v2498_v11 = vadd.f32 %v4780_v9, %v2496_v8 }
0x1887   :  { %v2502_v14 = vsel %vm497_vm15, %v2498_v11, -inf }
0x1888   :  { %2503 = vmax.xlane.f32.xlu1 %v2502_v14 }
0x18a1   :  { %2550 = vrot.lane.b32.xlu1 %v2474_v13, %s4012_s9 }
0x18a9   :  { %2662 = vrot.lane.b32.xlu1 %v2469_v57, %s4013_s12 }
0x18f3   :  { %v2501_v17 = vpop.xlane.xlu1 %2500 }
0x18f4   :  { %v2505_v19 = vsub.f32 %v2497_v5, %v2501_v17 }
0x18f6   :  { %v2507_v22 = vmul.f32 1.442695, %v2505_v19 }
0x18f8   :  { %3665 = vpow2.f32 %v2507_v22 }
0x18fb   :  { %v2504_v43 = vpop.xlane.xlu1 %2503 }
0x18fc   :  { %v2506_v58 = vsub.f32 %v2498_v11, %v2504_v43 }
0x18fe   :  { %v3666_v53 = vpop.eup %3665  ;;  %v2509_v23 = vmul.f32 1.442695, %v2506_v58 }
0x18ff   :  { %v2511_v55 = vsel %vm497_vm15, %v3666_v53, 0.0 }
0x1900   :  { %3667 = vpow2.f32 %v2509_v23  ;;  %2512 = vadd.xlane.f32.xlu0 %v2511_v55 }
0x1906   :  { %v3668_v25 = vpop.eup %3667 }
0x1907   :  { %v2514_v52 = vsel %vm497_vm15, %v3668_v25, 0.0 }
0x1908   :  { %2515 = vadd.xlane.f32.xlu2 %v2514_v52 }
0x1913   :  { %v2551_v0 = vpop.permute.xlu1 %2550 }
0x1914   :  { %v2556_v62 = vsel %vm472_vm14, %v2551_v0, 0  ;;  %2548 = vrot.lane.b32.xlu0 %v2469_v57, %s4012_s9 }
0x1915   :  { %2565 = vmatpush.bf16.xpose.msrb.mxu0 %v2556_v62 }
0x191b   :  { %v2663_v44 = vpop.permute.xlu1 %2662 }
0x191c   :  { %2760 = vrot.lane.b32.xlu0 %v2474_v13, %s4014_s23 }
0x1920   :  { %2664 = vrot.lane.b32.xlu2 %v2474_v13, %s4013_s12 }
0x1928   :  { %2758 = vrot.lane.b32.xlu2 %v2469_v57, %s4014_s23 }
0x1973   :  { %v2513_v12 = vpop.xlane.xlu0 %2512 }
0x1974   :  { %3669 = vrcp.f32 %v2513_v12 }
0x197a   :  { %v3670_v61 = vpop.eup %3669 }
0x197b   :  { %v2516_v36 = vpop.xlane.xlu2 %2515  ;;  %v2519_v1 = vmul.f32 %v3670_v61, %v3666_v53 }
0x197c   :  { %3671 = vrcp.f32 %v2516_v36 }
0x1982   :  { %v3672_v37 = vpop.eup %3671 }
0x1983   :  { %v2520_v39 = vmul.f32 %v3672_v37, %v3668_v25  ;;  %v2665_v30 = vpop.permute.xlu2 %2664 }
0x1984   :  { %v2670_v4 = vsel %vm472_vm14, %v2665_v30, 0 }
0x1985   :  { %v2521_v40 = vpack.c.bf16 %v2520_v39, %v2519_v1  ;;  %2679 = vmatpush.bf16.xpose.msra.mxu0 %v2670_v4 }
0x1986   :  { %v2549_v26 = vpop.permute.xlu0 %2548 }
0x1987   :  { %3385 = vmatmul.msk.bf16.vlgmr.msra.gmra.mxu3 %vm497_vm15, %v2521_v40  ;;  %3387 = vmatmul.msk.bf16.vlgmr.msrb.gmra.mxu0 %vm472_vm14, %v2549_v26 }
0x198b   :  { %v2759_v14 = vpop.permute.xlu2 %2758 }
0x198e   :  { %v2761_v42 = vpop.permute.xlu0 %2760 }
0x198f   :  { %v2766_v20 = vsel %vm472_vm14, %v2761_v42, 0 }
0x1990   :  { %2775 = vmatpush.bf16.xpose.msra.mxu3 %v2766_v20 }
0x1997   :  { %3392 = vmatmul.msk.bf16.vlgmr.msra.gmra.mxu0 %vm472_vm14, %v2663_v44 }
0x1a04   :  { %v2567_v13 = vpop.f32.mrf.mxu0 }
0x1a05   :  { %v2572_v21 = vmul.f32 0.35355338, %v2567_v13 }
0x1a07   :  { %v2574_v50 = vadd.f32 %v4773_v3, %v2572_v21 }
0x1a09   :  { %v2576_v46 = vsel %vm497_vm15, %v2574_v50, -inf }
0x1a0a   :  { %v2540_v49 = vpop.f32.mrf.mxu3  ;;  %2577 = vmax.xlane.f32.xlu0 %v2576_v46 }
0x1a0c   :  { %v2569_v47 = vpop.f32.mrf.mxu0 }
0x1a0d   :  { %v2573_v24 = vmul.f32 0.35355338, %v2569_v47 }
0x1a0f   :  { %v2575_v45 = vadd.f32 %v4780_v9, %v2573_v24 }
0x1a11   :  { %v2579_v48 = vsel %vm497_vm15, %v2575_v45, -inf }
0x1a12   :  { %v2542_v51 = vpop.f32.mrf.mxu3  ;;  %2580 = vmax.xlane.f32.xlu1 %v2579_v48  ;;  %v3389_v48 = vld [vmem:[%s4952_s15 + $0x14] sm:$0xf] }
0x1a13   :  { %v2545_v54 = vpack.c.bf16 %v2542_v51, %v2540_v49  ;;  %v2626_v51 = vsel %vm623_vm1, %v3389_v48, 0  ;;  %v3466_v48 = vld [vmem:[#allocation13 + $0x10] sm:$0xff] }
0x1a14   :  { %v2681_v57 = vpop.f32.mrf.mxu0  ;;  %2635 = vmatpush.bf16.msrb.mxu2 %v2626_v51 }
0x1a15   :  { %v2686_v60 = vmul.f32 0.35355338, %v2681_v57  ;;  %3391 = vmatmul.msk.bf16.vlgmr.msrb.gmra.mxu3 %vm472_vm14, %v2545_v54 }
0x1a17   :  { %v2688_v63 = vadd.f32 %v4773_v3, %v2686_v60 }
0x1a19   :  { %v2690_v5 = vsel %vm497_vm15, %v2688_v63, -inf }
0x1a1a   :  { %2691 = vmax.xlane.f32.xlu2 %v2690_v5 }
0x1a1c   :  { %v2683_v6 = vpop.f32.mrf.mxu0 }
0x1a1d   :  { %v2687_v7 = vmul.f32 0.35355338, %v2683_v6 }
0x1a1f   :  { %v2689_v8 = vadd.f32 %v4780_v9, %v2687_v7 }
0x1a21   :  { %v2693_v11 = vsel %vm497_vm15, %v2689_v8, -inf }
0x1a22   :  { %2694 = vmax.xlane.f32.xlu0 %v2693_v11 }
0x1a25   :  { %3396 = vmatmul.msk.bf16.vlgmr.msra.gmra.mxu3 %vm472_vm14, %v2759_v14 }
0x1a7d   :  { %v2578_v15 = vpop.xlane.xlu0 %2577 }
0x1a7e   :  { %v2582_v16 = vsub.f32 %v2574_v50, %v2578_v15 }
0x1a80   :  { %v2584_v17 = vmul.f32 1.442695, %v2582_v16 }
0x1a82   :  { %3673 = vpow2.f32 %v2584_v17 }
0x1a85   :  { %v2581_v41 = vpop.xlane.xlu1 %2580 }
0x1a86   :  { %v2583_v38 = vsub.f32 %v2575_v45, %v2581_v41  ;;  %v3398_v41 = vld [vmem:[%s4952_s15 + $0x1c] sm:$0xf] }
0x1a88   :  { %v3674_v19 = vpop.eup %3673  ;;  %v2586_v18 = vmul.f32 1.442695, %v2583_v38  ;;  %v2836_v38 = vsel %vm623_vm1, %v3398_v41, 0 }
0x1a89   :  { %v2588_v22 = vsel %vm497_vm15, %v3674_v19, 0.0 }
0x1a8a   :  { %2589 = vadd.xlane.f32.xlu0 %v2588_v22 }
0x1a8d   :  { %v2692_v43 = vpop.xlane.xlu2 %2691 }
0x1a8e   :  { %v2696_v58 = vsub.f32 %v2688_v63, %v2692_v43 }
0x1a90   :  { %v2698_v53 = vmul.f32 1.442695, %v2696_v58 }
0x1a92   :  { %3675 = vpow2.f32 %v2698_v53 }
0x1a93   :  { %3677 = vpow2.f32 %v2586_v18 }
0x1a95   :  { %v2695_v62 = vpop.xlane.xlu0 %2694 }
0x1a96   :  { %v2697_v29 = vsub.f32 %v2689_v8, %v2695_v62 }
0x1a98   :  { %v4824_v23 = vpop.eup %3675  ;;  %v4826_v55 = vpop.f32.mrf.mxu3  ;;  %v2700_v32 = vmul.f32 1.442695, %v2697_v29 }
0x1a99   :  { %v2702_v25 = vsel %vm497_vm15, %v4824_v23, 0.0  ;;  %v3678_v35 = vpop.eup %3677 }
0x1a9a   :  { %2703 = vadd.xlane.f32.xlu0 %v2702_v25  ;;  %3679 = vpow2.f32 %v2700_v32  ;;  %v2591_v61 = vsel %vm497_vm15, %v3678_v35, 0.0 }
0x1aa0   :  { %v4830_v52 = vpop.f32.mrf.mxu3  ;;  %v3680_v37 = vpop.eup %3679 }
0x1aa8   :  { %v2777_v0 = vpop.f32.mrf.mxu3 }
0x1aa9   :  { %v2782_v27 = vmul.f32 0.35355338, %v2777_v0 }
0x1aab   :  { %v2784_v28 = vadd.f32 %v4773_v3, %v2782_v27  ;;  %v2705_v3 = vsel %vm497_vm15, %v3680_v37, 0.0 }
0x1aad   :  { %v2786_v31 = vsel %vm497_vm15, %v2784_v28, -inf }
0x1aae   :  { %2787 = vmax.xlane.f32.xlu1 %v2786_v31 }
0x1ab0   :  { %v2779_v2 = vpop.f32.mrf.mxu3 }
0x1ab1   :  { %v2783_v34 = vmul.f32 0.35355338, %v2779_v2 }
0x1ab3   :  { %v2785_v12 = vadd.f32 %v4780_v9, %v2783_v34 }
0x1ab5   :  { %v2789_v36 = vsel %vm497_vm15, %v2785_v12, -inf }
0x1ab6   :  { %2790 = vmax.xlane.f32.xlu2 %v2789_v36  ;;  %2592 = vadd.xlane.f32.xlu1 %v2591_v61 }
0x1abe   :  { %2706 = vadd.xlane.f32.xlu1 %v2705_v3 }
0x1ace   :  { %2599 = vrot.lane.b32.xlu2 %v4799_v33, %s4012_s9 }
0x1afd   :  { %v2590_v4 = vpop.xlane.xlu0 %2589 }
0x1b0d   :  { %v2704_v54 = vpop.xlane.xlu0 %2703 }
0x1b21   :  { %v2788_v1 = vpop.xlane.xlu1 %2787 }
0x1b22   :  { %v2792_v39 = vsub.f32 %v2784_v28, %v2788_v1 }
0x1b24   :  { %v2794_v30 = vmul.f32 1.442695, %v2792_v39 }
0x1b26   :  { %3681 = vpow2.f32 %v2794_v30 }
0x1b27   :  { %3683 = vrcp.f32 %v2590_v4 }
0x1b29   :  { %v2791_v9 = vpop.xlane.xlu2 %2790  ;;  %v2593_v40 = vpop.xlane.xlu1 %2592 }
0x1b2a   :  { %v2793_v26 = vsub.f32 %v2785_v12, %v2791_v9  ;;  %3685 = vrcp.f32 %v2593_v40  ;;  %v3520_v12 = vld [vmem:[#allocation11 + $0x1] ss:$0 sm:$0xff] }
0x1b2c   :  { %v3682_v42 = vpop.eup %3681  ;;  %v2796_v20 = vmul.f32 1.442695, %v2793_v26 }
0x1b2d   :  { %v2798_v44 = vsel %vm497_vm15, %v3682_v42, 0.0  ;;  %v3684_v13 = vpop.eup %3683 }
0x1b2e   :  { %3687 = vpow2.f32 %v2796_v20  ;;  %2799 = vadd.xlane.f32.xlu0 %v2798_v44  ;;  %v2596_v50 = vmul.f32 %v3684_v13, %v3674_v19 }
0x1b30   :  { %v3686_v21 = vpop.eup %3685 }
0x1b31   :  { %v2597_v46 = vmul.f32 %v3686_v21, %v3678_v35  ;;  %v2600_v49 = vpop.permute.xlu2 %2599  ;;  %v2707_v57 = vpop.xlane.xlu1 %2706 }
0x1b32   :  { %2612 = vmatpush.bf16.msrb.mxu1 %v2600_v49  ;;  %3689 = vrcp.f32 %v2707_v57 }
0x1b33   :  { %v2598_v47 = vpack.c.bf16 %v2597_v46, %v2596_v50  ;;  %3691 = vrcp.f32 %v2704_v54 }
0x1b34   :  { %v3688_v24 = vpop.eup %3687 }
0x1b35   :  { %3388 = vmatmul.msk.bf16.vlgmr.msrb.gmra.mxu1 %vm497_vm15, %v2598_v47  ;;  %v2801_v45 = vsel %vm497_vm15, %v3688_v24, 0.0 }
0x1b36   :  { %2802 = vadd.xlane.f32.xlu1 %v2801_v45  ;;  %v3467_v45 = vld [vmem:[#allocation13 + $0x18] sm:$0xff] }
0x1b38   :  { %v3690_v63 = vpop.eup %3689 }
0x1b39   :  { %v3692_v5 = vpop.eup %3691  ;;  %v2711_v6 = vmul.f32 %v3690_v63, %v3680_v37 }
0x1b3a   :  { %v2710_v11 = vmul.f32 %v3692_v5, %v4824_v23  ;;  %v3394_v23 = vld [vmem:[%s4952_s15 + $0x18] sm:$0xf] }
0x1b3b   :  { %v2740_v25 = vsel %vm623_vm1, %v3394_v23, 0 }
0x1b3c   :  { %v2712_v14 = vpack.c.bf16 %v2711_v6, %v2710_v11  ;;  %2749 = vmatpush.bf16.msra.mxu2 %v2740_v25 }
0x1b42   :  { %2713 = vrot.lane.b32.xlu0 %v4799_v33, %s4013_s12 }
0x1b4f   :  { %2809 = vrot.lane.b32.xlu1 %v4799_v33, %s4014_s23 }
0x1ba1   :  { %v2800_v60 = vpop.xlane.xlu0 %2799 }
0x1ba9   :  { %v2803_v8 = vpop.xlane.xlu1 %2802 }
0x1baa   :  { %3693 = vrcp.f32 %v2803_v8 }
0x1bab   :  { %3695 = vrcp.f32 %v2800_v60 }
0x1bb0   :  { %v3694_v17 = vpop.eup %3693 }
0x1bb1   :  { %v3696_v19 = vpop.eup %3695  ;;  %v2807_v22 = vmul.f32 %v3694_v17, %v3688_v24 }
0x1bb2   :  { %v2614_v7 = vpop.f32.mrf.mxu1  ;;  %v2806_v43 = vmul.f32 %v3696_v19, %v3682_v42 }
0x1bb4   :  { %v2714_v33 = vpop.permute.xlu0 %2713  ;;  %v2808_v53 = vpack.c.bf16 %v2807_v22, %v2806_v43 }
0x1bb5   :  { %2726 = vmatpush.bf16.msra.mxu1 %v2714_v33 }
0x1bb8   :  { %3393 = vmatmul.msk.bf16.vlgmr.msra.gmra.mxu1 %vm497_vm15, %v2712_v14 }
0x1bb9   :  { %2845 = vmatpush.bf16.msrb.mxu1 %v2836_v38 }
0x1bba   :  { %v2616_v15 = vpop.f32.mrf.mxu1 }
0x1bbb   :  { %v2619_v16 = vpack.c.bf16 %v2616_v15, %v2614_v7 }
0x1bbd   :  { %3390 = vmatmul.msk.bf16.vlgmr.msrb.gmra.mxu2 %vm472_vm14, %v2619_v16 }
0x1bbe   :  { %2985 = vmatpush.bf16.msrb.mxu2 %v3467_v45 }
0x1bc1   :  { %v2810_v58 = vpop.permute.xlu1 %2809 }
0x1bc2   :  { %2822 = vmatpush.bf16.msrb.mxu0 %v2810_v58  ;;  %2986 = vmatpush.bf16.msrb.mxu2 %v3466_v48 }
0x1bc5   :  { %3397 = vmatmul.msk.bf16.vlgmr.msrb.gmra.mxu0 %vm497_vm15, %v2808_v53 }
0x1c35   :  { %v2728_v18 = vpop.f32.mrf.mxu1 }
0x1c3d   :  { %v2730_v0 = vpop.f32.mrf.mxu1 }
0x1c3e   :  { %v2733_v62 = vpack.c.bf16 %v2730_v0, %v2728_v18 }
0x1c40   :  { %3395 = vmatmul.msk.bf16.vlgmr.msra.gmra.mxu2 %vm472_vm14, %v2733_v62  ;;  %v2637_v31 = vpop.f32.mrf.mxu2 }
0x1c41   :  { %v2658_v34 = vadd.f32 %v4826_v55, %v2637_v31 }
0x1c42   :  { %v2824_v27 = vpop.f32.mrf.mxu0 }
0x1c48   :  { %v2639_v32 = vpop.f32.mrf.mxu2 }
0x1c49   :  { %v2660_v1 = vadd.f32 %v4830_v52, %v2639_v32 }
0x1c4a   :  { %v2826_v28 = vpop.f32.mrf.mxu0 }
0x1c4b   :  { %v2829_v29 = vpack.c.bf16 %v2826_v28, %v2824_v27 }
0x1c4d   :  { %3399 = vmatmul.msk.bf16.vlgmr.msrb.gmra.mxu1 %vm472_vm14, %v2829_v29 }
0x1cc3   :  { %v2751_v2 = vpop.f32.mrf.mxu2 }
0x1cc4   :  { %v2756_v35 = vadd.f32 %v2751_v2, %v2658_v34  ;;  %v3521_v34 = vld [vmem:[%s4961_s24 + $0x5] ss:$0 sm:$0xff] }
0x1cca   :  { %v2847_v36 = vpop.f32.mrf.mxu1 }
0x1ccb   :  { %v2852_v61 = vadd.f32 %v2847_v36, %v2756_v35  ;;  %v2753_v3 = vpop.f32.mrf.mxu2 }
0x1ccc   :  { %v2757_v30 = vadd.f32 %v2753_v3, %v2660_v1 }
0x1ccd   :  { %v2859_v37 = vadd.f32 %v3520_v12, %v2852_v61 }
0x1ccf   :  { %v4868_v39 = vadd.f32 %v2859_v37, %v4719_v59 }
0x1cd1   :  { %v2867_v4 = vsel %vm256_vm0, %v4868_v39, 0.0 }
0x1cd2   :  { %2868 = vadd.xlane.f32.xlu2 %v2867_v4  ;;  %v2849_v9 = vpop.f32.mrf.mxu1 }
0x1cd3   :  { %v2853_v40 = vadd.f32 %v2849_v9, %v2757_v30 }
0x1cd5   :  { %v2860_v26 = vadd.f32 %v3520_v12, %v2853_v40 }
0x1cd7   :  { %v4873_v55 = vadd.f32 %v2860_v26, %v4724_v56 }
0x1cd9   :  { %v2870_v42 = vsel %vm256_vm0, %v4873_v55, 0.0 }
0x1cda   :  { %2871 = vadd.xlane.f32.xlu0 %v2870_v42 }
0x1d45   :  { %v2869_v20 = vpop.xlane.xlu2 %2868 }
0x1d46   :  { %v2873_v52 = vmul.f32 %v2869_v20, %v4229_v10  ;;  %v3522_v20 = vld [vmem:[%s4962_s25 + $0x5] ss:$0 sm:$0xff] }
0x1d48   :  { %v4879_v59 = vsub.f32 %v4868_v39, %v2873_v52 }
0x1d4a   :  { %v2877_v44 = vmul.f32 %v4879_v59, %v4879_v59  ;;  %v2890_v30 = vmul.f32 %v3521_v34, %v4879_v59  ;;  %v3471_v59 = vld [vmem:[%s4959_s22 + $0x38] sm:$0xff] }
0x1d4b   :  { %3036 = vmatpush.bf16.msrb.mxu3 %v3471_v59 }
0x1d4c   :  { %v2879_v13 = vsel %vm256_vm0, %v2877_v44, 0.0 }
0x1d4d   :  { %2880 = vadd.xlane.f32.xlu1 %v2879_v13  ;;  %v2872_v21 = vpop.xlane.xlu0 %2871 }
0x1d4e   :  { %v2874_v56 = vmul.f32 %v2872_v21, %v4229_v10 }
0x1d50   :  { %v4886_v50 = vsub.f32 %v4873_v55, %v2874_v56 }
0x1d52   :  { %v2878_v46 = vmul.f32 %v4886_v50, %v4886_v50  ;;  %v2891_v40 = vmul.f32 %v3521_v34, %v4886_v50  ;;  %v3470_v50 = vld [vmem:[%s4959_s22 + $0x30] sm:$0xff] }
0x1d53   :  { %3037 = vmatpush.bf16.msrb.mxu3 %v3470_v50 }
0x1d54   :  { %v2882_v49 = vsel %vm256_vm0, %v2878_v46, 0.0  ;;  %v3469_v46 = vld [vmem:[%s4959_s22 + $0x28] sm:$0xff] }
0x1d55   :  { %2883 = vadd.xlane.f32.xlu2 %v2882_v49  ;;  %v3468_v49 = vld [vmem:[%s4959_s22 + $0x20] sm:$0xff] }
0x1d57   :  { %3038 = vmatpush.bf16.msrb.mxu3 %v3469_v46 }
0x1d5b   :  { %3039 = vmatpush.bf16.msrb.mxu3 %v3468_v49 }
0x1dc0   :  { %v2881_v47 = vpop.xlane.xlu1 %2880 }
0x1dc1   :  { %v2885_v24 = vmul.f32 0.032258064, %v2881_v47 }
0x1dc3   :  { %3697 = vrsqrt.f32 %v2885_v24  ;;  %vm2899_vm14 = vcmp.eq.f32.partialorder %v2885_v24, inf  ;;  %v2902_v15 = vand.u32 2147483648, %v2885_v24  ;;  %vm2901_vm15 = vcmp.eq.f32.partialorder %v2885_v24, 0.0 }
0x1dc8   :  { %v2884_v51 = vpop.xlane.xlu2 %2883 }
0x1dc9   :  { %v3698_v54 = vpop.eup %3697  ;;  %v2886_v57 = vmul.f32 0.032258064, %v2884_v51 }
0x1dca   :  { %v2893_v60 = vmul.f32 %v3698_v54, %v2885_v24 }
0x1dcb   :  { %3699 = vrsqrt.f32 %v2886_v57  ;;  %vm2911_vm1 = vcmp.eq.f32.partialorder %v2886_v57, inf  ;;  %v2914_v23 = vand.u32 2147483648, %v2886_v57  ;;  %vm2913_vm5 = vcmp.eq.f32.partialorder %v2886_v57, 0.0 }
0x1dcc   :  { %v2894_v63 = vmul.f32 %v3698_v54, %v2893_v60 }
0x1dce   :  { %v2895_v5 = vmul.f32 0.5, %v2894_v63  ;;  %v3524_v63 = vld [vmem:[#allocation16 + $0x1] ss:$0 sm:$0xff] }
0x1dd0   :  { %v2896_v6 = vsub.f32 1.5, %v2895_v5 }
0x1dd1   :  { %v3700_v7 = vpop.eup %3699 }
0x1dd2   :  { %v2897_v8 = vmul.f32 %v3698_v54, %v2896_v6  ;;  %v2905_v11 = vmul.f32 %v3700_v7, %v2886_v57 }
0x1dd4   :  { %v2898_v33 = vmul.f32 %v2897_v8, %v2885_v24  ;;  %v2906_v14 = vmul.f32 %v3700_v7, %v2905_v11 }
0x1dd6   :  { %v2900_v16 = vsel %vm2899_vm14, %v2885_v24, %v2898_v33  ;;  %v2907_v17 = vmul.f32 0.5, %v2906_v14  ;;  %v3523_v24 = vld [vmem:[#allocation14 + $0x1] ss:$0 sm:$0xff] }
0x1dd7   :  { %v2903_v19 = vsel %vm2901_vm15, %v2902_v15, %v2900_v16 }
0x1dd8   :  { %v2916_v22 = vadd.f32 1e-06, %v2903_v19  ;;  %v2908_v43 = vsub.f32 1.5, %v2907_v17 }
0x1dda   :  { %3701 = vrcp.f32 %v2916_v22  ;;  %v2909_v58 = vmul.f32 %v3700_v7, %v2908_v43  ;;  %v2929_v31 = vand.u32 2147483648, %v2916_v22  ;;  %vm2923_vm7 = vweird.f32 %v2916_v22 }
0x1ddb   :  { %v2927_v32 = vand.u32 2147483647, %v2916_v22 }
0x1ddc   :  { %v2910_v53 = vmul.f32 %v2909_v58, %v2886_v57  ;;  %v2930_v36 = vor.u32 1.1754944e-38, %v2929_v31 }
0x1ddd   :  { %vm2928_vm9 = vcmp.eq.f32.partialorder %v2927_v32, 8.507059e+37 }
0x1dde   :  { %v2912_v25 = vsel %vm2911_vm1, %v2886_v57, %v2910_v53 }
0x1ddf   :  { %v2915_v41 = vsel %vm2913_vm5, %v2914_v23, %v2912_v25 }
0x1de0   :  { %v3702_v38 = vpop.eup %3701  ;;  %v2917_v18 = vadd.f32 1e-06, %v2915_v41 }
0x1de1   :  { %v2919_v0 = vmul.f32 %v3702_v38, %v2916_v22  ;;  %vm2924_vm6 = vweird.f32 %v3702_v38 }
0x1de2   :  { %3703 = vrcp.f32 %v2917_v18  ;;  %vm2925_vm8 = vmor %vm2923_vm7, %vm2924_vm6  ;;  %v2944_v61 = vand.u32 2147483648, %v2917_v18  ;;  %v2942_v3 = vand.u32 2147483647, %v2917_v18  ;;  %vm2938_vm11 = vweird.f32 %v2917_v18 }
0x1de3   :  { %v2920_v62 = vsub.f32 1.0, %v2919_v0 }
0x1de4   :  { %v2945_v9 = vor.u32 1.1754944e-38, %v2944_v61  ;;  %vm2943_vm13 = vcmp.eq.f32.partialorder %v2942_v3, 8.507059e+37 }
0x1de5   :  { %v2921_v27 = vmul.f32 %v3702_v38, %v2920_v62 }
0x1de7   :  { %v2922_v28 = vadd.f32 %v3702_v38, %v2921_v27 }
0x1de8   :  { %v3704_v29 = vpop.eup %3703 }
0x1de9   :  { %v2934_v2 = vmul.f32 %v3704_v29, %v2917_v18  ;;  %v2926_v35 = vsel %vm2925_vm8, %v3702_v38, %v2922_v28  ;;  %vm2939_vm10 = vweird.f32 %v3704_v29 }
0x1dea   :  { %v2931_v1 = vsel %vm2928_vm9, %v2930_v36, %v2926_v35  ;;  %vm2940_vm12 = vmor %vm2938_vm11, %vm2939_vm10 }
0x1deb   :  { %v2935_v12 = vsub.f32 1.0, %v2934_v2  ;;  %v2932_v26 = vmul.f32 %v2931_v1, %v2890_v30 }
0x1ded   :  { %v2936_v37 = vmul.f32 %v3704_v29, %v2935_v12  ;;  %v2951_v13 = vadd.f32 %v3522_v20, %v2932_v26 }
0x1def   :  { %v2937_v4 = vadd.f32 %v3704_v29, %v2936_v37 }
0x1df1   :  { %v2941_v42 = vsel %vm2940_vm12, %v3704_v29, %v2937_v4 }
0x1df2   :  { %v2946_v52 = vsel %vm2943_vm13, %v2945_v9, %v2941_v42 }
0x1df3   :  { %v2947_v44 = vmul.f32 %v2946_v52, %v2891_v40 }
0x1df5   :  { %v2952_v21 = vadd.f32 %v3522_v20, %v2947_v44 }
0x1df7   :  { %v2953_v56 = vpack.c.bf16 %v2952_v21, %v2951_v13  ;;  %v3525_v13 = vld [vmem:[%s4963_s26] ss:$0 sm:$0xff]  ;;  %s4015_s26 = smov [#allocation19]  }
0x1df8   :  { %s3149_s8 = sshll.u32 %s4015_s26, 4  ;;  %s3150_s8 = int_to_ptr.vmem [resolvable:$true] %s3149_s8 }
0x1df9   :  { %3410 = vmatmul.msk.bf16.vlgmr.msrb.gmra.mxu2 %vm256_vm0, %v2953_v56 }
0x1e7c   :  { %v2988_v47 = vpop.f32.mrf.mxu2 }
0x1e7d   :  { %v2989_v45 = vadd.f32 %v3523_v24, %v2988_v47 }
0x1e7f   :  { %v2993_v54 = vmax.f32 %v2989_v45, 0.0  ;;  %v3526_v45 = vld [vmem:[#allocation17] ss:$0 sm:$0xff] }
0x1e84   :  { %v2990_v48 = vpop.f32.mrf.mxu2 }
0x1e85   :  { %v2991_v51 = vadd.f32 %v3523_v24, %v2990_v48 }
0x1e87   :  { %v2994_v57 = vmax.f32 %v2991_v51, 0.0 }
0x1e89   :  { %v2995_v60 = vpack.c.bf16 %v2994_v57, %v2993_v54 }
0x1e8b   :  { %3435 = vmatmul.msk.bf16.vlgmr.msrb.gmra.mxu3 %vm1625_vm2, %v2995_v60 }
0x1f0e   :  { %v3041_v5 = vpop.f32.mrf.mxu3 }
0x1f0f   :  { %v3046_v6 = vadd.f32 %v3041_v5, %v4868_v39 }
0x1f11   :  { %v3053_v7 = vadd.f32 %v3524_v63, %v3046_v6 }
0x1f13   :  { %v3057_v8 = vsel %vm256_vm0, %v3053_v7, 0.0 }
0x1f14   :  { %3058 = vadd.xlane.f32.xlu2 %v3057_v8 }
0x1f16   :  { %v3043_v11 = vpop.f32.mrf.mxu3 }
0x1f17   :  { %v3047_v33 = vadd.f32 %v3043_v11, %v4873_v55 }
0x1f19   :  { %v3054_v14 = vadd.f32 %v3524_v63, %v3047_v33 }
0x1f1b   :  { %v3060_v15 = vsel %vm256_vm0, %v3054_v14, 0.0 }
0x1f1c   :  { %3061 = vadd.xlane.f32.xlu0 %v3060_v15 }
0x1f87   :  { %v3059_v16 = vpop.xlane.xlu2 %3058 }
0x1f88   :  { %v3063_v17 = vmul.f32 %v3059_v16, %v4229_v10 }
0x1f8a   :  { %v3065_v19 = vsub.f32 %v3053_v7, %v3063_v17 }
0x1f8c   :  { %v3067_v22 = vmul.f32 %v3065_v19, %v3065_v19  ;;  %v3080_v49 = vmul.f32 %v3525_v13, %v3065_v19 }
0x1f8e   :  { %v3069_v43 = vsel %vm256_vm0, %v3067_v22, 0.0 }
0x1f8f   :  { %3070 = vadd.xlane.f32.xlu2 %v3069_v43  ;;  %v3062_v39 = vpop.xlane.xlu0 %3061 }
0x1f90   :  { %v3064_v58 = vmul.f32 %v3062_v39, %v4229_v10 }
0x1f92   :  { %v4920_v53 = vsub.f32 %v3054_v14, %v3064_v58 }
0x1f94   :  { %v3068_v55 = vmul.f32 %v4920_v53, %v4920_v53  ;;  %v3081_v8 = vmul.f32 %v3525_v13, %v4920_v53 }
0x1f96   :  { %v3072_v23 = vsel %vm256_vm0, %v3068_v55, 0.0 }
0x1f97   :  { %3073 = vadd.xlane.f32.xlu0 %v3072_v23 }
0x2002   :  { %v3071_v25 = vpop.xlane.xlu2 %3070 }
0x2003   :  { %v3075_v41 = vmul.f32 0.032258064, %v3071_v25 }
0x2005   :  { %3705 = vrsqrt.f32 %v3075_v41  ;;  %vm3089_vm2 = vcmp.eq.f32.partialorder %v3075_v41, inf  ;;  %v3092_v35 = vand.u32 2147483648, %v3075_v41  ;;  %vm3091_vm3 = vcmp.eq.f32.partialorder %v3075_v41, 0.0 }
0x200a   :  { %v3074_v38 = vpop.xlane.xlu0 %3073 }
0x200b   :  { %v3706_v18 = vpop.eup %3705  ;;  %v3076_v0 = vmul.f32 0.032258064, %v3074_v38 }
0x200c   :  { %v3083_v62 = vmul.f32 %v3706_v18, %v3075_v41 }
0x200d   :  { %3707 = vrsqrt.f32 %v3076_v0  ;;  %vm3101_vm4 = vcmp.eq.f32.partialorder %v3076_v0, inf  ;;  %v3104_v4 = vand.u32 2147483648, %v3076_v0  ;;  %vm3103_vm14 = vcmp.eq.f32.partialorder %v3076_v0, 0.0 }
0x200e   :  { %v3084_v27 = vmul.f32 %v3706_v18, %v3083_v62 }
0x2010   :  { %v3085_v28 = vmul.f32 0.5, %v3084_v27 }
0x2012   :  { %v3086_v29 = vsub.f32 1.5, %v3085_v28 }
0x2013   :  { %v3708_v10 = vpop.eup %3707 }
0x2014   :  { %v3087_v31 = vmul.f32 %v3706_v18, %v3086_v29  ;;  %v3095_v32 = vmul.f32 %v3708_v10, %v3076_v0 }
0x2016   :  { %v3088_v2 = vmul.f32 %v3087_v31, %v3075_v41  ;;  %v3096_v34 = vmul.f32 %v3708_v10, %v3095_v32 }
0x2018   :  { %v3090_v12 = vsel %vm3089_vm2, %v3075_v41, %v3088_v2  ;;  %v3097_v36 = vmul.f32 0.5, %v3096_v34 }
0x2019   :  { %v3093_v61 = vsel %vm3091_vm3, %v3092_v35, %v3090_v12 }
0x201a   :  { %v3106_v37 = vadd.f32 1e-06, %v3093_v61  ;;  %v3098_v3 = vsub.f32 1.5, %v3097_v36 }
0x201c   :  { %3709 = vrcp.f32 %v3106_v37  ;;  %v3099_v1 = vmul.f32 %v3708_v10, %v3098_v3  ;;  %v3119_v44 = vand.u32 2147483648, %v3106_v37  ;;  %v3117_v56 = vand.u32 2147483647, %v3106_v37 }
0x201d   :  { %vm3113_vm1 = vweird.f32 %v3106_v37 }
0x201e   :  { %v3100_v30 = vmul.f32 %v3099_v1, %v3076_v0  ;;  %v3120_v46 = vor.u32 1.1754944e-38, %v3119_v44  ;;  %vm3118_vm6 = vcmp.eq.f32.partialorder %v3117_v56, 8.507059e+37 }
0x2020   :  { %v3102_v9 = vsel %vm3101_vm4, %v3076_v0, %v3100_v30 }
0x2021   :  { %v3105_v40 = vsel %vm3103_vm14, %v3104_v4, %v3102_v9 }
0x2022   :  { %v3710_v26 = vpop.eup %3709  ;;  %v3107_v42 = vadd.f32 1e-06, %v3105_v40 }
0x2023   :  { %v3109_v20 = vmul.f32 %v3710_v26, %v3106_v37  ;;  %vm3114_vm15 = vweird.f32 %v3710_v26 }
0x2024   :  { %3711 = vrcp.f32 %v3107_v42  ;;  %vm3115_vm5 = vmor %vm3113_vm1, %vm3114_vm15  ;;  %v3134_v57 = vand.u32 2147483648, %v3107_v42  ;;  %v3132_v63 = vand.u32 2147483647, %v3107_v42  ;;  %vm3128_vm8 = vweird.f32 %v3107_v42 }
0x2025   :  { %v3110_v52 = vsub.f32 1.0, %v3109_v20 }
0x2026   :  { %v3135_v7 = vor.u32 1.1754944e-38, %v3134_v57  ;;  %vm3133_vm10 = vcmp.eq.f32.partialorder %v3132_v63, 8.507059e+37 }
0x2027   :  { %v3111_v21 = vmul.f32 %v3710_v26, %v3110_v52 }
0x2029   :  { %v3112_v59 = vadd.f32 %v3710_v26, %v3111_v21 }
0x202a   :  { %v3712_v50 = vpop.eup %3711 }
0x202b   :  { %v3116_v47 = vsel %vm3115_vm5, %v3710_v26, %v3112_v59  ;;  %v3124_v24 = vmul.f32 %v3712_v50, %v3107_v42  ;;  %vm3129_vm7 = vweird.f32 %v3712_v50 }
0x202c   :  { %v3121_v48 = vsel %vm3118_vm6, %v3120_v46, %v3116_v47  ;;  %vm3130_vm9 = vmor %vm3128_vm8, %vm3129_vm7 }
0x202d   :  { %v3122_v51 = vmul.f32 %v3121_v48, %v3080_v49  ;;  %v3125_v54 = vsub.f32 1.0, %v3124_v24 }
0x202f   :  { %v3126_v60 = vmul.f32 %v3712_v50, %v3125_v54  ;;  %v3141_v5 = vadd.f32 %v3526_v45, %v3122_v51 }
0x2031   :  { %v3127_v6 = vadd.f32 %v3712_v50, %v3126_v60  ;;  %3143 = vst.msk [vmem:[#allocation19] sm:$0xff] %vm256_vm0, %v3141_v5 }
0x2033   :  { %v3131_v11 = vsel %vm3130_vm9, %v3712_v50, %v3127_v6 }
0x2034   :  { %v3136_v33 = vsel %vm3133_vm10, %v3135_v7, %v3131_v11 }
0x2035   :  { %v3137_v14 = vmul.f32 %v3136_v33, %v3081_v8 }
0x2037   :  { %v3142_v15 = vadd.f32 %v3526_v45, %v3137_v14 }
0x2039   :  { %3144 = vst.msk [vmem:[#allocation19 + $0x8] sm:$0xff] %vm256_vm0, %v3142_v15 }
0x203a   :  { %3157 = dma.vmem_to_hbm [thread:$0]  %s3150_s8, 256, %s3152_s18, [#allocation4], %s5005_s2, %s5005_s2, %s5004_s10  }
0x203b   :  { %3993 = dma.done.wait [#allocation4], 256  }
0x203c   :  { %3994 = vsyncadd [#allocation4], 4294967040 }
0x203d   :  { %3162 = vsyncpa [#allocation3], 1 }
0x203e   :  { %3163 = vsyncpa [#allocation6], 1 }
0x203f   :  { %3164 = vsyncpa [#allocation9], 1 }
0x2040   :  { %3165 = vsyncpa [#allocation12], 1 }
0x2041   :  { %3166 = vsyncpa [#allocation15], 1 }
0x2042   :  { %3167 = vsyncpa [#allocation18], 1 }
0x2043   :  { %3168 = vsyncpa [#allocation4], 1 }

</bundles_post_ra>
